<compile_context>
chip_gen: v7x
topology: tpu7x:2x2x1
jax: 0.10.0
libtpu: 0.0.40
codegen_flags: <defaults>
</compile_context>

<pallas_src>
import functools

import jax
import jax.numpy as jnp
from jax.experimental import pallas as pl
from jax.experimental.pallas import tpu as pltpu


# --------------------------------------------------------------------------
# Generation-aware VMEM / tile budgeting
# --------------------------------------------------------------------------
def _hw_caps():
    """Returns (max_query_tile, vmem_limit_bytes, tile_budget_bytes)."""
    kind = ""
    try:
        kind = jax.devices()[0].device_kind.lower()
    except Exception:
        pass
    vmem_cap = None
    try:
        vmem_cap = int(pltpu.get_tpu_info().vmem_capacity_bytes)
    except Exception:
        vmem_cap = None
    if vmem_cap is None:
        # v7x has 64 MiB per TensorCore; v5e / v6e have 128 MiB.
        vmem_cap = (64 << 20) if "v7" in kind else (128 << 20)
    is_v5e = ("v5 lite" in kind) or ("v5e" in kind) or ("v5lite" in kind)
    # v5e: 128-wide MXU + 16 MiB scoped default -> a big TQ buys nothing.
    max_tq = 256 if is_v5e else 512
    vmem_limit = min(max(vmem_cap - (16 << 20), 16 << 20), 64 << 20)
    return max_tq, vmem_limit, vmem_limit // 2


def _vmem_estimate(tq, tk, d_in, d_out, num_heads, cd_bytes, out_bytes):
    """Rough per-program VMEM bytes for a (tq, tk) tile choice."""
    b = 0
    b += 2 * tq * d_in * cd_bytes            # q block (double-buffered)
    b += 2 * tk * d_in * cd_bytes            # k block
    b += 2 * tk * d_out * cd_bytes           # v block
    b += 2 * d_out * d_out * cd_bytes        # to_out weight (worst case 2 bufs)
    b += 2 * tq * d_out * out_bytes          # output block
    b += tq * d_out * 4                      # f32 acc slab scratch
    b += 2 * num_heads * tq * 128 * 4        # m / l scratch (lane padded)
    b += 3 * tq * max(tk, 128) * 4           # sim / p / temporaries
    return b


def _pick_tiles(n, m, d_in, d_out, num_heads, cd_bytes, out_bytes,
                max_tq, budget, min_align=8, max_kv_tile=None):
    cand = (1024, 512, 256, 128, 64, 32, 16, 8)
    max_tk = max_kv_tile if max_kv_tile is not None else 2048
    tq_cands = [t for t in cand
                if t <= max_tq and t % min_align == 0 and n % t == 0] or [n]
    tk_cands = [t for t in cand
                if t <= max_tk and t % min_align == 0 and m % t == 0] or [m]
    for tq in tq_cands:                       # prefer big TQ: fewer K/V re-reads
        for tk in tk_cands:                   # then big TK: fewer kv grid steps
            if _vmem_estimate(tq, tk, d_in, d_out, num_heads,
                              cd_bytes, out_bytes) <= budget:
                return tq, tk
    return tq_cands[-1], tk_cands[-1]


# --------------------------------------------------------------------------
# Fused kernel: per (batch, q-row-tile) program, looped over KV tiles via the
# innermost "arbitrary" grid axis:
#   QK^T -> online softmax -> P@V into a per-head lane slice of an f32 slab,
# then (at the last KV step) normalize + to_out Linear + lane-dense store.
# --------------------------------------------------------------------------
def _fused_attention_kernel(q_ref, k_ref, v_ref, wT_ref, b_ref, o_ref,
                            m_ref, l_ref, acc_ref, *,
                            num_heads, head_dim, head_vdim, scale):
    # q_ref : (1, TQ, D_in)   k_ref : (1, TK, D_in)   v_ref : (1, TK, D_out)
    # wT_ref: (D_out, D_out)  b_ref : (1, D_out)      o_ref : (1, TQ, D_out)
    # m_ref / l_ref: (H, TQ, 1) f32 running max / sum; acc_ref: (TQ, D_out) f32
    kv = pl.program_id(2)

    @pl.when(kv == 0)
    def _init():
        m_ref[...] = jnp.full_like(m_ref, -jnp.inf)
        l_ref[...] = jnp.zeros_like(l_ref)
        acc_ref[...] = jnp.zeros_like(acc_ref)

    # Fold the softmax scale into q (TQ*D_in multiplies instead of TQ*M).
    # Note: with a bf16 compute dtype the scale rounds in bf16 (acceptable).
    q = q_ref[0] * scale
    k = k_ref[0]
    v = v_ref[0]

    for h in range(num_heads):               # static unroll over heads
        sl_q = slice(h * head_dim, (h + 1) * head_dim)
        sl_v = slice(h * head_vdim, (h + 1) * head_vdim)
        # TODO(synk): head_dim/head_vdim < 128 forces sub-lane head slices; a
        # head-major layout would still need a relayout before to_out.
        qh = q[:, sl_q]                       # (TQ, HD)
        kh = k[:, sl_q]                       # (TK, HD)
        vh = v[:, sl_v]                       # (TK, VD)

        # QK^T on the input-dtype (bf16) MXU path, f32 accumulation.
        sim = jax.lax.dot_general(
            qh, kh, (((1,), (1,)), ((), ())),
            preferred_element_type=jnp.float32)            # (TQ, TK) f32

        # Online-softmax update; running stats live in VMEM scratch.
        m_prev = m_ref[h]                                  # (TQ, 1)
        m_new = jnp.maximum(m_prev, jnp.max(sim, axis=-1, keepdims=True))
        alpha = jnp.exp(m_prev - m_new)                    # (TQ, 1)
        p = jnp.exp(sim - m_new)                           # (TQ, TK) f32
        l_ref[h] = alpha * l_ref[h] + jnp.sum(p, axis=-1, keepdims=True)
        m_ref[h] = m_new

        # P@V in bf16 (cast right after exp), accumulate into this head's lane
        # slice of the shared f32 slab (no list, no register concat).
        pv = jnp.dot(p.astype(v.dtype), vh,
                     preferred_element_type=jnp.float32)   # (TQ, VD) f32
        acc_ref[:, sl_v] = alpha * acc_ref[:, sl_v] + pv

    @pl.when(kv == pl.num_programs(2) - 1)
    def _finalize():
        # Normalize each head by its softmax denominator (EUP approx recip),
        # then fuse the to_out Linear over the merged (TQ, D_out) slab and
        # store lane-dense over the full D_out width.
        for h in range(num_heads):
            sl_v = slice(h * head_vdim, (h + 1) * head_vdim)
            inv = pl.reciprocal(l_ref[h], approx=True)     # (TQ, 1)
            acc_ref[:, sl_v] = acc_ref[:, sl_v] * inv
        slab = acc_ref[...].astype(wT_ref.dtype)           # bf16 -> full-rate MXU
        y = jnp.dot(slab, wT_ref[...],
                    preferred_element_type=jnp.float32) + b_ref[...]
        o_ref[0] = y.astype(o_ref.dtype)
        # TODO(synk): if D_out < 128 in production, pad to_out to a 128-lane
        # multiple to avoid masked partial stores on the output path.


def _make_call(*, B, N, M, D_in, D_out, TQ, TK, num_heads, head_dim, head_vdim,
               scale, q_b, k_b, out_dtype, compute_dtype, vmem_limit,
               single_buffer_consts):
    kernel = functools.partial(
        _fused_attention_kernel, num_heads=num_heads, head_dim=head_dim,
        head_vdim=head_vdim, scale=scale)

    # RABlock has batch-1 q, DMABlock batch-1 k/v: broadcast via index maps.
    q_map = ((lambda b, i, kv: (b, i, 0)) if q_b == B
             else (lambda b, i, kv: (0, i, 0)))
    kv_map = ((lambda b, i, kv: (b, kv, 0)) if k_b == B
              else (lambda b, i, kv: (0, kv, 0)))
    const_map = lambda b, i, kv: (0, 0)

    # Grid-invariant to_out weight / bias: single-buffer to halve their VMEM.
    const_kwargs = (dict(pipeline_mode=pl.Buffered(1))
                    if single_buffer_consts else {})

    cd_bytes = jnp.dtype(compute_dtype).itemsize
    out_bytes = jnp.dtype(out_dtype).itemsize
    flops = 2 * B * N * M * (D_in + D_out) + 2 * B * N * D_out * D_out
    transcendentals = B * N * M * num_heads
    bytes_accessed = ((B * N * D_in + B * M * (D_in + D_out)) * cd_bytes
                      + D_out * D_out * cd_bytes + D_out * 4
                      + B * N * D_out * out_bytes)

    return pl.pallas_call(
        kernel,
        out_shape=jax.ShapeDtypeStruct((B, N, D_out), out_dtype),
        grid_spec=pltpu.PrefetchScalarGridSpec(
            num_scalar_prefetch=0,
            grid=(B, N // TQ, M // TK),
            in_specs=[
                pl.BlockSpec((1, TQ, D_in), q_map),
                pl.BlockSpec((1, TK, D_in), kv_map),
                pl.BlockSpec((1, TK, D_out), kv_map),
                pl.BlockSpec((D_out, D_out), const_map, **const_kwargs),
                pl.BlockSpec((1, D_out), const_map, **const_kwargs),
            ],
            out_specs=pl.BlockSpec((1, TQ, D_out), lambda b, i, kv: (b, i, 0)),
            scratch_shapes=[
                pltpu.VMEM((num_heads, TQ, 1), jnp.float32),   # running max m
                pltpu.VMEM((num_heads, TQ, 1), jnp.float32),   # running sum l
                pltpu.VMEM((TQ, D_out), jnp.float32),          # head-merged acc
            ]),
        compiler_params=pltpu.CompilerParams(
            dimension_semantics=("parallel", "parallel", "arbitrary"),
            vmem_limit_bytes=int(vmem_limit)),
        cost_estimate=pl.CostEstimate(
            flops=int(flops), transcendentals=int(transcendentals),
            bytes_accessed=int(bytes_accessed)),
    )


def fused_attention(q, k, v, wT, bias2d, *, num_heads, head_dim, head_vdim,
                    scale, compute_dtype=jnp.bfloat16, max_kv_tile=None):
    """q: (Bq, N, D_in), k: (Bk, M, D_in), v: (Bk, M, D_out) -> (B, N, D_out)."""
    q_b, N, D_in = q.shape
    k_b, M, _ = k.shape
    D_out = v.shape[-1]
    assert q_b == k_b or min(q_b, k_b) == 1, (
        "Batch sizes must match, or one of q / kv must have batch 1")
    B = max(q_b, k_b)
    out_dtype = q.dtype

    # bf16 activations / weight -> full-rate MXU on v5e/v6e/v7x (f32
    # accumulation requested inside the kernel); also halves K/V DMA bytes.
    qc = q.astype(compute_dtype)
    kc = k.astype(compute_dtype)
    vc = v.astype(compute_dtype)
    wTc = wT.astype(compute_dtype)
    bc = bias2d.astype(jnp.float32)          # bias added post-accumulate in f32

    cd_bytes = jnp.dtype(compute_dtype).itemsize
    min_align = 32 if cd_bytes == 1 else (16 if cd_bytes == 2 else 8)
    max_tq, vmem_limit, budget = _hw_caps()
    TQ, TK = _pick_tiles(N, M, D_in, D_out, num_heads, cd_bytes,
                         jnp.dtype(out_dtype).itemsize, max_tq, budget,
                         min_align=min_align, max_kv_tile=max_kv_tile)

    common = dict(B=B, N=N, M=M, D_in=D_in, D_out=D_out, TQ=TQ, TK=TK,
                  num_heads=num_heads, head_dim=head_dim, head_vdim=head_vdim,
                  scale=scale, q_b=q_b, k_b=k_b, out_dtype=out_dtype,
                  compute_dtype=compute_dtype, vmem_limit=vmem_limit)
    try:
        return _make_call(single_buffer_consts=True, **common)(qc, kc, vc, wTc, bc)
    except Exception:
        # pl.Buffered(1) single-buffering unavailable on this jax version /
        # backend: fall back to default double-buffered constant blocks.
        return _make_call(single_buffer_consts=False, **common)(qc, kc, vc, wTc, bc)


# --------------------------------------------------------------------------
# Module wrapper mirroring AttentionBase.forward (eval-mode semantics)
# --------------------------------------------------------------------------
class AttentionBasePallas:
    def __init__(self, in_features, out_features, num_heads, key, dropout=0.0,
                 compute_dtype=jnp.bfloat16):
        assert in_features % num_heads == 0 and out_features % num_heads == 0, (
            "Expected in_features and out_features to be divisible by num_heads")
        self.in_features = in_features
        self.out_features = out_features
        self.num_heads = num_heads
        self.head_dim = in_features // num_heads
        self.head_vdim = out_features // num_heads
        self.scale = float(self.head_dim ** (-0.5))
        self.compute_dtype = compute_dtype
        self.dropout = float(dropout)        # eval mode: nn.Dropout == identity
        # Deterministic init matching nn.Linear(out_features, out_features).
        k_w, k_b = jax.random.split(key)
        bound = 1.0 / (out_features ** 0.5)
        self.to_out_w = jax.random.uniform(
            k_w, (out_features, out_features), jnp.float32, -bound, bound)
        self.to_out_b = jax.random.uniform(
            k_b, (out_features,), jnp.float32, -bound, bound)
        # Hoisted once: transposed weight in the compute dtype + f32 2-D bias.
        self.to_out_wT = jnp.asarray(self.to_out_w.T).astype(compute_dtype)
        self.to_out_b2d = self.to_out_b.reshape(1, out_features)

    def __call__(self, q, k, v, *, training=False, max_kv_tile=None):
        if training and self.dropout > 0.0:
            # TODO(synk): training-mode attention dropout needs in-kernel
            # pltpu.prng_random_bits masking; only eval semantics implemented.
            raise NotImplementedError("training-mode dropout not implemented")
        d_in, d_out = self.in_features, self.out_features
        (q_b, q_n, q_d), (k_b, k_m, k_d), (v_b, v_m, v_d) = q.shape, k.shape, v.shape
        assert k_b == v_b, "Expected same batch size for k, v"
        assert q_d == k_d == d_in, f"Expected q, k to have {d_in} features"
        assert v_d == d_out, f"Expected v to have {d_out} features"
        assert k_m == v_m, "Expected k, v to have same length"
        return fused_attention(
            q, k, v, self.to_out_wT, self.to_out_b2d,
            num_heads=self.num_heads, head_dim=self.head_dim,
            head_vdim=self.head_vdim, scale=self.scale,
            compute_dtype=self.compute_dtype, max_kv_tile=max_kv_tile)


# --------------------------------------------------------------------------
def _reference(q, k, v, mod: AttentionBasePallas):
    """Pure-JAX f32 reference mirroring AttentionBase.forward (eval mode)."""
    h, hd, vd = mod.num_heads, mod.head_dim, mod.head_vdim
    B = max(q.shape[0], k.shape[0])
    n, m = q.shape[1], k.shape[1]
    q = jnp.broadcast_to(q, (B, n, q.shape[-1]))
    k = jnp.broadcast_to(k, (B, m, k.shape[-1]))
    v = jnp.broadcast_to(v, (B, m, v.shape[-1]))
    qh = q.reshape(B, n, h, hd).transpose(0, 2, 1, 3)
    kh = k.reshape(B, m, h, hd).transpose(0, 2, 1, 3)
    vh = v.reshape(B, m, h, vd).transpose(0, 2, 1, 3)
    sim = jnp.einsum('bhil,bhjl->bhij', qh, kh) * mod.scale
    att = jax.nn.softmax(sim, axis=-1)
    out = jnp.einsum('bhil,bhlj->bhij', att, vh)
    out = out.transpose(0, 2, 1, 3).reshape(B, n, mod.out_features)
    return out @ mod.to_out_w.T + mod.to_out_b


if __name__ == "__main__":
    key = jax.random.PRNGKey(0)
    k_q, k_k, k_v, k_p, k_q2, k_k2, k_v2 = jax.random.split(key, 7)

    in_features, out_features, num_heads = 32, 32, 4
    mod = AttentionBasePallas(in_features, out_features, num_heads, k_p)

    # bf16 compute path compared against the exact f32 reference.
    tol = dict(atol=8e-2, rtol=5e-2)

    # 1) SABlock-style: matching batches, single KV tile.
    batch, n, m = 2, 8, 8
    q1 = jax.random.normal(k_q, (batch, n, in_features), jnp.float32)
    k1 = jax.random.normal(k_k, (batch, m, in_features), jnp.float32)
    v1 = jax.random.normal(k_v, (batch, m, out_features), jnp.float32)
    out1 = mod(q1, k1, v1)
    jax.block_until_ready(out1)
    assert out1.shape == (batch, n, out_features)
    ref1 = _reference(q1, k1, v1, mod)
    assert jnp.allclose(out1, ref1, **tol), float(jnp.max(jnp.abs(out1 - ref1)))

    # 2) RABlock-style: batch-1 q broadcast + multi-step online softmax
    #    (KV length 32 forced into 16-wide tiles -> 2 "arbitrary" grid steps).
    m2 = 32
    q2 = jax.random.normal(k_q2, (1, n, in_features), jnp.float32)
    k2 = jax.random.normal(k_k2, (batch, m2, in_features), jnp.float32)
    v2 = jax.random.normal(k_v2, (batch, m2, out_features), jnp.float32)
    out2 = mod(q2, k2, v2, max_kv_tile=16)
    jax.block_until_ready(out2)
    assert out2.shape == (batch, n, out_features)
    ref2 = _reference(q2, k2, v2, mod)
    assert jnp.allclose(out2, ref2, **tol), float(jnp.max(jnp.abs(out2 - ref2)))

    print("KERNEL_OK")
</pallas_src>

<mosaic_0001>
module attributes {stable_mosaic.version = 11 : i64} {
  func.func @_fused_attention_kernel(%arg0: i32, %arg1: i32, %arg2: i32, %arg3: memref<1x8x32xbf16, #tpu.memory_space<vmem>>, %arg4: memref<1x8x32xbf16, #tpu.memory_space<vmem>>, %arg5: memref<1x8x32xbf16, #tpu.memory_space<vmem>>, %arg6: memref<32x32xbf16, #tpu.memory_space<vmem>>, %arg7: memref<1x32xf32, #tpu.memory_space<vmem>>, %arg8: memref<1x8x32xf32, #tpu.memory_space<vmem>>, %arg9: memref<4x8x1xf32, #tpu.memory_space<vmem>>, %arg10: memref<4x8x1xf32, #tpu.memory_space<vmem>>, %arg11: memref<8x32xf32, #tpu.memory_space<vmem>>) attributes {dimension_semantics = [#tpu.dimension_semantics<parallel>, #tpu.dimension_semantics<parallel>, #tpu.dimension_semantics<arbitrary>], iteration_bounds = array<i64: 2, 1, 1>, scalar_prefetch = 0 : i64, scratch_operands = 3 : i64, tpu.core_type = #tpu.core_type<tc>, window_params = [{transform_indices = @transform_0, window_bounds = array<i64: 1, 8, 32>}, {transform_indices = @transform_1, window_bounds = array<i64: 1, 8, 32>}, {transform_indices = @transform_2, window_bounds = array<i64: 1, 8, 32>}, {pipeline_mode = #tpu.pipeline_mode<synchronous>, transform_indices = @transform_3, window_bounds = array<i64: 32, 32>}, {pipeline_mode = #tpu.pipeline_mode<synchronous>, transform_indices = @transform_4, window_bounds = array<i64: 1, 32>}, {transform_indices = @transform_5, window_bounds = array<i64: 1, 8, 32>}]} {
    %c0_i32 = arith.constant 0 : i32
    %0 = arith.cmpi eq, %arg2, %c0_i32 : i32
    %1 = arith.extui %0 : i1 to i32
    %c0_i32_0 = arith.constant 0 : i32
    %2 = arith.cmpi ne, %1, %c0_i32_0 : i32
    scf.if %2 {
      %cst_85 = arith.constant 0xFF800000 : f32
      %146 = vector.broadcast %cst_85 : f32 to vector<4x8x1xf32>
      %c0_86 = arith.constant 0 : index
      %c0_87 = arith.constant 0 : index
      %c0_88 = arith.constant 0 : index
      %147 = vector.load %arg9[%c0_86, %c0_87, %c0_88] : memref<4x8x1xf32, #tpu.memory_space<vmem>>, vector<4x8x1xf32>
      tpu.vector_store %arg9[%c0_86, %c0_87, %c0_88], %146 {strides = array<i32>} : memref<4x8x1xf32, #tpu.memory_space<vmem>>, vector<4x8x1xf32>,
      %cst_89 = arith.constant 0.000000e+00 : f32
      %148 = vector.broadcast %cst_89 : f32 to vector<4x8x1xf32>
      %c0_90 = arith.constant 0 : index
      %c0_91 = arith.constant 0 : index
      %c0_92 = arith.constant 0 : index
      %149 = vector.load %arg10[%c0_90, %c0_91, %c0_92] : memref<4x8x1xf32, #tpu.memory_space<vmem>>, vector<4x8x1xf32>
      tpu.vector_store %arg10[%c0_90, %c0_91, %c0_92], %148 {strides = array<i32>} : memref<4x8x1xf32, #tpu.memory_space<vmem>>, vector<4x8x1xf32>,
      %cst_93 = arith.constant 0.000000e+00 : f32
      %150 = vector.broadcast %cst_93 : f32 to vector<8x32xf32>
      %c0_94 = arith.constant 0 : index
      %c0_95 = arith.constant 0 : index
      %151 = vector.load %arg11[%c0_94, %c0_95] : memref<8x32xf32, #tpu.memory_space<vmem>>, vector<8x32xf32>
      tpu.vector_store %arg11[%c0_94, %c0_95], %150 {strides = array<i32>} : memref<8x32xf32, #tpu.memory_space<vmem>>, vector<8x32xf32>,
    } else {
    }
    %c0 = arith.constant 0 : index
    %c0_1 = arith.constant 0 : index
    %c0_2 = arith.constant 0 : index
    %3 = vector.load %arg3[%c0, %c0_1, %c0_2] : memref<1x8x32xbf16, #tpu.memory_space<vmem>>, vector<1x8x32xbf16>
    %4 = vector.shape_cast %3 : vector<1x8x32xbf16> to vector<8x32xbf16>
    %cst = arith.constant 3.535160e-01 : bf16
    %5 = vector.broadcast %cst : bf16 to vector<8x32xbf16>
    %6 = arith.mulf %4, %5 : vector<8x32xbf16>
    %c0_3 = arith.constant 0 : index
    %c0_4 = arith.constant 0 : index
    %c0_5 = arith.constant 0 : index
    %7 = vector.load %arg4[%c0_3, %c0_4, %c0_5] : memref<1x8x32xbf16, #tpu.memory_space<vmem>>, vector<1x8x32xbf16>
    %8 = vector.shape_cast %7 : vector<1x8x32xbf16> to vector<8x32xbf16>
    %c0_6 = arith.constant 0 : index
    %c0_7 = arith.constant 0 : index
    %c0_8 = arith.constant 0 : index
    %9 = vector.load %arg5[%c0_6, %c0_7, %c0_8] : memref<1x8x32xbf16, #tpu.memory_space<vmem>>, vector<1x8x32xbf16>
    %10 = vector.shape_cast %9 : vector<1x8x32xbf16> to vector<8x32xbf16>
    %11 = vector.extract_strided_slice %6 {offsets = [0, 0], sizes = [8, 8], strides = [1, 1]} : vector<8x32xbf16> to vector<8x8xbf16>
    %12 = vector.extract_strided_slice %8 {offsets = [0, 0], sizes = [8, 8], strides = [1, 1]} : vector<8x32xbf16> to vector<8x8xbf16>
    %13 = vector.extract_strided_slice %10 {offsets = [0, 0], sizes = [8, 8], strides = [1, 1]} : vector<8x32xbf16> to vector<8x8xbf16>
    %cst_9 = arith.constant dense<0.000000e+00> : vector<8x8xf32>
    %14 = tpu.matmul %11, %12, %cst_9 {dimension_numbers = #tpu.dot_dimension_numbers<[1], [1], [0], [0], [0, 0, 1, 0], [], []>} : vector<8x8xbf16>, vector<8x8xbf16>, vector<8x8xf32> -> vector<8x8xf32>
    %c0_10 = arith.constant 0 : index
    %c0_11 = arith.constant 0 : index
    %c0_12 = arith.constant 0 : index
    %15 = vector.load %arg9[%c0_10, %c0_11, %c0_12] : memref<4x8x1xf32, #tpu.memory_space<vmem>>, vector<1x8x1xf32>
    %16 = vector.shape_cast %15 : vector<1x8x1xf32> to vector<8x1xf32>
    %cst_13 = arith.constant dense<0xFF800000> : vector<8xf32>
    %17 = vector.multi_reduction <maximumf>, %14, %cst_13 [1] : vector<8x8xf32> to vector<8xf32>
    %18 = vector.shape_cast %17 : vector<8xf32> to vector<8x1xf32>
    %19 = arith.maximumf %16, %18 : vector<8x1xf32>
    %20 = arith.subf %16, %19 : vector<8x1xf32>
    %21 = math.exp %20 : vector<8x1xf32>
    %22 = vector.broadcast %19 : vector<8x1xf32> to vector<8x8xf32>
    %23 = arith.subf %14, %22 : vector<8x8xf32>
    %24 = math.exp %23 : vector<8x8xf32>
    %c0_14 = arith.constant 0 : index
    %c0_15 = arith.constant 0 : index
    %c0_16 = arith.constant 0 : index
    %25 = vector.load %arg10[%c0_14, %c0_15, %c0_16] : memref<4x8x1xf32, #tpu.memory_space<vmem>>, vector<1x8x1xf32>
    %26 = vector.shape_cast %25 : vector<1x8x1xf32> to vector<8x1xf32>
    %27 = arith.mulf %21, %26 : vector<8x1xf32>
    %cst_17 = arith.constant dense<0.000000e+00> : vector<8xf32>
    %28 = vector.multi_reduction <add>, %24, %cst_17 [1] : vector<8x8xf32> to vector<8xf32>
    %29 = vector.shape_cast %28 : vector<8xf32> to vector<8x1xf32>
    %30 = arith.addf %27, %29 : vector<8x1xf32>
    %c0_18 = arith.constant 0 : index
    %c0_19 = arith.constant 0 : index
    %c0_20 = arith.constant 0 : index
    %31 = vector.load %arg10[%c0_18, %c0_19, %c0_20] : memref<4x8x1xf32, #tpu.memory_space<vmem>>, vector<1x8x1xf32>
    %32 = vector.shape_cast %31 : vector<1x8x1xf32> to vector<8x1xf32>
    %33 = vector.shape_cast %30 : vector<8x1xf32> to vector<1x8x1xf32>
    tpu.vector_store %arg10[%c0_18, %c0_19, %c0_20], %33 {strides = array<i32>} : memref<4x8x1xf32, #tpu.memory_space<vmem>>, vector<1x8x1xf32>,
    %c0_21 = arith.constant 0 : index
    %c0_22 = arith.constant 0 : index
    %c0_23 = arith.constant 0 : index
    %34 = vector.load %arg9[%c0_21, %c0_22, %c0_23] : memref<4x8x1xf32, #tpu.memory_space<vmem>>, vector<1x8x1xf32>
    %35 = vector.shape_cast %34 : vector<1x8x1xf32> to vector<8x1xf32>
    %36 = vector.shape_cast %19 : vector<8x1xf32> to vector<1x8x1xf32>
    tpu.vector_store %arg9[%c0_21, %c0_22, %c0_23], %36 {strides = array<i32>} : memref<4x8x1xf32, #tpu.memory_space<vmem>>, vector<1x8x1xf32>,
    %37 = arith.truncf %24 : vector<8x8xf32> to vector<8x8xbf16>
    %cst_24 = arith.constant dense<0.000000e+00> : vector<8x8xf32>
    %38 = tpu.matmul %37, %13, %cst_24 {dimension_numbers = #tpu.dot_dimension_numbers<[1], [0], [0], [1], [0, 0, 1, 1], [], []>} : vector<8x8xbf16>, vector<8x8xbf16>, vector<8x8xf32> -> vector<8x8xf32>
    %c0_25 = arith.constant 0 : index
    %c0_26 = arith.constant 0 : index
    %39 = vector.load %arg11[%c0_25, %c0_26] : memref<8x32xf32, #tpu.memory_space<vmem>>, vector<8x8xf32>
    %40 = vector.broadcast %21 : vector<8x1xf32> to vector<8x8xf32>
    %41 = arith.mulf %40, %39 : vector<8x8xf32>
    %42 = arith.addf %41, %38 : vector<8x8xf32>
    %c0_27 = arith.constant 0 : index
    %c0_28 = arith.constant 0 : index
    %43 = vector.load %arg11[%c0_27, %c0_28] : memref<8x32xf32, #tpu.memory_space<vmem>>, vector<8x8xf32>
    tpu.vector_store %arg11[%c0_27, %c0_28], %42 {strides = array<i32>} : memref<8x32xf32, #tpu.memory_space<vmem>>, vector<8x8xf32>,
    %44 = vector.extract_strided_slice %6 {offsets = [0, 8], sizes = [8, 8], strides = [1, 1]} : vector<8x32xbf16> to vector<8x8xbf16>
    %45 = vector.extract_strided_slice %8 {offsets = [0, 8], sizes = [8, 8], strides = [1, 1]} : vector<8x32xbf16> to vector<8x8xbf16>
    %46 = vector.extract_strided_slice %10 {offsets = [0, 8], sizes = [8, 8], strides = [1, 1]} : vector<8x32xbf16> to vector<8x8xbf16>
    %cst_29 = arith.constant dense<0.000000e+00> : vector<8x8xf32>
    %47 = tpu.matmul %44, %45, %cst_29 {dimension_numbers = #tpu.dot_dimension_numbers<[1], [1], [0], [0], [0, 0, 1, 0], [], []>} : vector<8x8xbf16>, vector<8x8xbf16>, vector<8x8xf32> -> vector<8x8xf32>
    %c1 = arith.constant 1 : index
    %c0_30 = arith.constant 0 : index
    %c0_31 = arith.constant 0 : index
    %48 = vector.load %arg9[%c1, %c0_30, %c0_31] : memref<4x8x1xf32, #tpu.memory_space<vmem>>, vector<1x8x1xf32>
    %49 = vector.shape_cast %48 : vector<1x8x1xf32> to vector<8x1xf32>
    %cst_32 = arith.constant dense<0xFF800000> : vector<8xf32>
    %50 = vector.multi_reduction <maximumf>, %47, %cst_32 [1] : vector<8x8xf32> to vector<8xf32>
    %51 = vector.shape_cast %50 : vector<8xf32> to vector<8x1xf32>
    %52 = arith.maximumf %49, %51 : vector<8x1xf32>
    %53 = arith.subf %49, %52 : vector<8x1xf32>
    %54 = math.exp %53 : vector<8x1xf32>
    %55 = vector.broadcast %52 : vector<8x1xf32> to vector<8x8xf32>
    %56 = arith.subf %47, %55 : vector<8x8xf32>
    %57 = math.exp %56 : vector<8x8xf32>
    %c1_33 = arith.constant 1 : index
    %c0_34 = arith.constant 0 : index
    %c0_35 = arith.constant 0 : index
    %58 = vector.load %arg10[%c1_33, %c0_34, %c0_35] : memref<4x8x1xf32, #tpu.memory_space<vmem>>, vector<1x8x1xf32>
    %59 = vector.shape_cast %58 : vector<1x8x1xf32> to vector<8x1xf32>
    %60 = arith.mulf %54, %59 : vector<8x1xf32>
    %cst_36 = arith.constant dense<0.000000e+00> : vector<8xf32>
    %61 = vector.multi_reduction <add>, %57, %cst_36 [1] : vector<8x8xf32> to vector<8xf32>
    %62 = vector.shape_cast %61 : vector<8xf32> to vector<8x1xf32>
    %63 = arith.addf %60, %62 : vector<8x1xf32>
    %c1_37 = arith.constant 1 : index
    %c0_38 = arith.constant 0 : index
    %c0_39 = arith.constant 0 : index
    %64 = vector.load %arg10[%c1_37, %c0_38, %c0_39] : memref<4x8x1xf32, #tpu.memory_space<vmem>>, vector<1x8x1xf32>
    %65 = vector.shape_cast %64 : vector<1x8x1xf32> to vector<8x1xf32>
    %66 = vector.shape_cast %63 : vector<8x1xf32> to vector<1x8x1xf32>
    tpu.vector_store %arg10[%c1_37, %c0_38, %c0_39], %66 {strides = array<i32>} : memref<4x8x1xf32, #tpu.memory_space<vmem>>, vector<1x8x1xf32>,
    %c1_40 = arith.constant 1 : index
    %c0_41 = arith.constant 0 : index
    %c0_42 = arith.constant 0 : index
    %67 = vector.load %arg9[%c1_40, %c0_41, %c0_42] : memref<4x8x1xf32, #tpu.memory_space<vmem>>, vector<1x8x1xf32>
    %68 = vector.shape_cast %67 : vector<1x8x1xf32> to vector<8x1xf32>
    %69 = vector.shape_cast %52 : vector<8x1xf32> to vector<1x8x1xf32>
    tpu.vector_store %arg9[%c1_40, %c0_41, %c0_42], %69 {strides = array<i32>} : memref<4x8x1xf32, #tpu.memory_space<vmem>>, vector<1x8x1xf32>,
    %70 = arith.truncf %57 : vector<8x8xf32> to vector<8x8xbf16>
    %cst_43 = arith.constant dense<0.000000e+00> : vector<8x8xf32>
    %71 = tpu.matmul %70, %46, %cst_43 {dimension_numbers = #tpu.dot_dimension_numbers<[1], [0], [0], [1], [0, 0, 1, 1], [], []>} : vector<8x8xbf16>, vector<8x8xbf16>, vector<8x8xf32> -> vector<8x8xf32>
    %c0_44 = arith.constant 0 : index
    %c8 = arith.constant 8 : index
    %72 = vector.load %arg11[%c0_44, %c8] : memref<8x32xf32, #tpu.memory_space<vmem>>, vector<8x8xf32>
    %73 = vector.broadcast %54 : vector<8x1xf32> to vector<8x8xf32>
    %74 = arith.mulf %73, %72 : vector<8x8xf32>
    %75 = arith.addf %74, %71 : vector<8x8xf32>
    %c0_45 = arith.constant 0 : index
    %c8_46 = arith.constant 8 : index
    %76 = vector.load %arg11[%c0_45, %c8_46] : memref<8x32xf32, #tpu.memory_space<vmem>>, vector<8x8xf32>
    tpu.vector_store %arg11[%c0_45, %c8_46], %75 {strides = array<i32>} : memref<8x32xf32, #tpu.memory_space<vmem>>, vector<8x8xf32>,
    %77 = vector.extract_strided_slice %6 {offsets = [0, 16], sizes = [8, 8], strides = [1, 1]} : vector<8x32xbf16> to vector<8x8xbf16>
    %78 = vector.extract_strided_slice %8 {offsets = [0, 16], sizes = [8, 8], strides = [1, 1]} : vector<8x32xbf16> to vector<8x8xbf16>
    %79 = vector.extract_strided_slice %10 {offsets = [0, 16], sizes = [8, 8], strides = [1, 1]} : vector<8x32xbf16> to vector<8x8xbf16>
    %cst_47 = arith.constant dense<0.000000e+00> : vector<8x8xf32>
    %80 = tpu.matmul %77, %78, %cst_47 {dimension_numbers = #tpu.dot_dimension_numbers<[1], [1], [0], [0], [0, 0, 1, 0], [], []>} : vector<8x8xbf16>, vector<8x8xbf16>, vector<8x8xf32> -> vector<8x8xf32>
    %c2 = arith.constant 2 : index
    %c0_48 = arith.constant 0 : index
    %c0_49 = arith.constant 0 : index
    %81 = vector.load %arg9[%c2, %c0_48, %c0_49] : memref<4x8x1xf32, #tpu.memory_space<vmem>>, vector<1x8x1xf32>
    %82 = vector.shape_cast %81 : vector<1x8x1xf32> to vector<8x1xf32>
    %cst_50 = arith.constant dense<0xFF800000> : vector<8xf32>
    %83 = vector.multi_reduction <maximumf>, %80, %cst_50 [1] : vector<8x8xf32> to vector<8xf32>
    %84 = vector.shape_cast %83 : vector<8xf32> to vector<8x1xf32>
    %85 = arith.maximumf %82, %84 : vector<8x1xf32>
    %86 = arith.subf %82, %85 : vector<8x1xf32>
    %87 = math.exp %86 : vector<8x1xf32>
    %88 = vector.broadcast %85 : vector<8x1xf32> to vector<8x8xf32>
    %89 = arith.subf %80, %88 : vector<8x8xf32>
    %90 = math.exp %89 : vector<8x8xf32>
    %c2_51 = arith.constant 2 : index
    %c0_52 = arith.constant 0 : index
    %c0_53 = arith.constant 0 : index
    %91 = vector.load %arg10[%c2_51, %c0_52, %c0_53] : memref<4x8x1xf32, #tpu.memory_space<vmem>>, vector<1x8x1xf32>
    %92 = vector.shape_cast %91 : vector<1x8x1xf32> to vector<8x1xf32>
    %93 = arith.mulf %87, %92 : vector<8x1xf32>
    %cst_54 = arith.constant dense<0.000000e+00> : vector<8xf32>
    %94 = vector.multi_reduction <add>, %90, %cst_54 [1] : vector<8x8xf32> to vector<8xf32>
    %95 = vector.shape_cast %94 : vector<8xf32> to vector<8x1xf32>
    %96 = arith.addf %93, %95 : vector<8x1xf32>
    %c2_55 = arith.constant 2 : index
    %c0_56 = arith.constant 0 : index
    %c0_57 = arith.constant 0 : index
    %97 = vector.load %arg10[%c2_55, %c0_56, %c0_57] : memref<4x8x1xf32, #tpu.memory_space<vmem>>, vector<1x8x1xf32>
    %98 = vector.shape_cast %97 : vector<1x8x1xf32> to vector<8x1xf32>
    %99 = vector.shape_cast %96 : vector<8x1xf32> to vector<1x8x1xf32>
    tpu.vector_store %arg10[%c2_55, %c0_56, %c0_57], %99 {strides = array<i32>} : memref<4x8x1xf32, #tpu.memory_space<vmem>>, vector<1x8x1xf32>,
    %c2_58 = arith.constant 2 : index
    %c0_59 = arith.constant 0 : index
    %c0_60 = arith.constant 0 : index
    %100 = vector.load %arg9[%c2_58, %c0_59, %c0_60] : memref<4x8x1xf32, #tpu.memory_space<vmem>>, vector<1x8x1xf32>
    %101 = vector.shape_cast %100 : vector<1x8x1xf32> to vector<8x1xf32>
    %102 = vector.shape_cast %85 : vector<8x1xf32> to vector<1x8x1xf32>
    tpu.vector_store %arg9[%c2_58, %c0_59, %c0_60], %102 {strides = array<i32>} : memref<4x8x1xf32, #tpu.memory_space<vmem>>, vector<1x8x1xf32>,
    %103 = arith.truncf %90 : vector<8x8xf32> to vector<8x8xbf16>
    %cst_61 = arith.constant dense<0.000000e+00> : vector<8x8xf32>
    %104 = tpu.matmul %103, %79, %cst_61 {dimension_numbers = #tpu.dot_dimension_numbers<[1], [0], [0], [1], [0, 0, 1, 1], [], []>} : vector<8x8xbf16>, vector<8x8xbf16>, vector<8x8xf32> -> vector<8x8xf32>
    %c0_62 = arith.constant 0 : index
    %c16 = arith.constant 16 : index
    %105 = vector.load %arg11[%c0_62, %c16] : memref<8x32xf32, #tpu.memory_space<vmem>>, vector<8x8xf32>
    %106 = vector.broadcast %87 : vector<8x1xf32> to vector<8x8xf32>
    %107 = arith.mulf %106, %105 : vector<8x8xf32>
    %108 = arith.addf %107, %104 : vector<8x8xf32>
    %c0_63 = arith.constant 0 : index
    %c16_64 = arith.constant 16 : index
    %109 = vector.load %arg11[%c0_63, %c16_64] : memref<8x32xf32, #tpu.memory_space<vmem>>, vector<8x8xf32>
    tpu.vector_store %arg11[%c0_63, %c16_64], %108 {strides = array<i32>} : memref<8x32xf32, #tpu.memory_space<vmem>>, vector<8x8xf32>,
    %110 = vector.extract_strided_slice %6 {offsets = [0, 24], sizes = [8, 8], strides = [1, 1]} : vector<8x32xbf16> to vector<8x8xbf16>
    %111 = vector.extract_strided_slice %8 {offsets = [0, 24], sizes = [8, 8], strides = [1, 1]} : vector<8x32xbf16> to vector<8x8xbf16>
    %112 = vector.extract_strided_slice %10 {offsets = [0, 24], sizes = [8, 8], strides = [1, 1]} : vector<8x32xbf16> to vector<8x8xbf16>
    %cst_65 = arith.constant dense<0.000000e+00> : vector<8x8xf32>
    %113 = tpu.matmul %110, %111, %cst_65 {dimension_numbers = #tpu.dot_dimension_numbers<[1], [1], [0], [0], [0, 0, 1, 0], [], []>} : vector<8x8xbf16>, vector<8x8xbf16>, vector<8x8xf32> -> vector<8x8xf32>
    %c3 = arith.constant 3 : index
    %c0_66 = arith.constant 0 : index
    %c0_67 = arith.constant 0 : index
    %114 = vector.load %arg9[%c3, %c0_66, %c0_67] : memref<4x8x1xf32, #tpu.memory_space<vmem>>, vector<1x8x1xf32>
    %115 = vector.shape_cast %114 : vector<1x8x1xf32> to vector<8x1xf32>
    %cst_68 = arith.constant dense<0xFF800000> : vector<8xf32>
    %116 = vector.multi_reduction <maximumf>, %113, %cst_68 [1] : vector<8x8xf32> to vector<8xf32>
    %117 = vector.shape_cast %116 : vector<8xf32> to vector<8x1xf32>
    %118 = arith.maximumf %115, %117 : vector<8x1xf32>
    %119 = arith.subf %115, %118 : vector<8x1xf32>
    %120 = math.exp %119 : vector<8x1xf32>
    %121 = vector.broadcast %118 : vector<8x1xf32> to vector<8x8xf32>
    %122 = arith.subf %113, %121 : vector<8x8xf32>
    %123 = math.exp %122 : vector<8x8xf32>
    %c3_69 = arith.constant 3 : index
    %c0_70 = arith.constant 0 : index
    %c0_71 = arith.constant 0 : index
    %124 = vector.load %arg10[%c3_69, %c0_70, %c0_71] : memref<4x8x1xf32, #tpu.memory_space<vmem>>, vector<1x8x1xf32>
    %125 = vector.shape_cast %124 : vector<1x8x1xf32> to vector<8x1xf32>
    %126 = arith.mulf %120, %125 : vector<8x1xf32>
    %cst_72 = arith.constant dense<0.000000e+00> : vector<8xf32>
    %127 = vector.multi_reduction <add>, %123, %cst_72 [1] : vector<8x8xf32> to vector<8xf32>
    %128 = vector.shape_cast %127 : vector<8xf32> to vector<8x1xf32>
    %129 = arith.addf %126, %128 : vector<8x1xf32>
    %c3_73 = arith.constant 3 : index
    %c0_74 = arith.constant 0 : index
    %c0_75 = arith.constant 0 : index
    %130 = vector.load %arg10[%c3_73, %c0_74, %c0_75] : memref<4x8x1xf32, #tpu.memory_space<vmem>>, vector<1x8x1xf32>
    %131 = vector.shape_cast %130 : vector<1x8x1xf32> to vector<8x1xf32>
    %132 = vector.shape_cast %129 : vector<8x1xf32> to vector<1x8x1xf32>
    tpu.vector_store %arg10[%c3_73, %c0_74, %c0_75], %132 {strides = array<i32>} : memref<4x8x1xf32, #tpu.memory_space<vmem>>, vector<1x8x1xf32>,
    %c3_76 = arith.constant 3 : index
    %c0_77 = arith.constant 0 : index
    %c0_78 = arith.constant 0 : index
    %133 = vector.load %arg9[%c3_76, %c0_77, %c0_78] : memref<4x8x1xf32, #tpu.memory_space<vmem>>, vector<1x8x1xf32>
    %134 = vector.shape_cast %133 : vector<1x8x1xf32> to vector<8x1xf32>
    %135 = vector.shape_cast %118 : vector<8x1xf32> to vector<1x8x1xf32>
    tpu.vector_store %arg9[%c3_76, %c0_77, %c0_78], %135 {strides = array<i32>} : memref<4x8x1xf32, #tpu.memory_space<vmem>>, vector<1x8x1xf32>,
    %136 = arith.truncf %123 : vector<8x8xf32> to vector<8x8xbf16>
    %cst_79 = arith.constant dense<0.000000e+00> : vector<8x8xf32>
    %137 = tpu.matmul %136, %112, %cst_79 {dimension_numbers = #tpu.dot_dimension_numbers<[1], [0], [0], [1], [0, 0, 1, 1], [], []>} : vector<8x8xbf16>, vector<8x8xbf16>, vector<8x8xf32> -> vector<8x8xf32>
    %c0_80 = arith.constant 0 : index
    %c24 = arith.constant 24 : index
    %138 = vector.load %arg11[%c0_80, %c24] : memref<8x32xf32, #tpu.memory_space<vmem>>, vector<8x8xf32>
    %139 = vector.broadcast %120 : vector<8x1xf32> to vector<8x8xf32>
    %140 = arith.mulf %139, %138 : vector<8x8xf32>
    %141 = arith.addf %140, %137 : vector<8x8xf32>
    %c0_81 = arith.constant 0 : index
    %c24_82 = arith.constant 24 : index
    %142 = vector.load %arg11[%c0_81, %c24_82] : memref<8x32xf32, #tpu.memory_space<vmem>>, vector<8x8xf32>
    tpu.vector_store %arg11[%c0_81, %c24_82], %141 {strides = array<i32>} : memref<8x32xf32, #tpu.memory_space<vmem>>, vector<8x8xf32>,
    %c0_i32_83 = arith.constant 0 : i32
    %143 = arith.cmpi eq, %arg2, %c0_i32_83 : i32
    %144 = arith.extui %143 : i1 to i32
    %c0_i32_84 = arith.constant 0 : i32
    %145 = arith.cmpi ne, %144, %c0_i32_84 : i32
    scf.if %145 {
      %c0_85 = arith.constant 0 : index
      %c0_86 = arith.constant 0 : index
      %c0_87 = arith.constant 0 : index
      %146 = vector.load %arg10[%c0_85, %c0_86, %c0_87] : memref<4x8x1xf32, #tpu.memory_space<vmem>>, vector<1x8x1xf32>
      %147 = vector.shape_cast %146 : vector<1x8x1xf32> to vector<8x1xf32>
      %148 = tpu.reciprocal %147 {approx = true} : vector<8x1xf32> -> vector<8x1xf32>
      %c0_88 = arith.constant 0 : index
      %c0_89 = arith.constant 0 : index
      %149 = vector.load %arg11[%c0_88, %c0_89] : memref<8x32xf32, #tpu.memory_space<vmem>>, vector<8x8xf32>
      %150 = vector.broadcast %148 : vector<8x1xf32> to vector<8x8xf32>
      %151 = arith.mulf %149, %150 : vector<8x8xf32>
      %c0_90 = arith.constant 0 : index
      %c0_91 = arith.constant 0 : index
      %152 = vector.load %arg11[%c0_90, %c0_91] : memref<8x32xf32, #tpu.memory_space<vmem>>, vector<8x8xf32>
      tpu.vector_store %arg11[%c0_90, %c0_91], %151 {strides = array<i32>} : memref<8x32xf32, #tpu.memory_space<vmem>>, vector<8x8xf32>,
      %c1_92 = arith.constant 1 : index
      %c0_93 = arith.constant 0 : index
      %c0_94 = arith.constant 0 : index
      %153 = vector.load %arg10[%c1_92, %c0_93, %c0_94] : memref<4x8x1xf32, #tpu.memory_space<vmem>>, vector<1x8x1xf32>
      %154 = vector.shape_cast %153 : vector<1x8x1xf32> to vector<8x1xf32>
      %155 = tpu.reciprocal %154 {approx = true} : vector<8x1xf32> -> vector<8x1xf32>
      %c0_95 = arith.constant 0 : index
      %c8_96 = arith.constant 8 : index
      %156 = vector.load %arg11[%c0_95, %c8_96] : memref<8x32xf32, #tpu.memory_space<vmem>>, vector<8x8xf32>
      %157 = vector.broadcast %155 : vector<8x1xf32> to vector<8x8xf32>
      %158 = arith.mulf %156, %157 : vector<8x8xf32>
      %c0_97 = arith.constant 0 : index
      %c8_98 = arith.constant 8 : index
      %159 = vector.load %arg11[%c0_97, %c8_98] : memref<8x32xf32, #tpu.memory_space<vmem>>, vector<8x8xf32>
      tpu.vector_store %arg11[%c0_97, %c8_98], %158 {strides = array<i32>} : memref<8x32xf32, #tpu.memory_space<vmem>>, vector<8x8xf32>,
      %c2_99 = arith.constant 2 : index
      %c0_100 = arith.constant 0 : index
      %c0_101 = arith.constant 0 : index
      %160 = vector.load %arg10[%c2_99, %c0_100, %c0_101] : memref<4x8x1xf32, #tpu.memory_space<vmem>>, vector<1x8x1xf32>
      %161 = vector.shape_cast %160 : vector<1x8x1xf32> to vector<8x1xf32>
      %162 = tpu.reciprocal %161 {approx = true} : vector<8x1xf32> -> vector<8x1xf32>
      %c0_102 = arith.constant 0 : index
      %c16_103 = arith.constant 16 : index
      %163 = vector.load %arg11[%c0_102, %c16_103] : memref<8x32xf32, #tpu.memory_space<vmem>>, vector<8x8xf32>
      %164 = vector.broadcast %162 : vector<8x1xf32> to vector<8x8xf32>
      %165 = arith.mulf %163, %164 : vector<8x8xf32>
      %c0_104 = arith.constant 0 : index
      %c16_105 = arith.constant 16 : index
      %166 = vector.load %arg11[%c0_104, %c16_105] : memref<8x32xf32, #tpu.memory_space<vmem>>, vector<8x8xf32>
      tpu.vector_store %arg11[%c0_104, %c16_105], %165 {strides = array<i32>} : memref<8x32xf32, #tpu.memory_space<vmem>>, vector<8x8xf32>,
      %c3_106 = arith.constant 3 : index
      %c0_107 = arith.constant 0 : index
      %c0_108 = arith.constant 0 : index
      %167 = vector.load %arg10[%c3_106, %c0_107, %c0_108] : memref<4x8x1xf32, #tpu.memory_space<vmem>>, vector<1x8x1xf32>
      %168 = vector.shape_cast %167 : vector<1x8x1xf32> to vector<8x1xf32>
      %169 = tpu.reciprocal %168 {approx = true} : vector<8x1xf32> -> vector<8x1xf32>
      %c0_109 = arith.constant 0 : index
      %c24_110 = arith.constant 24 : index
      %170 = vector.load %arg11[%c0_109, %c24_110] : memref<8x32xf32, #tpu.memory_space<vmem>>, vector<8x8xf32>
      %171 = vector.broadcast %169 : vector<8x1xf32> to vector<8x8xf32>
      %172 = arith.mulf %170, %171 : vector<8x8xf32>
      %c0_111 = arith.constant 0 : index
      %c24_112 = arith.constant 24 : index
      %173 = vector.load %arg11[%c0_111, %c24_112] : memref<8x32xf32, #tpu.memory_space<vmem>>, vector<8x8xf32>
      tpu.vector_store %arg11[%c0_111, %c24_112], %172 {strides = array<i32>} : memref<8x32xf32, #tpu.memory_space<vmem>>, vector<8x8xf32>,
      %c0_113 = arith.constant 0 : index
      %c0_114 = arith.constant 0 : index
      %174 = vector.load %arg11[%c0_113, %c0_114] : memref<8x32xf32, #tpu.memory_space<vmem>>, vector<8x32xf32>
      %175 = arith.truncf %174 : vector<8x32xf32> to vector<8x32xbf16>
      %c0_115 = arith.constant 0 : index
      %c0_116 = arith.constant 0 : index
      %176 = vector.load %arg6[%c0_115, %c0_116] : memref<32x32xbf16, #tpu.memory_space<vmem>>, vector<32x32xbf16>
      %cst_117 = arith.constant dense<0.000000e+00> : vector<8x32xf32>
      %177 = tpu.matmul %175, %176, %cst_117 {dimension_numbers = #tpu.dot_dimension_numbers<[1], [0], [0], [1], [0, 0, 1, 1], [], []>} : vector<8x32xbf16>, vector<32x32xbf16>, vector<8x32xf32> -> vector<8x32xf32>
      %c0_118 = arith.constant 0 : index
      %c0_119 = arith.constant 0 : index
      %178 = vector.load %arg7[%c0_118, %c0_119] : memref<1x32xf32, #tpu.memory_space<vmem>>, vector<1x32xf32>
      %179 = vector.broadcast %178 : vector<1x32xf32> to vector<8x32xf32>
      %180 = arith.addf %177, %179 : vector<8x32xf32>
      %c0_120 = arith.constant 0 : index
      %c0_121 = arith.constant 0 : index
      %c0_122 = arith.constant 0 : index
      %181 = vector.load %arg8[%c0_120, %c0_121, %c0_122] : memref<1x8x32xf32, #tpu.memory_space<vmem>>, vector<1x8x32xf32>
      %182 = vector.shape_cast %181 : vector<1x8x32xf32> to vector<8x32xf32>
      %183 = vector.shape_cast %180 : vector<8x32xf32> to vector<1x8x32xf32>
      tpu.vector_store %arg8[%c0_120, %c0_121, %c0_122], %183 {strides = array<i32>} : memref<1x8x32xf32, #tpu.memory_space<vmem>>, vector<1x8x32xf32>,
    } else {
    }
    return
  }
  func.func @transform_0(%arg0: i32, %arg1: i32, %arg2: i32) -> (i32, i32, i32) {
    %c0_i32 = arith.constant 0 : i32
    %c0_i32_0 = arith.constant 0 : i32
    return %arg0, %arg1, %c0_i32 : i32, i32, i32
  }
  func.func @transform_1(%arg0: i32, %arg1: i32, %arg2: i32) -> (i32, i32, i32) {
    %c0_i32 = arith.constant 0 : i32
    %c0_i32_0 = arith.constant 0 : i32
    return %arg0, %arg2, %c0_i32 : i32, i32, i32
  }
  func.func @transform_2(%arg0: i32, %arg1: i32, %arg2: i32) -> (i32, i32, i32) {
    %c0_i32 = arith.constant 0 : i32
    %c0_i32_0 = arith.constant 0 : i32
    return %arg0, %arg2, %c0_i32 : i32, i32, i32
  }
  func.func @transform_3(%arg0: i32, %arg1: i32, %arg2: i32) -> (i32, i32) {
    %c0_i32 = arith.constant 0 : i32
    %c0_i32_0 = arith.constant 0 : i32
    %c0_i32_1 = arith.constant 0 : i32
    return %c0_i32, %c0_i32_0 : i32, i32
  }
  func.func @transform_4(%arg0: i32, %arg1: i32, %arg2: i32) -> (i32, i32) {
    %c0_i32 = arith.constant 0 : i32
    %c0_i32_0 = arith.constant 0 : i32
    %c0_i32_1 = arith.constant 0 : i32
    return %c0_i32, %c0_i32_0 : i32, i32
  }
  func.func @transform_5(%arg0: i32, %arg1: i32, %arg2: i32) -> (i32, i32, i32) {
    %c0_i32 = arith.constant 0 : i32
    %c0_i32_0 = arith.constant 0 : i32
    return %arg0, %arg1, %c0_i32 : i32, i32, i32
  }
}

module attributes {stable_mosaic.version = 11 : i64} {
  func.func @_fused_attention_kernel(%arg0: i32, %arg1: i32, %arg2: i32, %arg3: memref<1x8x32xbf16, #tpu.memory_space<vmem>>, %arg4: memref<1x8x32xbf16, #tpu.memory_space<vmem>>, %arg5: memref<1x8x32xbf16, #tpu.memory_space<vmem>>, %arg6: memref<32x32xbf16, #tpu.memory_space<vmem>>, %arg7: memref<1x32xf32, #tpu.memory_space<vmem>>, %arg8: memref<1x8x32xf32, #tpu.memory_space<vmem>>, %arg9: memref<4x8x1xf32, #tpu.memory_space<vmem>>, %arg10: memref<4x8x1xf32, #tpu.memory_space<vmem>>, %arg11: memref<8x32xf32, #tpu.memory_space<vmem>>) attributes {dimension_semantics = [#tpu.dimension_semantics<parallel>, #tpu.dimension_semantics<parallel>, #tpu.dimension_semantics<arbitrary>], iteration_bounds = array<i64: 2, 1, 1>, scalar_prefetch = 0 : i64, scratch_operands = 3 : i64, tpu.core_type = #tpu.core_type<tc>, window_params = [{transform_indices = @transform_0, window_bounds = array<i64: 1, 8, 32>}, {transform_indices = @transform_1, window_bounds = array<i64: 1, 8, 32>}, {transform_indices = @transform_2, window_bounds = array<i64: 1, 8, 32>}, {pipeline_mode = #tpu.pipeline_mode<synchronous>, transform_indices = @transform_3, window_bounds = array<i64: 32, 32>}, {pipeline_mode = #tpu.pipeline_mode<synchronous>, transform_indices = @transform_4, window_bounds = array<i64: 1, 32>}, {transform_indices = @transform_5, window_bounds = array<i64: 1, 8, 32>}]} {
    %c0_i32 = arith.constant 0 : i32
    %0 = arith.cmpi eq, %arg2, %c0_i32 : i32
    %1 = arith.extui %0 : i1 to i32
    %c0_i32_0 = arith.constant 0 : i32
    %2 = arith.cmpi ne, %1, %c0_i32_0 : i32
    scf.if %2 {
      %cst_85 = arith.constant 0xFF800000 : f32
      %146 = vector.broadcast %cst_85 : f32 to vector<4x8x1xf32>
      %c0_86 = arith.constant 0 : index
      %c0_87 = arith.constant 0 : index
      %c0_88 = arith.constant 0 : index
      %147 = vector.load %arg9[%c0_86, %c0_87, %c0_88] : memref<4x8x1xf32, #tpu.memory_space<vmem>>, vector<4x8x1xf32>
      tpu.vector_store %arg9[%c0_86, %c0_87, %c0_88], %146 {strides = array<i32>} : memref<4x8x1xf32, #tpu.memory_space<vmem>>, vector<4x8x1xf32>,
      %cst_89 = arith.constant 0.000000e+00 : f32
      %148 = vector.broadcast %cst_89 : f32 to vector<4x8x1xf32>
      %c0_90 = arith.constant 0 : index
      %c0_91 = arith.constant 0 : index
      %c0_92 = arith.constant 0 : index
      %149 = vector.load %arg10[%c0_90, %c0_91, %c0_92] : memref<4x8x1xf32, #tpu.memory_space<vmem>>, vector<4x8x1xf32>
      tpu.vector_store %arg10[%c0_90, %c0_91, %c0_92], %148 {strides = array<i32>} : memref<4x8x1xf32, #tpu.memory_space<vmem>>, vector<4x8x1xf32>,
      %cst_93 = arith.constant 0.000000e+00 : f32
      %150 = vector.broadcast %cst_93 : f32 to vector<8x32xf32>
      %c0_94 = arith.constant 0 : index
      %c0_95 = arith.constant 0 : index
      %151 = vector.load %arg11[%c0_94, %c0_95] : memref<8x32xf32, #tpu.memory_space<vmem>>, vector<8x32xf32>
      tpu.vector_store %arg11[%c0_94, %c0_95], %150 {strides = array<i32>} : memref<8x32xf32, #tpu.memory_space<vmem>>, vector<8x32xf32>,
    } else {
    }
    %c0 = arith.constant 0 : index
    %c0_1 = arith.constant 0 : index
    %c0_2 = arith.constant 0 : index
    %3 = vector.load %arg3[%c0, %c0_1, %c0_2] : memref<1x8x32xbf16, #tpu.memory_space<vmem>>, vector<1x8x32xbf16>
    %4 = vector.shape_cast %3 : vector<1x8x32xbf16> to vector<8x32xbf16>
    %cst = arith.constant 3.535160e-01 : bf16
    %5 = vector.broadcast %cst : bf16 to vector<8x32xbf16>
    %6 = arith.mulf %4, %5 : vector<8x32xbf16>
    %c0_3 = arith.constant 0 : index
    %c0_4 = arith.constant 0 : index
    %c0_5 = arith.constant 0 : index
    %7 = vector.load %arg4[%c0_3, %c0_4, %c0_5] : memref<1x8x32xbf16, #tpu.memory_space<vmem>>, vector<1x8x32xbf16>
    %8 = vector.shape_cast %7 : vector<1x8x32xbf16> to vector<8x32xbf16>
    %c0_6 = arith.constant 0 : index
    %c0_7 = arith.constant 0 : index
    %c0_8 = arith.constant 0 : index
    %9 = vector.load %arg5[%c0_6, %c0_7, %c0_8] : memref<1x8x32xbf16, #tpu.memory_space<vmem>>, vector<1x8x32xbf16>
    %10 = vector.shape_cast %9 : vector<1x8x32xbf16> to vector<8x32xbf16>
    %11 = vector.extract_strided_slice %6 {offsets = [0, 0], sizes = [8, 8], strides = [1, 1]} : vector<8x32xbf16> to vector<8x8xbf16>
    %12 = vector.extract_strided_slice %8 {offsets = [0, 0], sizes = [8, 8], strides = [1, 1]} : vector<8x32xbf16> to vector<8x8xbf16>
    %13 = vector.extract_strided_slice %10 {offsets = [0, 0], sizes = [8, 8], strides = [1, 1]} : vector<8x32xbf16> to vector<8x8xbf16>
    %cst_9 = arith.constant dense<0.000000e+00> : vector<8x8xf32>
    %14 = tpu.matmul %11, %12, %cst_9 {dimension_numbers = #tpu.dot_dimension_numbers<[1], [1], [0], [0], [0, 0, 1, 0], [], []>} : vector<8x8xbf16>, vector<8x8xbf16>, vector<8x8xf32> -> vector<8x8xf32>
    %c0_10 = arith.constant 0 : index
    %c0_11 = arith.constant 0 : index
    %c0_12 = arith.constant 0 : index
    %15 = vector.load %arg9[%c0_10, %c0_11, %c0_12] : memref<4x8x1xf32, #tpu.memory_space<vmem>>, vector<1x8x1xf32>
    %16 = vector.shape_cast %15 : vector<1x8x1xf32> to vector<8x1xf32>
    %cst_13 = arith.constant dense<0xFF800000> : vector<8xf32>
    %17 = vector.multi_reduction <maximumf>, %14, %cst_13 [1] : vector<8x8xf32> to vector<8xf32>
    %18 = vector.shape_cast %17 : vector<8xf32> to vector<8x1xf32>
    %19 = arith.maximumf %16, %18 : vector<8x1xf32>
    %20 = arith.subf %16, %19 : vector<8x1xf32>
    %21 = math.exp %20 : vector<8x1xf32>
    %22 = vector.broadcast %19 : vector<8x1xf32> to vector<8x8xf32>
    %23 = arith.subf %14, %22 : vector<8x8xf32>
    %24 = math.exp %23 : vector<8x8xf32>
    %c0_14 = arith.constant 0 : index
    %c0_15 = arith.constant 0 : index
    %c0_16 = arith.constant 0 : index
    %25 = vector.load %arg10[%c0_14, %c0_15, %c0_16] : memref<4x8x1xf32, #tpu.memory_space<vmem>>, vector<1x8x1xf32>
    %26 = vector.shape_cast %25 : vector<1x8x1xf32> to vector<8x1xf32>
    %27 = arith.mulf %21, %26 : vector<8x1xf32>
    %cst_17 = arith.constant dense<0.000000e+00> : vector<8xf32>
    %28 = vector.multi_reduction <add>, %24, %cst_17 [1] : vector<8x8xf32> to vector<8xf32>
    %29 = vector.shape_cast %28 : vector<8xf32> to vector<8x1xf32>
    %30 = arith.addf %27, %29 : vector<8x1xf32>
    %c0_18 = arith.constant 0 : index
    %c0_19 = arith.constant 0 : index
    %c0_20 = arith.constant 0 : index
    %31 = vector.load %arg10[%c0_18, %c0_19, %c0_20] : memref<4x8x1xf32, #tpu.memory_space<vmem>>, vector<1x8x1xf32>
    %32 = vector.shape_cast %31 : vector<1x8x1xf32> to vector<8x1xf32>
    %33 = vector.shape_cast %30 : vector<8x1xf32> to vector<1x8x1xf32>
    tpu.vector_store %arg10[%c0_18, %c0_19, %c0_20], %33 {strides = array<i32>} : memref<4x8x1xf32, #tpu.memory_space<vmem>>, vector<1x8x1xf32>,
    %c0_21 = arith.constant 0 : index
    %c0_22 = arith.constant 0 : index
    %c0_23 = arith.constant 0 : index
    %34 = vector.load %arg9[%c0_21, %c0_22, %c0_23] : memref<4x8x1xf32, #tpu.memory_space<vmem>>, vector<1x8x1xf32>
    %35 = vector.shape_cast %34 : vector<1x8x1xf32> to vector<8x1xf32>
    %36 = vector.shape_cast %19 : vector<8x1xf32> to vector<1x8x1xf32>
    tpu.vector_store %arg9[%c0_21, %c0_22, %c0_23], %36 {strides = array<i32>} : memref<4x8x1xf32, #tpu.memory_space<vmem>>, vector<1x8x1xf32>,
    %37 = arith.truncf %24 : vector<8x8xf32> to vector<8x8xbf16>
    %cst_24 = arith.constant dense<0.000000e+00> : vector<8x8xf32>
    %38 = tpu.matmul %37, %13, %cst_24 {dimension_numbers = #tpu.dot_dimension_numbers<[1], [0], [0], [1], [0, 0, 1, 1], [], []>} : vector<8x8xbf16>, vector<8x8xbf16>, vector<8x8xf32> -> vector<8x8xf32>
    %c0_25 = arith.constant 0 : index
    %c0_26 = arith.constant 0 : index
    %39 = vector.load %arg11[%c0_25, %c0_26] : memref<8x32xf32, #tpu.memory_space<vmem>>, vector<8x8xf32>
    %40 = vector.broadcast %21 : vector<8x1xf32> to vector<8x8xf32>
    %41 = arith.mulf %40, %39 : vector<8x8xf32>
    %42 = arith.addf %41, %38 : vector<8x8xf32>
    %c0_27 = arith.constant 0 : index
    %c0_28 = arith.constant 0 : index
    %43 = vector.load %arg11[%c0_27, %c0_28] : memref<8x32xf32, #tpu.memory_space<vmem>>, vector<8x8xf32>
    tpu.vector_store %arg11[%c0_27, %c0_28], %42 {strides = array<i32>} : memref<8x32xf32, #tpu.memory_space<vmem>>, vector<8x8xf32>,
    %44 = vector.extract_strided_slice %6 {offsets = [0, 8], sizes = [8, 8], strides = [1, 1]} : vector<8x32xbf16> to vector<8x8xbf16>
    %45 = vector.extract_strided_slice %8 {offsets = [0, 8], sizes = [8, 8], strides = [1, 1]} : vector<8x32xbf16> to vector<8x8xbf16>
    %46 = vector.extract_strided_slice %10 {offsets = [0, 8], sizes = [8, 8], strides = [1, 1]} : vector<8x32xbf16> to vector<8x8xbf16>
    %cst_29 = arith.constant dense<0.000000e+00> : vector<8x8xf32>
    %47 = tpu.matmul %44, %45, %cst_29 {dimension_numbers = #tpu.dot_dimension_numbers<[1], [1], [0], [0], [0, 0, 1, 0], [], []>} : vector<8x8xbf16>, vector<8x8xbf16>, vector<8x8xf32> -> vector<8x8xf32>
    %c1 = arith.constant 1 : index
    %c0_30 = arith.constant 0 : index
    %c0_31 = arith.constant 0 : index
    %48 = vector.load %arg9[%c1, %c0_30, %c0_31] : memref<4x8x1xf32, #tpu.memory_space<vmem>>, vector<1x8x1xf32>
    %49 = vector.shape_cast %48 : vector<1x8x1xf32> to vector<8x1xf32>
    %cst_32 = arith.constant dense<0xFF800000> : vector<8xf32>
    %50 = vector.multi_reduction <maximumf>, %47, %cst_32 [1] : vector<8x8xf32> to vector<8xf32>
    %51 = vector.shape_cast %50 : vector<8xf32> to vector<8x1xf32>
    %52 = arith.maximumf %49, %51 : vector<8x1xf32>
    %53 = arith.subf %49, %52 : vector<8x1xf32>
    %54 = math.exp %53 : vector<8x1xf32>
    %55 = vector.broadcast %52 : vector<8x1xf32> to vector<8x8xf32>
    %56 = arith.subf %47, %55 : vector<8x8xf32>
    %57 = math.exp %56 : vector<8x8xf32>
    %c1_33 = arith.constant 1 : index
    %c0_34 = arith.constant 0 : index
    %c0_35 = arith.constant 0 : index
    %58 = vector.load %arg10[%c1_33, %c0_34, %c0_35] : memref<4x8x1xf32, #tpu.memory_space<vmem>>, vector<1x8x1xf32>
    %59 = vector.shape_cast %58 : vector<1x8x1xf32> to vector<8x1xf32>
    %60 = arith.mulf %54, %59 : vector<8x1xf32>
    %cst_36 = arith.constant dense<0.000000e+00> : vector<8xf32>
    %61 = vector.multi_reduction <add>, %57, %cst_36 [1] : vector<8x8xf32> to vector<8xf32>
    %62 = vector.shape_cast %61 : vector<8xf32> to vector<8x1xf32>
    %63 = arith.addf %60, %62 : vector<8x1xf32>
    %c1_37 = arith.constant 1 : index
    %c0_38 = arith.constant 0 : index
    %c0_39 = arith.constant 0 : index
    %64 = vector.load %arg10[%c1_37, %c0_38, %c0_39] : memref<4x8x1xf32, #tpu.memory_space<vmem>>, vector<1x8x1xf32>
    %65 = vector.shape_cast %64 : vector<1x8x1xf32> to vector<8x1xf32>
    %66 = vector.shape_cast %63 : vector<8x1xf32> to vector<1x8x1xf32>
    tpu.vector_store %arg10[%c1_37, %c0_38, %c0_39], %66 {strides = array<i32>} : memref<4x8x1xf32, #tpu.memory_space<vmem>>, vector<1x8x1xf32>,
    %c1_40 = arith.constant 1 : index
    %c0_41 = arith.constant 0 : index
    %c0_42 = arith.constant 0 : index
    %67 = vector.load %arg9[%c1_40, %c0_41, %c0_42] : memref<4x8x1xf32, #tpu.memory_space<vmem>>, vector<1x8x1xf32>
    %68 = vector.shape_cast %67 : vector<1x8x1xf32> to vector<8x1xf32>
    %69 = vector.shape_cast %52 : vector<8x1xf32> to vector<1x8x1xf32>
    tpu.vector_store %arg9[%c1_40, %c0_41, %c0_42], %69 {strides = array<i32>} : memref<4x8x1xf32, #tpu.memory_space<vmem>>, vector<1x8x1xf32>,
    %70 = arith.truncf %57 : vector<8x8xf32> to vector<8x8xbf16>
    %cst_43 = arith.constant dense<0.000000e+00> : vector<8x8xf32>
    %71 = tpu.matmul %70, %46, %cst_43 {dimension_numbers = #tpu.dot_dimension_numbers<[1], [0], [0], [1], [0, 0, 1, 1], [], []>} : vector<8x8xbf16>, vector<8x8xbf16>, vector<8x8xf32> -> vector<8x8xf32>
    %c0_44 = arith.constant 0 : index
    %c8 = arith.constant 8 : index
    %72 = vector.load %arg11[%c0_44, %c8] : memref<8x32xf32, #tpu.memory_space<vmem>>, vector<8x8xf32>
    %73 = vector.broadcast %54 : vector<8x1xf32> to vector<8x8xf32>
    %74 = arith.mulf %73, %72 : vector<8x8xf32>
    %75 = arith.addf %74, %71 : vector<8x8xf32>
    %c0_45 = arith.constant 0 : index
    %c8_46 = arith.constant 8 : index
    %76 = vector.load %arg11[%c0_45, %c8_46] : memref<8x32xf32, #tpu.memory_space<vmem>>, vector<8x8xf32>
    tpu.vector_store %arg11[%c0_45, %c8_46], %75 {strides = array<i32>} : memref<8x32xf32, #tpu.memory_space<vmem>>, vector<8x8xf32>,
    %77 = vector.extract_strided_slice %6 {offsets = [0, 16], sizes = [8, 8], strides = [1, 1]} : vector<8x32xbf16> to vector<8x8xbf16>
    %78 = vector.extract_strided_slice %8 {offsets = [0, 16], sizes = [8, 8], strides = [1, 1]} : vector<8x32xbf16> to vector<8x8xbf16>
    %79 = vector.extract_strided_slice %10 {offsets = [0, 16], sizes = [8, 8], strides = [1, 1]} : vector<8x32xbf16> to vector<8x8xbf16>
    %cst_47 = arith.constant dense<0.000000e+00> : vector<8x8xf32>
    %80 = tpu.matmul %77, %78, %cst_47 {dimension_numbers = #tpu.dot_dimension_numbers<[1], [1], [0], [0], [0, 0, 1, 0], [], []>} : vector<8x8xbf16>, vector<8x8xbf16>, vector<8x8xf32> -> vector<8x8xf32>
    %c2 = arith.constant 2 : index
    %c0_48 = arith.constant 0 : index
    %c0_49 = arith.constant 0 : index
    %81 = vector.load %arg9[%c2, %c0_48, %c0_49] : memref<4x8x1xf32, #tpu.memory_space<vmem>>, vector<1x8x1xf32>
    %82 = vector.shape_cast %81 : vector<1x8x1xf32> to vector<8x1xf32>
    %cst_50 = arith.constant dense<0xFF800000> : vector<8xf32>
    %83 = vector.multi_reduction <maximumf>, %80, %cst_50 [1] : vector<8x8xf32> to vector<8xf32>
    %84 = vector.shape_cast %83 : vector<8xf32> to vector<8x1xf32>
    %85 = arith.maximumf %82, %84 : vector<8x1xf32>
    %86 = arith.subf %82, %85 : vector<8x1xf32>
    %87 = math.exp %86 : vector<8x1xf32>
    %88 = vector.broadcast %85 : vector<8x1xf32> to vector<8x8xf32>
    %89 = arith.subf %80, %88 : vector<8x8xf32>
    %90 = math.exp %89 : vector<8x8xf32>
    %c2_51 = arith.constant 2 : index
    %c0_52 = arith.constant 0 : index
    %c0_53 = arith.constant 0 : index
    %91 = vector.load %arg10[%c2_51, %c0_52, %c0_53] : memref<4x8x1xf32, #tpu.memory_space<vmem>>, vector<1x8x1xf32>
    %92 = vector.shape_cast %91 : vector<1x8x1xf32> to vector<8x1xf32>
    %93 = arith.mulf %87, %92 : vector<8x1xf32>
    %cst_54 = arith.constant dense<0.000000e+00> : vector<8xf32>
    %94 = vector.multi_reduction <add>, %90, %cst_54 [1] : vector<8x8xf32> to vector<8xf32>
    %95 = vector.shape_cast %94 : vector<8xf32> to vector<8x1xf32>
    %96 = arith.addf %93, %95 : vector<8x1xf32>
    %c2_55 = arith.constant 2 : index
    %c0_56 = arith.constant 0 : index
    %c0_57 = arith.constant 0 : index
    %97 = vector.load %arg10[%c2_55, %c0_56, %c0_57] : memref<4x8x1xf32, #tpu.memory_space<vmem>>, vector<1x8x1xf32>
    %98 = vector.shape_cast %97 : vector<1x8x1xf32> to vector<8x1xf32>
    %99 = vector.shape_cast %96 : vector<8x1xf32> to vector<1x8x1xf32>
    tpu.vector_store %arg10[%c2_55, %c0_56, %c0_57], %99 {strides = array<i32>} : memref<4x8x1xf32, #tpu.memory_space<vmem>>, vector<1x8x1xf32>,
    %c2_58 = arith.constant 2 : index
    %c0_59 = arith.constant 0 : index
    %c0_60 = arith.constant 0 : index
    %100 = vector.load %arg9[%c2_58, %c0_59, %c0_60] : memref<4x8x1xf32, #tpu.memory_space<vmem>>, vector<1x8x1xf32>
    %101 = vector.shape_cast %100 : vector<1x8x1xf32> to vector<8x1xf32>
    %102 = vector.shape_cast %85 : vector<8x1xf32> to vector<1x8x1xf32>
    tpu.vector_store %arg9[%c2_58, %c0_59, %c0_60], %102 {strides = array<i32>} : memref<4x8x1xf32, #tpu.memory_space<vmem>>, vector<1x8x1xf32>,
    %103 = arith.truncf %90 : vector<8x8xf32> to vector<8x8xbf16>
    %cst_61 = arith.constant dense<0.000000e+00> : vector<8x8xf32>
    %104 = tpu.matmul %103, %79, %cst_61 {dimension_numbers = #tpu.dot_dimension_numbers<[1], [0], [0], [1], [0, 0, 1, 1], [], []>} : vector<8x8xbf16>, vector<8x8xbf16>, vector<8x8xf32> -> vector<8x8xf32>
    %c0_62 = arith.constant 0 : index
    %c16 = arith.constant 16 : index
    %105 = vector.load %arg11[%c0_62, %c16] : memref<8x32xf32, #tpu.memory_space<vmem>>, vector<8x8xf32>
    %106 = vector.broadcast %87 : vector<8x1xf32> to vector<8x8xf32>
    %107 = arith.mulf %106, %105 : vector<8x8xf32>
    %108 = arith.addf %107, %104 : vector<8x8xf32>
    %c0_63 = arith.constant 0 : index
    %c16_64 = arith.constant 16 : index
    %109 = vector.load %arg11[%c0_63, %c16_64] : memref<8x32xf32, #tpu.memory_space<vmem>>, vector<8x8xf32>
    tpu.vector_store %arg11[%c0_63, %c16_64], %108 {strides = array<i32>} : memref<8x32xf32, #tpu.memory_space<vmem>>, vector<8x8xf32>,
    %110 = vector.extract_strided_slice %6 {offsets = [0, 24], sizes = [8, 8], strides = [1, 1]} : vector<8x32xbf16> to vector<8x8xbf16>
    %111 = vector.extract_strided_slice %8 {offsets = [0, 24], sizes = [8, 8], strides = [1, 1]} : vector<8x32xbf16> to vector<8x8xbf16>
    %112 = vector.extract_strided_slice %10 {offsets = [0, 24], sizes = [8, 8], strides = [1, 1]} : vector<8x32xbf16> to vector<8x8xbf16>
    %cst_65 = arith.constant dense<0.000000e+00> : vector<8x8xf32>
    %113 = tpu.matmul %110, %111, %cst_65 {dimension_numbers = #tpu.dot_dimension_numbers<[1], [1], [0], [0], [0, 0, 1, 0], [], []>} : vector<8x8xbf16>, vector<8x8xbf16>, vector<8x8xf32> -> vector<8x8xf32>
    %c3 = arith.constant 3 : index
    %c0_66 = arith.constant 0 : index
    %c0_67 = arith.constant 0 : index
    %114 = vector.load %arg9[%c3, %c0_66, %c0_67] : memref<4x8x1xf32, #tpu.memory_space<vmem>>, vector<1x8x1xf32>
    %115 = vector.shape_cast %114 : vector<1x8x1xf32> to vector<8x1xf32>
    %cst_68 = arith.constant dense<0xFF800000> : vector<8xf32>
    %116 = vector.multi_reduction <maximumf>, %113, %cst_68 [1] : vector<8x8xf32> to vector<8xf32>
    %117 = vector.shape_cast %116 : vector<8xf32> to vector<8x1xf32>
    %118 = arith.maximumf %115, %117 : vector<8x1xf32>
    %119 = arith.subf %115, %118 : vector<8x1xf32>
    %120 = math.exp %119 : vector<8x1xf32>
    %121 = vector.broadcast %118 : vector<8x1xf32> to vector<8x8xf32>
    %122 = arith.subf %113, %121 : vector<8x8xf32>
    %123 = math.exp %122 : vector<8x8xf32>
    %c3_69 = arith.constant 3 : index
    %c0_70 = arith.constant 0 : index
    %c0_71 = arith.constant 0 : index
    %124 = vector.load %arg10[%c3_69, %c0_70, %c0_71] : memref<4x8x1xf32, #tpu.memory_space<vmem>>, vector<1x8x1xf32>
    %125 = vector.shape_cast %124 : vector<1x8x1xf32> to vector<8x1xf32>
    %126 = arith.mulf %120, %125 : vector<8x1xf32>
    %cst_72 = arith.constant dense<0.000000e+00> : vector<8xf32>
    %127 = vector.multi_reduction <add>, %123, %cst_72 [1] : vector<8x8xf32> to vector<8xf32>
    %128 = vector.shape_cast %127 : vector<8xf32> to vector<8x1xf32>
    %129 = arith.addf %126, %128 : vector<8x1xf32>
    %c3_73 = arith.constant 3 : index
    %c0_74 = arith.constant 0 : index
    %c0_75 = arith.constant 0 : index
    %130 = vector.load %arg10[%c3_73, %c0_74, %c0_75] : memref<4x8x1xf32, #tpu.memory_space<vmem>>, vector<1x8x1xf32>
    %131 = vector.shape_cast %130 : vector<1x8x1xf32> to vector<8x1xf32>
    %132 = vector.shape_cast %129 : vector<8x1xf32> to vector<1x8x1xf32>
    tpu.vector_store %arg10[%c3_73, %c0_74, %c0_75], %132 {strides = array<i32>} : memref<4x8x1xf32, #tpu.memory_space<vmem>>, vector<1x8x1xf32>,
    %c3_76 = arith.constant 3 : index
    %c0_77 = arith.constant 0 : index
    %c0_78 = arith.constant 0 : index
    %133 = vector.load %arg9[%c3_76, %c0_77, %c0_78] : memref<4x8x1xf32, #tpu.memory_space<vmem>>, vector<1x8x1xf32>
    %134 = vector.shape_cast %133 : vector<1x8x1xf32> to vector<8x1xf32>
    %135 = vector.shape_cast %118 : vector<8x1xf32> to vector<1x8x1xf32>
    tpu.vector_store %arg9[%c3_76, %c0_77, %c0_78], %135 {strides = array<i32>} : memref<4x8x1xf32, #tpu.memory_space<vmem>>, vector<1x8x1xf32>,
    %136 = arith.truncf %123 : vector<8x8xf32> to vector<8x8xbf16>
    %cst_79 = arith.constant dense<0.000000e+00> : vector<8x8xf32>
    %137 = tpu.matmul %136, %112, %cst_79 {dimension_numbers = #tpu.dot_dimension_numbers<[1], [0], [0], [1], [0, 0, 1, 1], [], []>} : vector<8x8xbf16>, vector<8x8xbf16>, vector<8x8xf32> -> vector<8x8xf32>
    %c0_80 = arith.constant 0 : index
    %c24 = arith.constant 24 : index
    %138 = vector.load %arg11[%c0_80, %c24] : memref<8x32xf32, #tpu.memory_space<vmem>>, vector<8x8xf32>
    %139 = vector.broadcast %120 : vector<8x1xf32> to vector<8x8xf32>
    %140 = arith.mulf %139, %138 : vector<8x8xf32>
    %141 = arith.addf %140, %137 : vector<8x8xf32>
    %c0_81 = arith.constant 0 : index
    %c24_82 = arith.constant 24 : index
    %142 = vector.load %arg11[%c0_81, %c24_82] : memref<8x32xf32, #tpu.memory_space<vmem>>, vector<8x8xf32>
    tpu.vector_store %arg11[%c0_81, %c24_82], %141 {strides = array<i32>} : memref<8x32xf32, #tpu.memory_space<vmem>>, vector<8x8xf32>,
    %c0_i32_83 = arith.constant 0 : i32
    %143 = arith.cmpi eq, %arg2, %c0_i32_83 : i32
    %144 = arith.extui %143 : i1 to i32
    %c0_i32_84 = arith.constant 0 : i32
    %145 = arith.cmpi ne, %144, %c0_i32_84 : i32
    scf.if %145 {
      %c0_85 = arith.constant 0 : index
      %c0_86 = arith.constant 0 : index
      %c0_87 = arith.constant 0 : index
      %146 = vector.load %arg10[%c0_85, %c0_86, %c0_87] : memref<4x8x1xf32, #tpu.memory_space<vmem>>, vector<1x8x1xf32>
      %147 = vector.shape_cast %146 : vector<1x8x1xf32> to vector<8x1xf32>
      %148 = tpu.reciprocal %147 {approx = true} : vector<8x1xf32> -> vector<8x1xf32>
      %c0_88 = arith.constant 0 : index
      %c0_89 = arith.constant 0 : index
      %149 = vector.load %arg11[%c0_88, %c0_89] : memref<8x32xf32, #tpu.memory_space<vmem>>, vector<8x8xf32>
      %150 = vector.broadcast %148 : vector<8x1xf32> to vector<8x8xf32>
      %151 = arith.mulf %149, %150 : vector<8x8xf32>
      %c0_90 = arith.constant 0 : index
      %c0_91 = arith.constant 0 : index
      %152 = vector.load %arg11[%c0_90, %c0_91] : memref<8x32xf32, #tpu.memory_space<vmem>>, vector<8x8xf32>
      tpu.vector_store %arg11[%c0_90, %c0_91], %151 {strides = array<i32>} : memref<8x32xf32, #tpu.memory_space<vmem>>, vector<8x8xf32>,
      %c1_92 = arith.constant 1 : index
      %c0_93 = arith.constant 0 : index
      %c0_94 = arith.constant 0 : index
      %153 = vector.load %arg10[%c1_92, %c0_93, %c0_94] : memref<4x8x1xf32, #tpu.memory_space<vmem>>, vector<1x8x1xf32>
      %154 = vector.shape_cast %153 : vector<1x8x1xf32> to vector<8x1xf32>
      %155 = tpu.reciprocal %154 {approx = true} : vector<8x1xf32> -> vector<8x1xf32>
      %c0_95 = arith.constant 0 : index
      %c8_96 = arith.constant 8 : index
      %156 = vector.load %arg11[%c0_95, %c8_96] : memref<8x32xf32, #tpu.memory_space<vmem>>, vector<8x8xf32>
      %157 = vector.broadcast %155 : vector<8x1xf32> to vector<8x8xf32>
      %158 = arith.mulf %156, %157 : vector<8x8xf32>
      %c0_97 = arith.constant 0 : index
      %c8_98 = arith.constant 8 : index
      %159 = vector.load %arg11[%c0_97, %c8_98] : memref<8x32xf32, #tpu.memory_space<vmem>>, vector<8x8xf32>
      tpu.vector_store %arg11[%c0_97, %c8_98], %158 {strides = array<i32>} : memref<8x32xf32, #tpu.memory_space<vmem>>, vector<8x8xf32>,
      %c2_99 = arith.constant 2 : index
      %c0_100 = arith.constant 0 : index
      %c0_101 = arith.constant 0 : index
      %160 = vector.load %arg10[%c2_99, %c0_100, %c0_101] : memref<4x8x1xf32, #tpu.memory_space<vmem>>, vector<1x8x1xf32>
      %161 = vector.shape_cast %160 : vector<1x8x1xf32> to vector<8x1xf32>
      %162 = tpu.reciprocal %161 {approx = true} : vector<8x1xf32> -> vector<8x1xf32>
      %c0_102 = arith.constant 0 : index
      %c16_103 = arith.constant 16 : index
      %163 = vector.load %arg11[%c0_102, %c16_103] : memref<8x32xf32, #tpu.memory_space<vmem>>, vector<8x8xf32>
      %164 = vector.broadcast %162 : vector<8x1xf32> to vector<8x8xf32>
      %165 = arith.mulf %163, %164 : vector<8x8xf32>
      %c0_104 = arith.constant 0 : index
      %c16_105 = arith.constant 16 : index
      %166 = vector.load %arg11[%c0_104, %c16_105] : memref<8x32xf32, #tpu.memory_space<vmem>>, vector<8x8xf32>
      tpu.vector_store %arg11[%c0_104, %c16_105], %165 {strides = array<i32>} : memref<8x32xf32, #tpu.memory_space<vmem>>, vector<8x8xf32>,
      %c3_106 = arith.constant 3 : index
      %c0_107 = arith.constant 0 : index
      %c0_108 = arith.constant 0 : index
      %167 = vector.load %arg10[%c3_106, %c0_107, %c0_108] : memref<4x8x1xf32, #tpu.memory_space<vmem>>, vector<1x8x1xf32>
      %168 = vector.shape_cast %167 : vector<1x8x1xf32> to vector<8x1xf32>
      %169 = tpu.reciprocal %168 {approx = true} : vector<8x1xf32> -> vector<8x1xf32>
      %c0_109 = arith.constant 0 : index
      %c24_110 = arith.constant 24 : index
      %170 = vector.load %arg11[%c0_109, %c24_110] : memref<8x32xf32, #tpu.memory_space<vmem>>, vector<8x8xf32>
      %171 = vector.broadcast %169 : vector<8x1xf32> to vector<8x8xf32>
      %172 = arith.mulf %170, %171 : vector<8x8xf32>
      %c0_111 = arith.constant 0 : index
      %c24_112 = arith.constant 24 : index
      %173 = vector.load %arg11[%c0_111, %c24_112] : memref<8x32xf32, #tpu.memory_space<vmem>>, vector<8x8xf32>
      tpu.vector_store %arg11[%c0_111, %c24_112], %172 {strides = array<i32>} : memref<8x32xf32, #tpu.memory_space<vmem>>, vector<8x8xf32>,
      %c0_113 = arith.constant 0 : index
      %c0_114 = arith.constant 0 : index
      %174 = vector.load %arg11[%c0_113, %c0_114] : memref<8x32xf32, #tpu.memory_space<vmem>>, vector<8x32xf32>
      %175 = arith.truncf %174 : vector<8x32xf32> to vector<8x32xbf16>
      %c0_115 = arith.constant 0 : index
      %c0_116 = arith.constant 0 : index
      %176 = vector.load %arg6[%c0_115, %c0_116] : memref<32x32xbf16, #tpu.memory_space<vmem>>, vector<32x32xbf16>
      %cst_117 = arith.constant dense<0.000000e+00> : vector<8x32xf32>
      %177 = tpu.matmul %175, %176, %cst_117 {dimension_numbers = #tpu.dot_dimension_numbers<[1], [0], [0], [1], [0, 0, 1, 1], [], []>} : vector<8x32xbf16>, vector<32x32xbf16>, vector<8x32xf32> -> vector<8x32xf32>
      %c0_118 = arith.constant 0 : index
      %c0_119 = arith.constant 0 : index
      %178 = vector.load %arg7[%c0_118, %c0_119] : memref<1x32xf32, #tpu.memory_space<vmem>>, vector<1x32xf32>
      %179 = vector.broadcast %178 : vector<1x32xf32> to vector<8x32xf32>
      %180 = arith.addf %177, %179 : vector<8x32xf32>
      %c0_120 = arith.constant 0 : index
      %c0_121 = arith.constant 0 : index
      %c0_122 = arith.constant 0 : index
      %181 = vector.load %arg8[%c0_120, %c0_121, %c0_122] : memref<1x8x32xf32, #tpu.memory_space<vmem>>, vector<1x8x32xf32>
      %182 = vector.shape_cast %181 : vector<1x8x32xf32> to vector<8x32xf32>
      %183 = vector.shape_cast %180 : vector<8x32xf32> to vector<1x8x32xf32>
      tpu.vector_store %arg8[%c0_120, %c0_121, %c0_122], %183 {strides = array<i32>} : memref<1x8x32xf32, #tpu.memory_space<vmem>>, vector<1x8x32xf32>,
    } else {
    }
    return
  }
  func.func @transform_0(%arg0: i32, %arg1: i32, %arg2: i32) -> (i32, i32, i32) {
    %c0_i32 = arith.constant 0 : i32
    %c0_i32_0 = arith.constant 0 : i32
    return %arg0, %arg1, %c0_i32 : i32, i32, i32
  }
  func.func @transform_1(%arg0: i32, %arg1: i32, %arg2: i32) -> (i32, i32, i32) {
    %c0_i32 = arith.constant 0 : i32
    %c0_i32_0 = arith.constant 0 : i32
    return %arg0, %arg2, %c0_i32 : i32, i32, i32
  }
  func.func @transform_2(%arg0: i32, %arg1: i32, %arg2: i32) -> (i32, i32, i32) {
    %c0_i32 = arith.constant 0 : i32
    %c0_i32_0 = arith.constant 0 : i32
    return %arg0, %arg2, %c0_i32 : i32, i32, i32
  }
  func.func @transform_3(%arg0: i32, %arg1: i32, %arg2: i32) -> (i32, i32) {
    %c0_i32 = arith.constant 0 : i32
    %c0_i32_0 = arith.constant 0 : i32
    %c0_i32_1 = arith.constant 0 : i32
    return %c0_i32, %c0_i32_0 : i32, i32
  }
  func.func @transform_4(%arg0: i32, %arg1: i32, %arg2: i32) -> (i32, i32) {
    %c0_i32 = arith.constant 0 : i32
    %c0_i32_0 = arith.constant 0 : i32
    %c0_i32_1 = arith.constant 0 : i32
    return %c0_i32, %c0_i32_0 : i32, i32
  }
  func.func @transform_5(%arg0: i32, %arg1: i32, %arg2: i32) -> (i32, i32, i32) {
    %c0_i32 = arith.constant 0 : i32
    %c0_i32_0 = arith.constant 0 : i32
    return %arg0, %arg1, %c0_i32 : i32, i32, i32
  }
}

</mosaic_0001>

<bundles_post_ra>
// kernel: tpu_custom_call.1
= control target key start
LH: loop header
LB: loop body
LE: loop exit
PB: predicated region body
PF: predicated region fallthrough
CT: control target
= control target key end

     0   :  { %s2191_s0 = inlined_call_operand.hbm [shape: bf16[2,8,32], index: 0, kind: input, shape index: {}]   ;;  %s2192_s1 = inlined_call_operand.hbm [shape: bf16[2,8,32], index: 1, kind: input, shape index: {}]   ;;  %s2193_s2 = inlined_call_operand.hbm [shape: bf16[2,8,32], index: 2, kind: input, shape index: {}]   ;;  %s2194_s3 = inlined_call_operand.hbm [shape: bf16[32,32], index: 3, kind: input, shape index: {}]   ;;  %s2195_s4 = inlined_call_operand.hbm [shape: f32[1,32], index: 4, kind: input, shape index: {}]   ;;  %s2196_s5 = inlined_call_operand.hbm [shape: f32[2,8,32], index: 5, kind: output, shape index: {}]  }
   0x1   :  { %2211 = sst [smem:[#allocation22_spill]] %s2192_s1 }
   0x2   :  { %2212 = sst [smem:[#allocation23_spill]] %s2194_s3 }
   0x3   :  { %2213 = sst [smem:[#allocation24_spill]] %s2195_s4 }
   0x4   :  { %10 = vsyncpa [#allocation6], 0 }
   0x5   :  { %12 = vsyncpa [#allocation6 + $0x1], 0 }
   0x6   :  { %13 = vsyncpa [#allocation9], 0 }
   0x7   :  { %15 = vsyncpa [#allocation9 + $0x1], 0 }
   0x8   :  { %16 = vsyncpa [#allocation12], 0 }
   0x9   :  { %17 = vsyncpa [#allocation7], 0 }
   0xa   :  { %19 = vsyncpa [#allocation7 + $0x1], 0  ;;  %s1753_s18 = smov 0   ;;  %s1755_s19 = smov 0  }
   0xb   :  { %s1757_s20 = smov 0   ;;  %s1759_s21 = smov 0  }
   0xc   :  { %s1761_s22 = smov 0   ;;  %s1763_s23 = smov 0  }
   0xd LB: > { %2214 = sst [smem:[#allocation19_spill]] %s1699_s22  ;;  %s1784_s24 = sadd.s32 4294967295, %s1703_s23   ;;  %s1703_s23 = sphi %s1763_s23, %s25_s23   ;;  %s1699_s22 = sphi %s1761_s22, %s2244_s22   ;;  %s1695_s21 = sphi %s1759_s21, %s2243_s21   ;;  %s1691_s20 = sphi %s1757_s20, %s2247_s20   ;;  %s1687_s19 = sphi %s1755_s19, %s2246_s19   ;;  %s1683_s18 = sphi %s1753_s18, %s2245_s18  }
   0xe   : > { %s1220_s25 = sadd.s32 4294967294, %s1703_s23   ;;  %p66_p0 = scmp.ne.s32.totalorder %s1687_s19, %s1683_s18 }
   0xf   : > { %p2197_p1 = scmp.eq.s32.totalorder %s1784_s24, 0  ;;  %p196_p3 = scmp.eq.s32.totalorder %s1220_s25, 1 }
  0x10   : > { %p1221_p5 = scmp.ge.s32.totalorder %s1703_s23, 1  ;;  %p203_p7 = scmp.lt.s32.totalorder %s1703_s23, 3 }
  0x11   : > { %p1793_p4 = por %p2197_p1, %p66_p0  ;;  %p1798_p6 = por %p196_p3, %p66_p0 }
  0x12   : > { %p1803_p8 = pnand %p1221_p5, %p203_p7  ;;  %s1705_s29 = smov [#allocation11]  }
  0x13   : > { %s2215_s26 = scalar_select %p1793_p4, 1, 0 }
  0x14   : > { %s2216_s27 = scalar_select %p1798_p6, 1, 0 }
  0x15   : > { %s2217_s28 = scalar_select %p1803_p8, 1, 0 }
  0x16   : > { %s215_s30 = sshll.u32 %s1705_s29, 4  ;;  %p1348_p9 = pneg %p1803_p8  ;;  %s216_s30 = int_to_ptr.vmem [resolvable:$true] %s215_s30 }
  0x17   : > { %s44_s7 = sadd.s32 1, %s1699_s22  ;;  %s2219_s3 = sld [smem:[#allocation23_spill]] }
  0x18   : > { %p1812_p11 = pnand %p1348_p9, %p2197_p1 }
  0x1a   : > { %s2218_s6 = scalar_select %p1812_p11, 1, 0 }
  0x1b   : > { %p2203_p13 = pneg %p1812_p11 }
  0x1d   : > { %s1467_s10 = scalar_lea.hbm %s2219_s3, 256 }
  0x1e   : > { %p1468_p12 = scmp.ne.s32.totalorder %s2219_s3, %s1467_s10  ;;  %p1474_p5 = scmp.lt.u32.totalorder %s1467_s10, %s2219_s3 }
  0x20   : > { %p1470_p0 = pnand %p2203_p13, %p1468_p12 }
  0x22   : > { %p1471_p3 = pneg %p1470_p0 }
  0x24   : > { %p1476_p7 = pnand %p1474_p5, %p1471_p3 }
  0x26   : > { %1479 = shalt.err (!%p1476_p7)
}
  0x27   : > { %s1480_s15 = scalar_lea.vmem %s216_s30, 256  ;;  %p1488_p2 = scmp.lt.s32.totalorder %s216_s30, %s216_s30 }
  0x28   : > { %p1481_p9 = scmp.ne.s32.totalorder %s216_s30, %s1480_s15  ;;  %p1489_p6 = scmp.lt.s32.totalorder %s1480_s15, %s1480_s15 }
  0x2a   : > { %p1483_p10 = pnand %p1481_p9, %p2203_p13  ;;  %p1490_p4 = por %p1489_p6, %p1488_p2 }
  0x2c   : > { %p1484_p1 = pneg %p1483_p10 }
  0x2e   : > { %p1491_p8 = pnand %p1490_p4, %p1484_p1 }
  0x30   : > { %1494 = shalt.err (!%p1491_p8)
}
  0x31   : > { %s1706_s16 = smov 64   ;;  %s1707_s17 = smov 4  }
  0x32   : > { %1351 = dma.hbm_to_vmem [thread:$0]  (!%p1812_p11), %s2219_s3, 256, %s216_s30, [#allocation12], %s1706_s16, %s1706_s16, %s1707_s17  }
  0x33   : > { %p46_p1 = scmp.ge.s32.totalorder %s44_s7, 2  ;;  %s53_s8 = sadd.s32 1, %s1691_s20 }
  0x34   : > { %p60_p2 = scmp.ne.s32.totalorder %s1691_s20, %s1687_s19  ;;  %p61_p4 = scmp.eq.s32.totalorder %s1703_s23, 0 }
  0x35   : > { %s2249_s7 = smov (%p46_p1, %s44_s7), 0  ;;  %p2221_p8 = scmp.eq.s32.totalorder %s1784_s24, 1 }
  0x36   : > { %2220 = sst [smem:[#allocation20_spill]] %s2249_s7  ;;  %p62_p6 = por %p61_p4, %p60_p2 }
  0x37   : > { %p1847_p10 = por %p2221_p8, %p60_p2  ;;  %s48_s10 = ssub.s32 %s1699_s22, %s2249_s7 }
  0x38   : > { %p1371_p12 = scmp.lt.s32.totalorder %s1703_s23, 2  ;;  %p51_p0 = scmp.eq.s32.totalorder %s48_s10, 0 }
  0x39   : > { %s2222_s9 = scalar_select %p1847_p10, 1, 0 }
  0x3a   : > { %s2200_s11 = sand.u32 1, %s1691_s20   ;;  %s1860_s12 = sshll.u32 %s1699_s22, 6 }
  0x3b   : > { %s1857_s30 = sshll.u32 %s2200_s11, 2  ;;  %p1865_p3 = pnand %p1371_p12, %p62_p6 }
  0x3c   : > { %s1863_s13 = scalar_select %p51_p0, %s1691_s20, %s53_s8  }
  0x3d   : > { %s2224_s14 = scalar_select %p1865_p3, 1, 0 }
  0x3e   : > { %2223 = sst [smem:[#allocation21_spill]] %s1863_s13  ;;  %s259_s15 = sand.u32 1, %s1703_s23  }
  0x3f   : > { %s2225_s1 = sld [smem:[#allocation22_spill]]  ;;  %s263_s29 = scalar_lea.vmem [#allocation8], %s1857_s30 }
  0x40   : > { %s271_s10 = sshll.u32 %s263_s29, 4  ;;  %s1708_s8 = smov [#allocation13]   ;;  %s1877_s10 = int_to_ptr.vmem [resolvable:$true] %s271_s10 }
  0x41   : > { %s1879_s11 = sshll.u32 %s1708_s8, 4  ;;  %s1881_s3 = scalar_lea.sflag [#allocation9], %s259_s15  ;;  %s230_s11 = int_to_ptr.vmem [resolvable:$true] %s1879_s11 }
  0x42   : > { %p1887_p7 = pneg %p1865_p3 }
  0x44   : > { %s2226_s16 = scalar_select %p1887_p7, 1, 0 }
  0x45   : > { %s1874_s25 = scalar_lea.hbm %s2225_s1, %s1860_s12  ;;  %s1500_s22 = scalar_lea.hbm %s2225_s1, 128 }
  0x46   : > { %s1495_s7 = scalar_lea.hbm %s1874_s25, 64  ;;  %p1501_p2 = scmp.lt.u32.totalorder %s1874_s25, %s2225_s1 }
  0x47   : > { %p1496_p5 = scmp.ne.s32.totalorder %s1874_s25, %s1495_s7  ;;  %p1502_p4 = scmp.lt.u32.totalorder %s1500_s22, %s1495_s7 }
  0x48   : > { %p1504_p8 = scmp.lt.u32.totalorder %s1495_s7, %s1874_s25 }
  0x49   : > { %p1498_p9 = pnand %p1887_p7, %p1496_p5  ;;  %p1503_p6 = por %p1502_p4, %p1501_p2 }
  0x4b   : > { %p1499_p1 = pneg %p1498_p9  ;;  %p1505_p12 = por %p1504_p8, %p1503_p6 }
  0x4d   : > { %p1506_p0 = pnand %p1505_p12, %p1499_p1 }
  0x4f   : > { %1509 = shalt.err (!%p1506_p0)
}
  0x50   : > { %s1510_s15 = scalar_lea.vmem %s1877_s10, 64  ;;  %s1709_s17 = smov [#allocation8]  }
  0x51   : > { %p1511_p5 = scmp.ne.s32.totalorder %s1877_s10, %s1510_s15  ;;  %s1515_s29 = sshll.u32 %s1709_s17, 4  ;;  %s1516_s29 = int_to_ptr.vmem [resolvable:$false] %s1515_s29 }
  0x52   : > { %s1517_s13 = scalar_lea.vmem %s1516_s29, 128  ;;  %p1518_p10 = scmp.lt.s32.totalorder %s1877_s10, %s1516_s29 }
  0x53   : > { %p1513_p9 = pnand %p1511_p5, %p1887_p7  ;;  %p1519_p11 = scmp.lt.s32.totalorder %s1517_s13, %s1510_s15 }
  0x55   : > { %p1514_p13 = pneg %p1513_p9  ;;  %p1520_p2 = por %p1519_p11, %p1518_p10 }
  0x57   : > { %p1521_p4 = pnand %p1520_p2, %p1514_p13 }
  0x59   : > { %1524 = shalt.err (!%p1521_p4)
}
  0x5a   : > { %1361 = dma.hbm_to_vmem [thread:$0]  (!%p1865_p3), %s1874_s25, 64, %s1877_s10, %s1881_s3  }
  0x5b   : > { %s2227_s4 = sld [smem:[#allocation24_spill]]  ;;  %p2228_p11 = scmp.ne.s32.totalorder %s2218_s6, 0 }
  0x5d   : > { %p2229_p13 = pneg %p2228_p11 }
  0x61   : > { %s1525_s8 = scalar_lea.hbm %s2227_s4, 16 }
  0x62   : > { %p1526_p1 = scmp.ne.s32.totalorder %s2227_s4, %s1525_s8  ;;  %p1532_p8 = scmp.lt.u32.totalorder %s1525_s8, %s2227_s4 }
  0x64   : > { %p1528_p10 = pnand %p1526_p1, %p2229_p13 }
  0x66   : > { %p1529_p6 = pneg %p1528_p10 }
  0x68   : > { %p1534_p12 = pnand %p1532_p8, %p1529_p6 }
  0x6a   : > { %1537 = shalt.err (!%p1534_p12)
}
  0x6b   : > { %s1538_s25 = scalar_lea.vmem %s230_s11, 16  ;;  %p2230_p5 = pmov %p2229_p13 }
  0x6c   : > { %p1539_p0 = scmp.ne.s32.totalorder %s230_s11, %s1538_s25  ;;  %s1545_s10 = scalar_lea.vmem %s230_s11, 32 }
  0x6d   : > { %p1546_p4 = scmp.lt.s32.totalorder %s230_s11, %s230_s11  ;;  %p1547_p3 = scmp.lt.s32.totalorder %s1545_s10, %s1538_s25 }
  0x6e   : > { %p1541_p9 = pnand %p1539_p0, %p2230_p5 }
  0x6f   : > { %p1548_p7 = por %p1547_p3, %p1546_p4 }
  0x70   : > { %p1542_p2 = pneg %p1541_p9 }
  0x72   : > { %p1549_p1 = pnand %p1548_p7, %p1542_p2 }
  0x74   : > { %1552 = shalt.err (!%p1549_p1)
}
  0x75   : > { %1354 = dma.hbm_to_vmem [thread:$0]  (!%p2228_p11), %s2227_s4, 16, %s230_s11, [#allocation12]  }
  0x76   : > { %s1936_s8 = scalar_lea.hbm %s2191_s0, %s1860_s12  ;;  %s244_s17 = scalar_lea.vmem [#allocation5], %s1857_s30 }
  0x77   : > { %s252_s6 = sshll.u32 %s244_s17, 4  ;;  %s1945_s25 = scalar_lea.hbm %s2193_s2, %s1860_s12  ;;  %s1939_s6 = int_to_ptr.vmem [resolvable:$true] %s252_s6 }
  0x78   : > { %s2231_s10 = sand.u32 1, %s1691_s20   ;;  %s1553_s1 = scalar_lea.hbm %s1936_s8, 64 }
  0x79   : > { %s241_s11 = scalar_lea.sflag [#allocation6], %s2231_s10  ;;  %p1554_p3 = scmp.ne.s32.totalorder %s1936_s8, %s1553_s1 }
  0x7a   : > { %p2232_p7 = scmp.ne.s32.totalorder %s2226_s16, 0  ;;  %s1558_s7 = scalar_lea.hbm %s2191_s0, 128 }
  0x7b   : > { %p1559_p10 = scmp.lt.u32.totalorder %s1936_s8, %s2191_s0  ;;  %p1560_p6 = scmp.lt.u32.totalorder %s1558_s7, %s1553_s1 }
  0x7c   : > { %p1556_p11 = pnand %p1554_p3, %p2232_p7  ;;  %p1562_p12 = scmp.lt.u32.totalorder %s1553_s1, %s1936_s8 }
  0x7d   : > { %p1561_p8 = por %p1560_p6, %p1559_p10 }
  0x7e   : > { %p1557_p13 = pneg %p1556_p11 }
  0x7f   : > { %p1563_p0 = por %p1562_p12, %p1561_p8 }
  0x81   : > { %p1564_p5 = pnand %p1563_p0, %p1557_p13 }
  0x83   : > { %1567 = shalt.err (!%p1564_p5)
}
  0x84   : > { %s1568_s12 = scalar_lea.vmem %s1939_s6, 64  ;;  %s1710_s15 = smov [#allocation5]  }
  0x85   : > { %p1569_p9 = scmp.ne.s32.totalorder %s1939_s6, %s1568_s12  ;;  %s1573_s29 = sshll.u32 %s1710_s15, 4  ;;  %s1574_s29 = int_to_ptr.vmem [resolvable:$false] %s1573_s29 }
  0x86   : > { %s1575_s4 = scalar_lea.vmem %s1574_s29, 128  ;;  %p1576_p1 = scmp.lt.s32.totalorder %s1939_s6, %s1574_s29 }
  0x87   : > { %p1571_p2 = pnand %p1569_p9, %p2232_p7  ;;  %p1577_p3 = scmp.lt.s32.totalorder %s1575_s4, %s1568_s12 }
  0x89   : > { %p1572_p4 = pneg %p1571_p2  ;;  %p1578_p11 = por %p1577_p3, %p1576_p1 }
  0x8b   : > { %p1579_p10 = pnand %p1578_p11, %p1572_p4 }
  0x8d   : > { %1582 = shalt.err (!%p1579_p10)
}
  0x8e   : > { %p2233_p13 = scmp.ne.s32.totalorder %s2224_s14, 0  ;;  %s282_s10 = scalar_lea.vmem [#allocation10], %s1857_s30 }
  0x8f   : > { %s290_s1 = sshll.u32 %s282_s10, 4  ;;  %s1583_s13 = scalar_lea.hbm %s1945_s25, 64  ;;  %s291_s1 = int_to_ptr.vmem [resolvable:$true] %s290_s1 }
  0x90   : > { %1358 = dma.hbm_to_vmem [thread:$0]  (!%p2233_p13), %s1936_s8, 64, %s1939_s6, %s241_s11  }
  0x91   : > { %p1584_p6 = scmp.ne.s32.totalorder %s1945_s25, %s1583_s13  ;;  %s1588_s17 = scalar_lea.hbm %s2193_s2, 128 }
  0x92   : > { %p1589_p0 = scmp.lt.u32.totalorder %s1945_s25, %s2193_s2  ;;  %p1590_p5 = scmp.lt.u32.totalorder %s1588_s17, %s1583_s13 }
  0x93   : > { %p1586_p8 = pnand %p1584_p6, %p2232_p7  ;;  %p1592_p2 = scmp.lt.u32.totalorder %s1583_s13, %s1945_s25 }
  0x94   : > { %p1591_p9 = por %p1590_p5, %p1589_p0 }
  0x95   : > { %p1587_p12 = pneg %p1586_p8 }
  0x96   : > { %p1593_p4 = por %p1592_p2, %p1591_p9 }
  0x98   : > { %p1594_p1 = pnand %p1593_p4, %p1587_p12 }
  0x9a   : > { %1597 = shalt.err (!%p1594_p1)
}
  0x9b   : > { %s1598_s30 = scalar_lea.vmem %s291_s1, 64  ;;  %s1711_s8 = smov [#allocation10]  }
  0x9c   : > { %p1599_p3 = scmp.ne.s32.totalorder %s291_s1, %s1598_s30  ;;  %s1603_s6 = sshll.u32 %s1711_s8, 4  ;;  %s1604_s6 = int_to_ptr.vmem [resolvable:$false] %s1603_s6 }
  0x9d   : > { %s1605_s11 = scalar_lea.vmem %s1604_s6, 128  ;;  %p1606_p6 = scmp.lt.s32.totalorder %s291_s1, %s1604_s6 }
  0x9e   : > { %p1601_p11 = pnand %p1599_p3, %p2232_p7  ;;  %p1607_p8 = scmp.lt.s32.totalorder %s1605_s11, %s1598_s30 }
  0xa0   : > { %p1602_p10 = pneg %p1601_p11  ;;  %p1608_p13 = por %p1607_p8, %p1606_p6 }
  0xa2   : > { %p1609_p0 = pnand %p1608_p13, %p1602_p10 }
  0xa4   : > { %1612 = shalt.err (!%p1609_p0)
}
  0xa5   : > { %p2234_p5 = scmp.ne.s32.totalorder %s2224_s14, 0  ;;  %p2235_p12 = scmp.ne.s32.totalorder %s2217_s28, 0 }
  0xa6   : > { %s1992_s16 = sand.u32 (!%p2235_p12), 1, %s1687_s19   ;;  %p2236_p7 = scmp.ne.s32.totalorder (!%p2235_p12), %s2215_s26, 0 }
  0xa7   : > { %1364 = dma.hbm_to_vmem [thread:$0]  (!%p2234_p5), %s1945_s25, 64, %s291_s1, %s1881_s3  }
  0xa8   : > { %299 = sbr.rel (%p2235_p12) target bundleno = 1835 (0x72b), region = 40  ;;  %s1995_s29 = sshll.u32 (!%p2235_p12), %s1992_s16, 2 }
  0xa9   : > { %s302_s4 = scalar_lea.sflag (!%p2235_p12), [#allocation6], %s1992_s16  ;;  %s305_s10 = scalar_lea.vmem (!%p2235_p12), [#allocation5], %s1995_s29 }
  0xaf   : > { %1666 = dma.done.wait (%p2236_p7), %s302_s4, 64  }
  0xb0   : > { %1668 = vsyncadd (%p2236_p7), %s302_s4, 4294967232  ;;  %s310_s3 = sand.u32 1, %s1784_s24   ;;  %s314_s14 = scalar_lea.vmem [#allocation8], %s1995_s29 }
  0xb1   : > { %s311_s28 = scalar_lea.sflag [#allocation9], %s310_s3 }
  0xb2   : > { %1670 = dma.done.wait (%p2236_p7), %s311_s28, 128  }
  0xb3   : > { %1672 = vsyncadd (%p2236_p7), %s311_s28, 4294967168  ;;  %s323_s25 = scalar_lea.vmem [#allocation10], %s1995_s29  ;;  %p2237_p13 = scmp.eq.s32.totalorder %s1784_s24, 0 }
  0xb5   : > { %1674 = dma.done.wait (%p2237_p13), [#allocation12], 272   ;;  %p2238_p9 = pmov %p2237_p13 }
  0xb6   : > { %v1712_v0 = vmov 0.0   ;;  %vm1713_vm0 = vmmov 0   ;;  %vm389_vm1 = vcmask 64512   ;;  %v387_v1 = vld [vmem:[%s314_s14] sm:$0xf]  ;;  %vm374_vm2 = vcmask 7168  }
  0xb7   : > { %1676 = vsyncadd (%p2238_p9), [#allocation12], 4294967024  ;;  %1276 = vmatprep.subr.bf16.mxu0 %v1712_v0  ;;  %1278 = vmatprep.mubr.msk.bf16.mxu0 %vm1713_vm0, %v1712_v0  ;;  %v394_v2 = vsel %vm389_vm1, %v387_v1, 0  ;;  %v385_v3 = vld [vmem:[%s305_s10] sm:$0xf]  ;;  %v1714_v5 = vmov -inf   ;;  %v1241_v12 = vcombine.low %v387_v1, %v387_v1 }
  0xb8   : > { %1282 = vmatprep.subr.bf16.mxu1 %v1712_v0  ;;  %1284 = vmatprep.mubr.msk.bf16.mxu1 %vm1713_vm0, %v1712_v0  ;;  %v386_v4 = vmul.bf16 1052065461, %v385_v3  ;;  %375 = vst.msk [vmem:[#allocation2] sm:$0xff] %vm374_vm2, %v1714_v5  ;;  %376 = vst.msk [vmem:[#allocation2 + $0x8] sm:$0xff] %vm374_vm2, %v1714_v5  ;;  %v1715_v11 = vmov 0   ;;  %s1716_s24 = smov 120  }
  0xb9   : > { %1277 = vmatpush3.bf16.xpose.msra.mxu0 %v394_v2  ;;  %377 = vst.msk [vmem:[#allocation2 + $0x10] sm:$0xff] %vm374_vm2, %v1714_v5  ;;  %378 = vst.msk [vmem:[#allocation2 + $0x18] sm:$0xff] %vm374_vm2, %v1714_v5  ;;  %1437 = vset.pattern.permute.xlu0 %v1715_v11  ;;  %s1717_s26 = smov 112   ;;  %s1718_s1 = smov 104   ;;  %v388_v18 = vld [vmem:[%s323_s25] sm:$0xf] }
  0xba   : > { %1294 = vmatprep.subr.bf16.mxu0 %v1712_v0  ;;  %379 = vst.msk [vmem:[#allocation3] sm:$0xff] %vm374_vm2, %v1712_v0  ;;  %380 = vst.msk [vmem:[#allocation3 + $0x8] sm:$0xff] %vm374_vm2, %v1712_v0  ;;  %1438 = vset.pattern.permute.xlu1 %v1715_v11  ;;  %v1240_v13 = vcombine.low %v386_v4, %v386_v4  ;;  %vm465_vm3 = vcmask 1043456   ;;  %v1243_v56 = vcombine.low %v388_v18, %v388_v18  ;;  %vm383_vm4 = vcmask 261120   ;;  %s1719_s13 = smov 8   ;;  %s1720_s22 = smov 16  }
  0xbb   : > { %381 = vst.msk [vmem:[#allocation3 + $0x10] sm:$0xff] %vm374_vm2, %v1712_v0  ;;  %382 = vst.msk [vmem:[#allocation3 + $0x18] sm:$0xff] %vm374_vm2, %v1712_v0  ;;  %526 = vrot.lane.b32.xlu1 %v1241_v12, %s1716_s24  ;;  %v467_v19 = vsel %vm465_vm3, %v388_v18, 0  ;;  %s1721_s7 = smov 24   ;;  %vm664_vm5 = vcmask 130112   ;;  %vm803_vm6 = vcmask 195712  }
  0xbc   : > { %1283 = vmatpush3.bf16.msra.mxu1 %v467_v19  ;;  %384 = vst.msk [vmem:[#allocation4] sm:$0xff] %vm383_vm4, %v1712_v0  ;;  %vm942_vm7 = vcmask 261312   ;;  %s1237_s17 = sshll.u32 %s1992_s16, 3  ;;  %s1254_s12 = sshll.u32 %s1695_s21, 7 }
  0xbd   : > { %1288 = vmatprep.subr.bf16.mxu1 %v1712_v0  ;;  %s367_s15 = scalar_lea.vmem [#allocation14], %s1237_s17  ;;  %s2141_s11 = scalar_lea.hbm %s2196_s5, %s1254_s12 }
  0xbe   : > { %s1072_s30 = sshll.u32 %s367_s15, 4  ;;  %s1058_s21 = scalar_lea.sflag [#allocation7], %s1992_s16  ;;  %s2143_s30 = int_to_ptr.vmem [resolvable:$true] %s1072_s30 }
  0xbf   : > { %521 = vrot.lane.b32.xlu1 %v1240_v13, %s1716_s24  ;;  %v2044_v14 = vld [vmem:[#allocation2] sm:$0xff]  ;;  %v575_v53 = vld [vmem:[#allocation2 + $0x8] sm:$0xff]  ;;  %s1613_s29 = scalar_lea.vmem %s2143_s30, 128  ;;  %p2239_p4 = scmp.ne.s32.totalorder %s2222_s9, 0 }
  0xc0   : > { %1279 = vmatmul.mubr.msk.bf16.vlgmr.msra.gmra.mrb[0].mxu0 %vm389_vm1, %v386_v4  ;;  %v2086_v57 = vld [vmem:[#allocation2 + $0x10] sm:$0xff]  ;;  %v856_v61 = vld [vmem:[#allocation2 + $0x18] sm:$0xff]  ;;  %p1614_p2 = scmp.ne.s32.totalorder %s2143_s30, %s1613_s29  ;;  %s1722_s4 = smov [#allocation14]  }
  0xc1   : > { %1296 = vmatprep.mubr.msk.bf16.mxu0 %vm1713_vm0, %v1712_v0  ;;  %s1617_s10 = sshll.u32 %s1722_s4, 4  ;;  %s1618_s10 = int_to_ptr.vmem [resolvable:$false] %s1617_s10 }
  0xc2   : > { %p1615_p1 = pnand %p1614_p2, %p2239_p4  ;;  %s1619_s3 = scalar_lea.vmem %s1618_s10, 256 }
  0xc3   : > { %668 = vrot.lane.b32.xlu1 %v1241_v12, %s1717_s26  ;;  %p1620_p11 = scmp.lt.s32.totalorder %s2143_s30, %s1618_s10  ;;  %p1621_p10 = scmp.lt.s32.totalorder %s1619_s3, %s1613_s29 }
  0xc4   : > { %p1616_p3 = pneg %p1615_p1 }
  0xc5   : > { %p1622_p6 = por %p1621_p10, %p1620_p11 }
  0xc7   : > { %666 = vrot.lane.b32.xlu1 %v1240_v13, %s1717_s26  ;;  %p1623_p8 = pnand %p1622_p6, %p1616_p3 }
  0xcb   : > { %807 = vrot.lane.b32.xlu1 %v1241_v12, %s1718_s1 }
  0xcf   : > { %805 = vrot.lane.b32.xlu1 %v1240_v13, %s1718_s1 }
 0x12d   : > { %v527_v23 = vpop.permute.xlu1 %526 }
 0x12e   : > { %v532_v26 = vsel %vm389_vm1, %v527_v23, 0 }
 0x131   : > { %v522_v24 = vpop.permute.xlu1 %521 }
 0x135   : > { %v669_v28 = vpop.permute.xlu1 %668 }
 0x136   : > { %v674_v30 = vsel %vm389_vm1, %v669_v28, 0 }
 0x139   : > { %v667_v29 = vpop.permute.xlu1 %666 }
 0x13d   : > { %v808_v31 = vpop.permute.xlu1 %807 }
 0x13e   : > { %v813_v32 = vsel %vm389_vm1, %v808_v31, 0 }
 0x141   : > { %v806_v33 = vpop.permute.xlu1 %805 }
 0x193   : > { %v430_v6 = vpop.f32.mrb[0].mxu0 }
 0x194   : > { %v1280_v7 = vpop.f32.mrb[1].mxu0  ;;  %v437_v8 = vsel %vm389_vm1, %v430_v6, -inf }
 0x195   : > { %438 = vmax.xlane.f32.xlu0 %v437_v8  ;;  %v433_v9 = vpop.f32.mrb[2].mxu0 }
 0x196   : > { %v1281_v10 = vpop.f32.mrb[3].mxu0 }
 0x222   : > { %v439_v15 = vpop.xlane.xlu0 %438 }
 0x223   : > { %v2047_v16 = vmax.f32 %v2044_v14, %v439_v15 }
 0x225   : > { %v441_v17 = vsub.f32 %v2044_v14, %v2047_v16  ;;  %460 = vst.msk [vmem:[#allocation2] sm:$0xff] %vm374_vm2, %v2047_v16  ;;  %446 = vperm.xlu0 %1437, %v2047_v16   ;;  %v452_v16 = vld [vmem:[#allocation3] sm:$0xff] }
 0x227   : > { %v442_v31 = vmul.f32 1.442695, %v441_v17 }
 0x2a4   : > { %v447_v20 = vpop.permute.xlu0 %446 }
 0x2a5   : > { %v449_v21 = vsub.f32 %v430_v6, %v447_v20 }
 0x2a7   : > { %v450_v22 = vmul.f32 1.442695, %v449_v21 }
 0x2a9   : > { %1443 = vpow2.f32 %v450_v22 }
 0x2b3   : > { %v2058_v25 = vpop.eup %1443 }
 0x2b4   : > { %v461_v27 = vpack.c.bf16 %v2058_v25, %v2058_v25  ;;  %v454_v3 = vsel %vm389_vm1, %v2058_v25, 0.0 }
 0x2b6   : > { %1285 = vmatmul.mubr.msk.bf16.vlgmr.msra.gmra.mrb[0].mxu1 %vm389_vm1, %v461_v27 }
 0x2b7   : > { %1289 = vmatpush3.bf16.xpose.msra.mxu1 %v532_v26  ;;  %1290 = vmatprep.mubr.msk.bf16.mxu1 %vm1713_vm0, %v1712_v0 }
 0x2b8   : > { %1300 = vmatprep.subr.bf16.mxu1 %v1712_v0 }
 0x2be   : > { %1291 = vmatmul.mubr.msk.bf16.vlgmr.msra.gmra.mrb[4].mxu1 %vm389_vm1, %v522_v24 }
 0x2bf   : > { %1301 = vmatpush3.bf16.xpose.msra.mxu1 %v674_v30  ;;  %1302 = vmatprep.mubr.msk.bf16.mxu1 %vm1713_vm0, %v1712_v0 }
 0x2c0   : > { %1312 = vmatprep.subr.bf16.mxu1 %v1712_v0 }
 0x2c6   : > { %1303 = vmatmul.mubr.msk.bf16.vlgmr.msra.gmra.mrb[8].mxu1 %vm389_vm1, %v667_v29 }
 0x2c7   : > { %1313 = vmatpush3.bf16.xpose.msra.mxu1 %v813_v32  ;;  %1314 = vmatprep.mubr.msk.bf16.mxu1 %vm1713_vm0, %v1712_v0 }
 0x2c8   : > { %1324 = vmatprep.subr.bf16.mxu1 %v1712_v0 }
 0x2ce   : > { %1315 = vmatmul.mubr.msk.bf16.vlgmr.msra.gmra.mrb[12].mxu1 %vm389_vm1, %v806_v33 }
 0x2cf   : > { %1328 = vmatprep.mubr.msk.bf16.mxu1 %vm1713_vm0, %v1712_v0 }
 0x389   : > { %v2080_v34 = vpop.f32.mrb[0].mxu1 }
 0x38a   : > { %v1286_v35 = vpop.f32.mrb[1].mxu1 }
 0x38b   : > { %v506_v36 = vpop.f32.mrb[2].mxu1 }
 0x38c   : > { %v1287_v37 = vpop.f32.mrb[3].mxu1 }
 0x391   : > { %v568_v38 = vpop.f32.mrb[4].mxu1 }
 0x392   : > { %v1292_v39 = vpop.f32.mrb[5].mxu1  ;;  %v576_v40 = vsel %vm389_vm1, %v568_v38, -inf }
 0x393   : > { %577 = vmax.xlane.f32.xlu1 %v576_v40  ;;  %v571_v41 = vpop.f32.mrb[6].mxu1 }
 0x394   : > { %v1293_v42 = vpop.f32.mrb[7].mxu1 }
 0x399   : > { %v710_v43 = vpop.f32.mrb[8].mxu1 }
 0x39a   : > { %v1304_v44 = vpop.f32.mrb[9].mxu1  ;;  %v718_v45 = vsel %vm389_vm1, %v710_v43, -inf }
 0x39b   : > { %719 = vmax.xlane.f32.xlu0 %v718_v45  ;;  %v713_v46 = vpop.f32.mrb[10].mxu1 }
 0x39c   : > { %v1305_v47 = vpop.f32.mrb[11].mxu1 }
 0x39d   : > { %v734_v47 = vld [vmem:[#allocation3 + $0x10] sm:$0xff] }
 0x3a1   : > { %v849_v48 = vpop.f32.mrb[12].mxu1 }
 0x3a2   : > { %v1316_v49 = vpop.f32.mrb[13].mxu1  ;;  %v857_v50 = vsel %vm389_vm1, %v849_v48, -inf }
 0x3a3   : > { %858 = vmax.xlane.f32.xlu1 %v857_v50  ;;  %v852_v51 = vpop.f32.mrb[14].mxu1 }
 0x3a4   : > { %v1317_v52 = vpop.f32.mrb[15].mxu1 }
 0x3a5   : > { %v873_v52 = vld [vmem:[#allocation3 + $0x18] sm:$0xff] }
 0x420   : > { %v578_v54 = vpop.xlane.xlu1 %577 }
 0x421   : > { %v579_v55 = vmax.f32 %v575_v53, %v578_v54 }
 0x423   : > { %599 = vst.msk [vmem:[#allocation2 + $0x8] sm:$0xff] %vm374_vm2, %v579_v55  ;;  %585 = vperm.xlu1 %1438, %v579_v55   ;;  %v580_v2 = vsub.f32 %v575_v53, %v579_v55  ;;  %v509_v53 = vld [vmem:[#allocation4] sm:$0xff] }
 0x425   : > { %v581_v4 = vmul.f32 1.442695, %v580_v2 }
 0x427   : > { %604 = vrot.lane.b32.xlu1 %v1243_v56, %s1716_s24  ;;  %1445 = vpow2.f32 %v581_v4 }
 0x428   : > { %v720_v58 = vpop.xlane.xlu0 %719 }
 0x429   : > { %v721_v59 = vmax.f32 %v2086_v57, %v720_v58 }
 0x42b   : > { %v722_v60 = vsub.f32 %v2086_v57, %v721_v59  ;;  %741 = vst.msk [vmem:[#allocation2 + $0x10] sm:$0xff] %vm374_vm2, %v721_v59  ;;  %727 = vperm.xlu0 %1437, %v721_v59  }
 0x42d   : > { %v723_v35 = vmul.f32 1.442695, %v722_v60 }
 0x430   : > { %v859_v62 = vpop.xlane.xlu1 %858 }
 0x431   : > { %v860_v63 = vmax.f32 %v856_v61, %v859_v62  ;;  %v2097_v5 = vpop.eup %1445 }
 0x433   : > { %v861_v1 = vsub.f32 %v856_v61, %v860_v63  ;;  %880 = vst.msk [vmem:[#allocation2 + $0x18] sm:$0xff] %vm374_vm2, %v860_v63  ;;  %866 = vperm.xlu1 %1438, %v860_v63  }
 0x435   : > { %v862_v36 = vmul.f32 1.442695, %v861_v1 }
 0x437   : > { %743 = vrot.lane.b32.xlu1 %v1243_v56, %s1717_s26 }
 0x43b   : > { %882 = vrot.lane.b32.xlu1 %v1243_v56, %s1718_s1 }
 0x45f   : > { %455 = vadd.xlane.f32.xlu1 %v454_v3 }
 0x470   : > { %655 = vperm.xlu1 %1438, %v2097_v5  }
 0x4a2   : > { %v586_v6 = vpop.permute.xlu1 %585 }
 0x4a3   : > { %v588_v7 = vsub.f32 %v568_v38, %v586_v6 }
 0x4a5   : > { %v589_v8 = vmul.f32 1.442695, %v588_v7 }
 0x4a6   : > { %v605_v9 = vpop.permute.xlu1 %604 }
 0x4a7   : > { %1447 = vpow2.f32 %v589_v8  ;;  %v610_v10 = vsel %vm465_vm3, %v605_v9, 0 }
 0x4a8   : > { %1295 = vmatpush3.bf16.msra.mxu0 %v610_v10 }
 0x4a9   : > { %1306 = vmatprep.subr.bf16.mxu0 %v1712_v0 }
 0x4aa   : > { %v728_v11 = vpop.permute.xlu0 %727 }
 0x4ab   : > { %v730_v12 = vsub.f32 %v710_v43, %v728_v11  ;;  %v592_v43 = vld [vmem:[#allocation3 + $0x8] sm:$0xff] }
 0x4ac   : > { %v593_v44 = vmul.f32 %v2097_v5, %v592_v43 }
 0x4ad   : > { %v731_v13 = vmul.f32 1.442695, %v730_v12 }
 0x4af   : > { %1449 = vpow2.f32 %v731_v13 }
 0x4b1   : > { %v1448_v15 = vpop.eup %1447 }
 0x4b2   : > { %v867_v18 = vpop.permute.xlu1 %866  ;;  %v594_v19 = vsel %vm389_vm1, %v1448_v15, 0.0  ;;  %v600_v20 = vpack.c.bf16 %v1448_v15, %v1448_v15  ;;  %v1441_v15 = vld [vmem:[#allocation11] sm:$0xff]  }
 0x4b3   : > { %v869_v21 = vsub.f32 %v849_v48, %v867_v18  ;;  %595 = vadd.xlane.f32.xlu0 %v594_v19  ;;  %1325 = vmatpush3.bf16.msra.mxu1 %v1441_v15  ;;  %v1442_v18 = vld [vmem:[#allocation11 + $0x8] sm:$0xff]  }
 0x4b4   : > { %1297 = vmatmul.mubr.msk.bf16.vlgmr.msra.gmra.mrb[4].mxu0 %vm389_vm1, %v600_v20  ;;  %1326 = vmatprep.subr.bf16.mxu1 %v1712_v0 }
 0x4b5   : > { %v870_v22 = vmul.f32 1.442695, %v869_v21  ;;  %1308 = vmatprep.mubr.msk.bf16.mxu0 %vm1713_vm0, %v1712_v0 }
 0x4b6   : > { %v744_v23 = vpop.permute.xlu1 %743 }
 0x4b7   : > { %1451 = vpow2.f32 %v870_v22  ;;  %v749_v24 = vsel %vm465_vm3, %v744_v23, 0  ;;  %1327 = vmatpush3.bf16.msra.mxu1 %v1442_v18 }
 0x4b8   : > { %1307 = vmatpush3.bf16.msra.mxu0 %v749_v24  ;;  %1453 = vpow2.f32 %v442_v31 }
 0x4b9   : > { %v1450_v25 = vpop.eup %1449  ;;  %1318 = vmatprep.subr.bf16.mxu0 %v1712_v0  ;;  %1455 = vpow2.f32 %v723_v35 }
 0x4ba   : > { %v736_v26 = vsel %vm389_vm1, %v1450_v25, 0.0  ;;  %v742_v27 = vpack.c.bf16 %v1450_v25, %v1450_v25  ;;  %v883_v28 = vpop.permute.xlu1 %882  ;;  %1457 = vpow2.f32 %v862_v36 }
 0x4bb   : > { %737 = vadd.xlane.f32.xlu0 %v736_v26  ;;  %v888_v29 = vsel %vm465_vm3, %v883_v28, 0 }
 0x4bc   : > { %1309 = vmatmul.mubr.msk.bf16.vlgmr.msra.gmra.mrb[8].mxu0 %vm389_vm1, %v742_v27 }
 0x4bd   : > { %1319 = vmatpush3.bf16.msra.mxu0 %v888_v29  ;;  %1320 = vmatprep.mubr.msk.bf16.mxu0 %vm1713_vm0, %v1712_v0 }
 0x4c1   : > { %v1452_v30 = vpop.eup %1451 }
 0x4c2   : > { %v875_v32 = vsel %vm389_vm1, %v1452_v30, 0.0  ;;  %v881_v33 = vpack.c.bf16 %v1452_v30, %v1452_v30  ;;  %v1454_v37 = vpop.eup %1453 }
 0x4c3   : > { %876 = vadd.xlane.f32.xlu1 %v875_v32  ;;  %v1456_v38 = vpop.eup %1455  ;;  %v453_v17 = vmul.f32 %v1454_v37, %v452_v16 }
 0x4c4   : > { %1321 = vmatmul.mubr.msk.bf16.vlgmr.msra.gmra.mrb[12].mxu0 %vm389_vm1, %v881_v33  ;;  %v1458_v14 = vpop.eup %1457  ;;  %v735_v48 = vmul.f32 %v1456_v38, %v734_v47 }
 0x4c5   : > { %v874_v54 = vmul.f32 %v1458_v14, %v873_v52 }
 0x4d1   : > { %512 = vperm.xlu0 %1437, %v1454_v37  }
 0x4d5   : > { %794 = vperm.xlu0 %1437, %v1456_v38  }
 0x4d9   : > { %933 = vperm.xlu0 %1437, %v1458_v14  }
 0x4ec   : > { %v456_v39 = vpop.xlane.xlu1 %455 }
 0x4ed   : > { %v457_v40 = vadd.f32 %v456_v39, %v453_v17 }
 0x4ef   : > { %459 = vst.msk [vmem:[#allocation3] sm:$0xff] %vm374_vm2, %v457_v40 }
 0x4f0   : > { %v656_v51 = vpop.permute.xlu1 %655 }
 0x4f6   : > { %v947_v41 = vld [vmem:[#allocation3] sm:$0xff] }
 0x4f7   : > { %1459 = vrcp.f32 %v947_v41 }
 0x501   : > { %v1460_v42 = vpop.eup %1459 }
 0x502   : > { %952 = vperm.xlu0 %1437, %v1460_v42  }
 0x540   : > { %v596_v45 = vpop.xlane.xlu0 %595 }
 0x541   : > { %v597_v46 = vadd.f32 %v596_v45, %v593_v44  ;;  %v1249_v44 = vld [vmem:[#allocation13] ss:$0 sm:$0xff] }
 0x543   : > { %598 = vst.msk [vmem:[#allocation3 + $0x8] sm:$0xff] %vm374_vm2, %v597_v46 }
 0x548   : > { %v738_v49 = vpop.xlane.xlu0 %737 }
 0x549   : > { %v739_v50 = vadd.f32 %v738_v49, %v735_v48 }
 0x54a   : > { %v957_v3 = vld [vmem:[#allocation3 + $0x8] sm:$0xff] }
 0x54b   : > { %740 = vst.msk [vmem:[#allocation3 + $0x10] sm:$0xff] %vm374_vm2, %v739_v50 }
 0x550   : > { %v877_v55 = vpop.xlane.xlu1 %876  ;;  %v513_v56 = vpop.permute.xlu0 %512 }
 0x551   : > { %v878_v57 = vadd.f32 %v877_v55, %v874_v54  ;;  %v515_v58 = vmul.f32 %v513_v56, %v509_v53 }
 0x552   : > { %v967_v59 = vld [vmem:[#allocation3 + $0x10] sm:$0xff] }
 0x553   : > { %879 = vst.msk [vmem:[#allocation3 + $0x18] sm:$0xff] %vm374_vm2, %v878_v57  ;;  %v516_v60 = vadd.f32 %v515_v58, %v2080_v34  ;;  %1461 = vrcp.f32 %v967_v59 }
 0x554   : > { %1463 = vrcp.f32 %v957_v3  ;;  %v795_v23 = vpop.permute.xlu0 %794 }
 0x555   : > { %517 = vst.msk [vmem:[#allocation4] sm:$0xff] %vm389_vm1, %v516_v60 }
 0x558   : > { %v934_v28 = vpop.permute.xlu0 %933 }
 0x55a   : > { %v977_v34 = vld [vmem:[#allocation3 + $0x18] sm:$0xff] }
 0x55b   : > { %1465 = vrcp.f32 %v977_v34 }
 0x55c   : > { %v652_v19 = vld [vmem:[#allocation4] sm:$0xff] }
 0x55d   : > { %v1462_v61 = vpop.eup %1461  ;;  %v658_v20 = vmul.f32 %v656_v51, %v652_v19 }
 0x55e   : > { %972 = vperm.xlu0 %1437, %v1462_v61   ;;  %v1464_v12 = vpop.eup %1463 }
 0x565   : > { %v1466_v13 = vpop.eup %1465 }
 0x581   : > { %v953_v32 = vpop.permute.xlu0 %952 }
 0x587   : > { %v646_v62 = vpop.f32.mrb[4].mxu0 }
 0x588   : > { %v1298_v63 = vpop.f32.mrb[5].mxu0  ;;  %660 = vrot.lane.b32.xlu1 %v646_v62, %s1719_s13 }
 0x589   : > { %v649_v1 = vpop.f32.mrb[6].mxu0 }
 0x58a   : > { %v1299_v2 = vpop.f32.mrb[7].mxu0 }
 0x58f   : > { %v785_v4 = vpop.f32.mrb[8].mxu0 }
 0x590   : > { %v1310_v5 = vpop.f32.mrb[9].mxu0  ;;  %799 = vrot.lane.b32.xlu1 %v785_v4, %s1720_s22 }
 0x591   : > { %v788_v6 = vpop.f32.mrb[10].mxu0 }
 0x592   : > { %v1311_v7 = vpop.f32.mrb[11].mxu0 }
 0x597   : > { %v924_v8 = vpop.f32.mrb[12].mxu0 }
 0x598   : > { %v1322_v9 = vpop.f32.mrb[13].mxu0  ;;  %938 = vrot.lane.b32.xlu1 %v924_v8, %s1721_s7 }
 0x599   : > { %v927_v10 = vpop.f32.mrb[14].mxu0 }
 0x59a   : > { %v1323_v11 = vpop.f32.mrb[15].mxu0 }
 0x59c   : > { %962 = vperm.xlu1 %1438, %v1464_v12  }
 0x5a0   : > { %982 = vperm.xlu1 %1438, %v1466_v13  }
 0x5dd   : > { %v973_v14 = vpop.permute.xlu0 %972 }
 0x5fa   : > { %v661_v21 = vpop.permute.xlu1 %660 }
 0x5fb   : > { %v663_v22 = vadd.f32 %v661_v21, %v658_v20 }
 0x5fd   : > { %665 = vst.msk [vmem:[#allocation4] sm:$0xff] %vm664_vm5, %v663_v22 }
 0x602   : > { %v800_v26 = vpop.permute.xlu1 %799 }
 0x604   : > { %v791_v24 = vld [vmem:[#allocation4] sm:$0xff] }
 0x605   : > { %v797_v25 = vmul.f32 %v795_v23, %v791_v24 }
 0x607   : > { %v802_v27 = vadd.f32 %v800_v26, %v797_v25 }
 0x609   : > { %804 = vst.msk [vmem:[#allocation4] sm:$0xff] %vm803_vm6, %v802_v27 }
 0x60a   : > { %v939_v0 = vpop.permute.xlu1 %938 }
 0x610   : > { %v930_v29 = vld [vmem:[#allocation4] sm:$0xff] }
 0x611   : > { %v936_v30 = vmul.f32 %v934_v28, %v930_v29 }
 0x613   : > { %v941_v31 = vadd.f32 %v939_v0, %v936_v30 }
 0x615   : > { %943 = vst.msk [vmem:[#allocation4] sm:$0xff] %vm942_vm7, %v941_v31 }
 0x61b   : > { %v963_v36 = vpop.permute.xlu1 %962 }
 0x61c   : > { %v949_v33 = vld [vmem:[#allocation4] sm:$0xff] }
 0x61d   : > { %v955_v35 = vmul.f32 %v953_v32, %v949_v33 }
 0x61f   : > { %956 = vst.msk [vmem:[#allocation4] sm:$0xff] %vm389_vm1, %v955_v35  ;;  %v983_v39 = vpop.permute.xlu1 %982 }
 0x626   : > { %v959_v37 = vld [vmem:[#allocation4] sm:$0xff] }
 0x627   : > { %v965_v38 = vmul.f32 %v963_v36, %v959_v37 }
 0x629   : > { %966 = vst.msk [vmem:[#allocation4] sm:$0xff] %vm664_vm5, %v965_v38 }
 0x630   : > { %v969_v16 = vld [vmem:[#allocation4] sm:$0xff] }
 0x631   : > { %v975_v17 = vmul.f32 %v973_v14, %v969_v16 }
 0x633   : > { %976 = vst.msk [vmem:[#allocation4] sm:$0xff] %vm803_vm6, %v975_v17 }
 0x63a   : > { %v979_v40 = vld [vmem:[#allocation4] sm:$0xff] }
 0x63b   : > { %v985_v41 = vmul.f32 %v983_v39, %v979_v40 }
 0x63d   : > { %986 = vst.msk [vmem:[#allocation4] sm:$0xff] %vm942_vm7, %v985_v41 }
 0x644   : > { %v987_v42 = vld [vmem:[#allocation4] sm:$0xff] }
 0x645   : > { %v988_v43 = vpack.c.bf16 %v987_v42, %v987_v42 }
 0x647   : > { %1329 = vmatmul.mubr.msk.bf16.vlgmr.msra.gmra.mrb[16].mxu1 %vm383_vm4, %v988_v43 }
 0x71a   : > { %v1050_v45 = vpop.f32.mrb[16].mxu1 }
 0x71b   : > { %v1051_v46 = vadd.f32 %v1249_v44, %v1050_v45  ;;  %v1330_v47 = vpop.f32.mrb[17].mxu1 }
 0x71c   : > { %v1053_v48 = vpop.f32.mrb[18].mxu1 }
 0x71d   : > { %v1331_v49 = vpop.f32.mrb[19].mxu1  ;;  %1056 = vst.msk [vmem:[%s367_s15] sm:$0xff] %vm383_vm4, %v1051_v46 }
 0x71e   : > { %1626 = shalt.err (!%p1623_p8)
}
 0x71f   : > { %s1627_s16 = scalar_lea.hbm %s2141_s11, 128  ;;  %s1631_s25 = scalar_lea.hbm %s2196_s5, 256 }
 0x720   : > { %p1628_p0 = scmp.ne.s32.totalorder %s2141_s11, %s1627_s16  ;;  %p1632_p7 = scmp.lt.u32.totalorder %s2141_s11, %s2196_s5 }
 0x721   : > { %p1633_p13 = scmp.lt.u32.totalorder %s1631_s25, %s1627_s16  ;;  %p1635_p2 = scmp.lt.u32.totalorder %s1627_s16, %s2141_s11 }
 0x722   : > { %p1629_p5 = pnand %p1628_p0, %p2239_p4 }
 0x723   : > { %p1634_p9 = por %p1633_p13, %p1632_p7 }
 0x724   : > { %p1630_p12 = pneg %p1629_p5 }
 0x725   : > { %p1636_p1 = por %p1635_p2, %p1634_p9 }
 0x727   : > { %p1637_p3 = pnand %p1636_p1, %p1630_p12 }
 0x729   : > { %1640 = shalt.err (!%p1637_p3)
}
 0x72a   : > { %1346 = dma.vmem_to_hbm [thread:$0]  (%p2239_p4), %s2143_s30, 128, %s2141_s11, %s1058_s21  }
 0x72b PF: > { %s1084_s1 = sand.u32 1, %s1683_s18   ;;  %p2240_p11 = scmp.ne.s32.totalorder %s2216_s27, 0 }
 0x72c   : > { %p2241_p10 = scmp.ge.s32.totalorder %s1703_s23, 2  ;;  %s1085_s13 = scalar_lea.sflag [#allocation7], %s1084_s1 }
 0x72e   : > { %p1366_p6 = pnand %p2241_p10, %p2240_p11 }
 0x730   : > { %1678 = dma.done.wait (!%p1366_p6), %s1085_s13, 128  }
 0x731   : > { %1680 = vsyncadd (!%p1366_p6), %s1085_s13, 4294967168  ;;  %s25_s23 = sadd.s32 1, %s1703_s23   ;;  %s2242_s9 = sld [smem:[#allocation21_spill]] }
 0x732   : > { %p22_p8 = scmp.ge.s32.totalorder %s25_s23, 4   ;;  %s2243_s21 = sld [smem:[#allocation19_spill]] }
 0x733   : > { %s2244_s22 = sld [smem:[#allocation20_spill]]  ;;  %s2245_s18 = smov %s1687_s19 }
 0x734   : > { %s2246_s19 = smov %s1691_s20  ;;  %24 = sbr.rel (!%p22_p8) target bundleno = 13 (0xd), region = 131 }
 0x737   : > { %s2247_s20 = smov %s2242_s9 }
 0x73b   :  { %1090 = vsyncpa [#allocation6], 1 }
 0x73c   :  { %1092 = vsyncpa [#allocation6 + $0x1], 1 }
 0x73d   :  { %1093 = vsyncpa [#allocation9], 1 }
 0x73e   :  { %1095 = vsyncpa [#allocation9 + $0x1], 1 }
 0x73f   :  { %1096 = vsyncpa [#allocation12], 1 }
 0x740   :  { %1097 = vsyncpa [#allocation7], 1 }
 0x741   :  { %1099 = vsyncpa [#allocation7 + $0x1], 1 }

// kernel: tpu_custom_call.1
= control target key start
LH: loop header
LB: loop body
LE: loop exit
PB: predicated region body
PF: predicated region fallthrough
CT: control target
= control target key end

     0   :  { %s2191_s0 = inlined_call_operand.hbm [shape: bf16[2,8,32], index: 0, kind: input, shape index: {}]   ;;  %s2192_s1 = inlined_call_operand.hbm [shape: bf16[2,8,32], index: 1, kind: input, shape index: {}]   ;;  %s2193_s2 = inlined_call_operand.hbm [shape: bf16[2,8,32], index: 2, kind: input, shape index: {}]   ;;  %s2194_s3 = inlined_call_operand.hbm [shape: bf16[32,32], index: 3, kind: input, shape index: {}]   ;;  %s2195_s4 = inlined_call_operand.hbm [shape: f32[1,32], index: 4, kind: input, shape index: {}]   ;;  %s2196_s5 = inlined_call_operand.hbm [shape: f32[2,8,32], index: 5, kind: output, shape index: {}]  }
   0x1   :  { %2211 = sst [smem:[#allocation22_spill]] %s2192_s1 }
   0x2   :  { %2212 = sst [smem:[#allocation23_spill]] %s2194_s3 }
   0x3   :  { %2213 = sst [smem:[#allocation24_spill]] %s2195_s4 }
   0x4   :  { %10 = vsyncpa [#allocation6], 0 }
   0x5   :  { %12 = vsyncpa [#allocation6 + $0x1], 0 }
   0x6   :  { %13 = vsyncpa [#allocation9], 0 }
   0x7   :  { %15 = vsyncpa [#allocation9 + $0x1], 0 }
   0x8   :  { %16 = vsyncpa [#allocation12], 0 }
   0x9   :  { %17 = vsyncpa [#allocation7], 0 }
   0xa   :  { %19 = vsyncpa [#allocation7 + $0x1], 0  ;;  %s1753_s18 = smov 0   ;;  %s1755_s19 = smov 0  }
   0xb   :  { %s1757_s20 = smov 0   ;;  %s1759_s21 = smov 0  }
   0xc   :  { %s1761_s22 = smov 0   ;;  %s1763_s23 = smov 0  }
   0xd LB: > { %2214 = sst [smem:[#allocation19_spill]] %s1699_s22  ;;  %s1784_s24 = sadd.s32 4294967295, %s1703_s23   ;;  %s1703_s23 = sphi %s1763_s23, %s25_s23   ;;  %s1699_s22 = sphi %s1761_s22, %s2244_s22   ;;  %s1695_s21 = sphi %s1759_s21, %s2243_s21   ;;  %s1691_s20 = sphi %s1757_s20, %s2247_s20   ;;  %s1687_s19 = sphi %s1755_s19, %s2246_s19   ;;  %s1683_s18 = sphi %s1753_s18, %s2245_s18  }
   0xe   : > { %s1220_s25 = sadd.s32 4294967294, %s1703_s23   ;;  %p66_p0 = scmp.ne.s32.totalorder %s1687_s19, %s1683_s18 }
   0xf   : > { %p2197_p1 = scmp.eq.s32.totalorder %s1784_s24, 0  ;;  %p196_p3 = scmp.eq.s32.totalorder %s1220_s25, 1 }
  0x10   : > { %p1221_p5 = scmp.ge.s32.totalorder %s1703_s23, 1  ;;  %p203_p7 = scmp.lt.s32.totalorder %s1703_s23, 3 }
  0x11   : > { %p1793_p4 = por %p2197_p1, %p66_p0  ;;  %p1798_p6 = por %p196_p3, %p66_p0 }
  0x12   : > { %p1803_p8 = pnand %p1221_p5, %p203_p7  ;;  %s1705_s29 = smov [#allocation11]  }
  0x13   : > { %s2215_s26 = scalar_select %p1793_p4, 1, 0 }
  0x14   : > { %s2216_s27 = scalar_select %p1798_p6, 1, 0 }
  0x15   : > { %s2217_s28 = scalar_select %p1803_p8, 1, 0 }
  0x16   : > { %s215_s30 = sshll.u32 %s1705_s29, 4  ;;  %p1348_p9 = pneg %p1803_p8  ;;  %s216_s30 = int_to_ptr.vmem [resolvable:$true] %s215_s30 }
  0x17   : > { %s44_s7 = sadd.s32 1, %s1699_s22  ;;  %s2219_s3 = sld [smem:[#allocation23_spill]] }
  0x18   : > { %p1812_p11 = pnand %p1348_p9, %p2197_p1 }
  0x1a   : > { %s2218_s6 = scalar_select %p1812_p11, 1, 0 }
  0x1b   : > { %p2203_p13 = pneg %p1812_p11 }
  0x1d   : > { %s1467_s10 = scalar_lea.hbm %s2219_s3, 256 }
  0x1e   : > { %p1468_p12 = scmp.ne.s32.totalorder %s2219_s3, %s1467_s10  ;;  %p1474_p5 = scmp.lt.u32.totalorder %s1467_s10, %s2219_s3 }
  0x20   : > { %p1470_p0 = pnand %p2203_p13, %p1468_p12 }
  0x22   : > { %p1471_p3 = pneg %p1470_p0 }
  0x24   : > { %p1476_p7 = pnand %p1474_p5, %p1471_p3 }
  0x26   : > { %1479 = shalt.err (!%p1476_p7)
}
  0x27   : > { %s1480_s15 = scalar_lea.vmem %s216_s30, 256  ;;  %p1488_p2 = scmp.lt.s32.totalorder %s216_s30, %s216_s30 }
  0x28   : > { %p1481_p9 = scmp.ne.s32.totalorder %s216_s30, %s1480_s15  ;;  %p1489_p6 = scmp.lt.s32.totalorder %s1480_s15, %s1480_s15 }
  0x2a   : > { %p1483_p10 = pnand %p1481_p9, %p2203_p13  ;;  %p1490_p4 = por %p1489_p6, %p1488_p2 }
  0x2c   : > { %p1484_p1 = pneg %p1483_p10 }
  0x2e   : > { %p1491_p8 = pnand %p1490_p4, %p1484_p1 }
  0x30   : > { %1494 = shalt.err (!%p1491_p8)
}
  0x31   : > { %s1706_s16 = smov 64   ;;  %s1707_s17 = smov 4  }
  0x32   : > { %1351 = dma.hbm_to_vmem [thread:$0]  (!%p1812_p11), %s2219_s3, 256, %s216_s30, [#allocation12], %s1706_s16, %s1706_s16, %s1707_s17  }
  0x33   : > { %p46_p1 = scmp.ge.s32.totalorder %s44_s7, 2  ;;  %s53_s8 = sadd.s32 1, %s1691_s20 }
  0x34   : > { %p60_p2 = scmp.ne.s32.totalorder %s1691_s20, %s1687_s19  ;;  %p61_p4 = scmp.eq.s32.totalorder %s1703_s23, 0 }
  0x35   : > { %s2249_s7 = smov (%p46_p1, %s44_s7), 0  ;;  %p2221_p8 = scmp.eq.s32.totalorder %s1784_s24, 1 }
  0x36   : > { %2220 = sst [smem:[#allocation20_spill]] %s2249_s7  ;;  %p62_p6 = por %p61_p4, %p60_p2 }
  0x37   : > { %p1847_p10 = por %p2221_p8, %p60_p2  ;;  %s48_s10 = ssub.s32 %s1699_s22, %s2249_s7 }
  0x38   : > { %p1371_p12 = scmp.lt.s32.totalorder %s1703_s23, 2  ;;  %p51_p0 = scmp.eq.s32.totalorder %s48_s10, 0 }
  0x39   : > { %s2222_s9 = scalar_select %p1847_p10, 1, 0 }
  0x3a   : > { %s2200_s11 = sand.u32 1, %s1691_s20   ;;  %s1860_s12 = sshll.u32 %s1699_s22, 6 }
  0x3b   : > { %s1857_s30 = sshll.u32 %s2200_s11, 2  ;;  %p1865_p3 = pnand %p1371_p12, %p62_p6 }
  0x3c   : > { %s1863_s13 = scalar_select %p51_p0, %s1691_s20, %s53_s8  }
  0x3d   : > { %s2224_s14 = scalar_select %p1865_p3, 1, 0 }
  0x3e   : > { %2223 = sst [smem:[#allocation21_spill]] %s1863_s13  ;;  %s259_s15 = sand.u32 1, %s1703_s23  }
  0x3f   : > { %s2225_s1 = sld [smem:[#allocation22_spill]]  ;;  %s263_s29 = scalar_lea.vmem [#allocation8], %s1857_s30 }
  0x40   : > { %s271_s10 = sshll.u32 %s263_s29, 4  ;;  %s1708_s8 = smov [#allocation13]   ;;  %s1877_s10 = int_to_ptr.vmem [resolvable:$true] %s271_s10 }
  0x41   : > { %s1879_s11 = sshll.u32 %s1708_s8, 4  ;;  %s1881_s3 = scalar_lea.sflag [#allocation9], %s259_s15  ;;  %s230_s11 = int_to_ptr.vmem [resolvable:$true] %s1879_s11 }
  0x42   : > { %p1887_p7 = pneg %p1865_p3 }
  0x44   : > { %s2226_s16 = scalar_select %p1887_p7, 1, 0 }
  0x45   : > { %s1874_s25 = scalar_lea.hbm %s2225_s1, %s1860_s12  ;;  %s1500_s22 = scalar_lea.hbm %s2225_s1, 128 }
  0x46   : > { %s1495_s7 = scalar_lea.hbm %s1874_s25, 64  ;;  %p1501_p2 = scmp.lt.u32.totalorder %s1874_s25, %s2225_s1 }
  0x47   : > { %p1496_p5 = scmp.ne.s32.totalorder %s1874_s25, %s1495_s7  ;;  %p1502_p4 = scmp.lt.u32.totalorder %s1500_s22, %s1495_s7 }
  0x48   : > { %p1504_p8 = scmp.lt.u32.totalorder %s1495_s7, %s1874_s25 }
  0x49   : > { %p1498_p9 = pnand %p1887_p7, %p1496_p5  ;;  %p1503_p6 = por %p1502_p4, %p1501_p2 }
  0x4b   : > { %p1499_p1 = pneg %p1498_p9  ;;  %p1505_p12 = por %p1504_p8, %p1503_p6 }
  0x4d   : > { %p1506_p0 = pnand %p1505_p12, %p1499_p1 }
  0x4f   : > { %1509 = shalt.err (!%p1506_p0)
}
  0x50   : > { %s1510_s15 = scalar_lea.vmem %s1877_s10, 64  ;;  %s1709_s17 = smov [#allocation8]  }
  0x51   : > { %p1511_p5 = scmp.ne.s32.totalorder %s1877_s10, %s1510_s15  ;;  %s1515_s29 = sshll.u32 %s1709_s17, 4  ;;  %s1516_s29 = int_to_ptr.vmem [resolvable:$false] %s1515_s29 }
  0x52   : > { %s1517_s13 = scalar_lea.vmem %s1516_s29, 128  ;;  %p1518_p10 = scmp.lt.s32.totalorder %s1877_s10, %s1516_s29 }
  0x53   : > { %p1513_p9 = pnand %p1511_p5, %p1887_p7  ;;  %p1519_p11 = scmp.lt.s32.totalorder %s1517_s13, %s1510_s15 }
  0x55   : > { %p1514_p13 = pneg %p1513_p9  ;;  %p1520_p2 = por %p1519_p11, %p1518_p10 }
  0x57   : > { %p1521_p4 = pnand %p1520_p2, %p1514_p13 }
  0x59   : > { %1524 = shalt.err (!%p1521_p4)
}
  0x5a   : > { %1361 = dma.hbm_to_vmem [thread:$0]  (!%p1865_p3), %s1874_s25, 64, %s1877_s10, %s1881_s3  }
  0x5b   : > { %s2227_s4 = sld [smem:[#allocation24_spill]]  ;;  %p2228_p11 = scmp.ne.s32.totalorder %s2218_s6, 0 }
  0x5d   : > { %p2229_p13 = pneg %p2228_p11 }
  0x61   : > { %s1525_s8 = scalar_lea.hbm %s2227_s4, 16 }
  0x62   : > { %p1526_p1 = scmp.ne.s32.totalorder %s2227_s4, %s1525_s8  ;;  %p1532_p8 = scmp.lt.u32.totalorder %s1525_s8, %s2227_s4 }
  0x64   : > { %p1528_p10 = pnand %p1526_p1, %p2229_p13 }
  0x66   : > { %p1529_p6 = pneg %p1528_p10 }
  0x68   : > { %p1534_p12 = pnand %p1532_p8, %p1529_p6 }
  0x6a   : > { %1537 = shalt.err (!%p1534_p12)
}
  0x6b   : > { %s1538_s25 = scalar_lea.vmem %s230_s11, 16  ;;  %p2230_p5 = pmov %p2229_p13 }
  0x6c   : > { %p1539_p0 = scmp.ne.s32.totalorder %s230_s11, %s1538_s25  ;;  %s1545_s10 = scalar_lea.vmem %s230_s11, 32 }
  0x6d   : > { %p1546_p4 = scmp.lt.s32.totalorder %s230_s11, %s230_s11  ;;  %p1547_p3 = scmp.lt.s32.totalorder %s1545_s10, %s1538_s25 }
  0x6e   : > { %p1541_p9 = pnand %p1539_p0, %p2230_p5 }
  0x6f   : > { %p1548_p7 = por %p1547_p3, %p1546_p4 }
  0x70   : > { %p1542_p2 = pneg %p1541_p9 }
  0x72   : > { %p1549_p1 = pnand %p1548_p7, %p1542_p2 }
  0x74   : > { %1552 = shalt.err (!%p1549_p1)
}
  0x75   : > { %1354 = dma.hbm_to_vmem [thread:$0]  (!%p2228_p11), %s2227_s4, 16, %s230_s11, [#allocation12]  }
  0x76   : > { %s1936_s8 = scalar_lea.hbm %s2191_s0, %s1860_s12  ;;  %s244_s17 = scalar_lea.vmem [#allocation5], %s1857_s30 }
  0x77   : > { %s252_s6 = sshll.u32 %s244_s17, 4  ;;  %s1945_s25 = scalar_lea.hbm %s2193_s2, %s1860_s12  ;;  %s1939_s6 = int_to_ptr.vmem [resolvable:$true] %s252_s6 }
  0x78   : > { %s2231_s10 = sand.u32 1, %s1691_s20   ;;  %s1553_s1 = scalar_lea.hbm %s1936_s8, 64 }
  0x79   : > { %s241_s11 = scalar_lea.sflag [#allocation6], %s2231_s10  ;;  %p1554_p3 = scmp.ne.s32.totalorder %s1936_s8, %s1553_s1 }
  0x7a   : > { %p2232_p7 = scmp.ne.s32.totalorder %s2226_s16, 0  ;;  %s1558_s7 = scalar_lea.hbm %s2191_s0, 128 }
  0x7b   : > { %p1559_p10 = scmp.lt.u32.totalorder %s1936_s8, %s2191_s0  ;;  %p1560_p6 = scmp.lt.u32.totalorder %s1558_s7, %s1553_s1 }
  0x7c   : > { %p1556_p11 = pnand %p1554_p3, %p2232_p7  ;;  %p1562_p12 = scmp.lt.u32.totalorder %s1553_s1, %s1936_s8 }
  0x7d   : > { %p1561_p8 = por %p1560_p6, %p1559_p10 }
  0x7e   : > { %p1557_p13 = pneg %p1556_p11 }
  0x7f   : > { %p1563_p0 = por %p1562_p12, %p1561_p8 }
  0x81   : > { %p1564_p5 = pnand %p1563_p0, %p1557_p13 }
  0x83   : > { %1567 = shalt.err (!%p1564_p5)
}
  0x84   : > { %s1568_s12 = scalar_lea.vmem %s1939_s6, 64  ;;  %s1710_s15 = smov [#allocation5]  }
  0x85   : > { %p1569_p9 = scmp.ne.s32.totalorder %s1939_s6, %s1568_s12  ;;  %s1573_s29 = sshll.u32 %s1710_s15, 4  ;;  %s1574_s29 = int_to_ptr.vmem [resolvable:$false] %s1573_s29 }
  0x86   : > { %s1575_s4 = scalar_lea.vmem %s1574_s29, 128  ;;  %p1576_p1 = scmp.lt.s32.totalorder %s1939_s6, %s1574_s29 }
  0x87   : > { %p1571_p2 = pnand %p1569_p9, %p2232_p7  ;;  %p1577_p3 = scmp.lt.s32.totalorder %s1575_s4, %s1568_s12 }
  0x89   : > { %p1572_p4 = pneg %p1571_p2  ;;  %p1578_p11 = por %p1577_p3, %p1576_p1 }
  0x8b   : > { %p1579_p10 = pnand %p1578_p11, %p1572_p4 }
  0x8d   : > { %1582 = shalt.err (!%p1579_p10)
}
  0x8e   : > { %p2233_p13 = scmp.ne.s32.totalorder %s2224_s14, 0  ;;  %s282_s10 = scalar_lea.vmem [#allocation10], %s1857_s30 }
  0x8f   : > { %s290_s1 = sshll.u32 %s282_s10, 4  ;;  %s1583_s13 = scalar_lea.hbm %s1945_s25, 64  ;;  %s291_s1 = int_to_ptr.vmem [resolvable:$true] %s290_s1 }
  0x90   : > { %1358 = dma.hbm_to_vmem [thread:$0]  (!%p2233_p13), %s1936_s8, 64, %s1939_s6, %s241_s11  }
  0x91   : > { %p1584_p6 = scmp.ne.s32.totalorder %s1945_s25, %s1583_s13  ;;  %s1588_s17 = scalar_lea.hbm %s2193_s2, 128 }
  0x92   : > { %p1589_p0 = scmp.lt.u32.totalorder %s1945_s25, %s2193_s2  ;;  %p1590_p5 = scmp.lt.u32.totalorder %s1588_s17, %s1583_s13 }
  0x93   : > { %p1586_p8 = pnand %p1584_p6, %p2232_p7  ;;  %p1592_p2 = scmp.lt.u32.totalorder %s1583_s13, %s1945_s25 }
  0x94   : > { %p1591_p9 = por %p1590_p5, %p1589_p0 }
  0x95   : > { %p1587_p12 = pneg %p1586_p8 }
  0x96   : > { %p1593_p4 = por %p1592_p2, %p1591_p9 }
  0x98   : > { %p1594_p1 = pnand %p1593_p4, %p1587_p12 }
  0x9a   : > { %1597 = shalt.err (!%p1594_p1)
}
  0x9b   : > { %s1598_s30 = scalar_lea.vmem %s291_s1, 64  ;;  %s1711_s8 = smov [#allocation10]  }
  0x9c   : > { %p1599_p3 = scmp.ne.s32.totalorder %s291_s1, %s1598_s30  ;;  %s1603_s6 = sshll.u32 %s1711_s8, 4  ;;  %s1604_s6 = int_to_ptr.vmem [resolvable:$false] %s1603_s6 }
  0x9d   : > { %s1605_s11 = scalar_lea.vmem %s1604_s6, 128  ;;  %p1606_p6 = scmp.lt.s32.totalorder %s291_s1, %s1604_s6 }
  0x9e   : > { %p1601_p11 = pnand %p1599_p3, %p2232_p7  ;;  %p1607_p8 = scmp.lt.s32.totalorder %s1605_s11, %s1598_s30 }
  0xa0   : > { %p1602_p10 = pneg %p1601_p11  ;;  %p1608_p13 = por %p1607_p8, %p1606_p6 }
  0xa2   : > { %p1609_p0 = pnand %p1608_p13, %p1602_p10 }
  0xa4   : > { %1612 = shalt.err (!%p1609_p0)
}
  0xa5   : > { %p2234_p5 = scmp.ne.s32.totalorder %s2224_s14, 0  ;;  %p2235_p12 = scmp.ne.s32.totalorder %s2217_s28, 0 }
  0xa6   : > { %s1992_s16 = sand.u32 (!%p2235_p12), 1, %s1687_s19   ;;  %p2236_p7 = scmp.ne.s32.totalorder (!%p2235_p12), %s2215_s26, 0 }
  0xa7   : > { %1364 = dma.hbm_to_vmem [thread:$0]  (!%p2234_p5), %s1945_s25, 64, %s291_s1, %s1881_s3  }
  0xa8   : > { %299 = sbr.rel (%p2235_p12) target bundleno = 1835 (0x72b), region = 40  ;;  %s1995_s29 = sshll.u32 (!%p2235_p12), %s1992_s16, 2 }
  0xa9   : > { %s302_s4 = scalar_lea.sflag (!%p2235_p12), [#allocation6], %s1992_s16  ;;  %s305_s10 = scalar_lea.vmem (!%p2235_p12), [#allocation5], %s1995_s29 }
  0xaf   : > { %1666 = dma.done.wait (%p2236_p7), %s302_s4, 64  }
  0xb0   : > { %1668 = vsyncadd (%p2236_p7), %s302_s4, 4294967232  ;;  %s310_s3 = sand.u32 1, %s1784_s24   ;;  %s314_s14 = scalar_lea.vmem [#allocation8], %s1995_s29 }
  0xb1   : > { %s311_s28 = scalar_lea.sflag [#allocation9], %s310_s3 }
  0xb2   : > { %1670 = dma.done.wait (%p2236_p7), %s311_s28, 128  }
  0xb3   : > { %1672 = vsyncadd (%p2236_p7), %s311_s28, 4294967168  ;;  %s323_s25 = scalar_lea.vmem [#allocation10], %s1995_s29  ;;  %p2237_p13 = scmp.eq.s32.totalorder %s1784_s24, 0 }
  0xb5   : > { %1674 = dma.done.wait (%p2237_p13), [#allocation12], 272   ;;  %p2238_p9 = pmov %p2237_p13 }
  0xb6   : > { %v1712_v0 = vmov 0.0   ;;  %vm1713_vm0 = vmmov 0   ;;  %vm389_vm1 = vcmask 64512   ;;  %v387_v1 = vld [vmem:[%s314_s14] sm:$0xf]  ;;  %vm374_vm2 = vcmask 7168  }
  0xb7   : > { %1676 = vsyncadd (%p2238_p9), [#allocation12], 4294967024  ;;  %1276 = vmatprep.subr.bf16.mxu0 %v1712_v0  ;;  %1278 = vmatprep.mubr.msk.bf16.mxu0 %vm1713_vm0, %v1712_v0  ;;  %v394_v2 = vsel %vm389_vm1, %v387_v1, 0  ;;  %v385_v3 = vld [vmem:[%s305_s10] sm:$0xf]  ;;  %v1714_v5 = vmov -inf   ;;  %v1241_v12 = vcombine.low %v387_v1, %v387_v1 }
  0xb8   : > { %1282 = vmatprep.subr.bf16.mxu1 %v1712_v0  ;;  %1284 = vmatprep.mubr.msk.bf16.mxu1 %vm1713_vm0, %v1712_v0  ;;  %v386_v4 = vmul.bf16 1052065461, %v385_v3  ;;  %375 = vst.msk [vmem:[#allocation2] sm:$0xff] %vm374_vm2, %v1714_v5  ;;  %376 = vst.msk [vmem:[#allocation2 + $0x8] sm:$0xff] %vm374_vm2, %v1714_v5  ;;  %v1715_v11 = vmov 0   ;;  %s1716_s24 = smov 120  }
  0xb9   : > { %1277 = vmatpush3.bf16.xpose.msra.mxu0 %v394_v2  ;;  %377 = vst.msk [vmem:[#allocation2 + $0x10] sm:$0xff] %vm374_vm2, %v1714_v5  ;;  %378 = vst.msk [vmem:[#allocation2 + $0x18] sm:$0xff] %vm374_vm2, %v1714_v5  ;;  %1437 = vset.pattern.permute.xlu0 %v1715_v11  ;;  %s1717_s26 = smov 112   ;;  %s1718_s1 = smov 104   ;;  %v388_v18 = vld [vmem:[%s323_s25] sm:$0xf] }
  0xba   : > { %1294 = vmatprep.subr.bf16.mxu0 %v1712_v0  ;;  %379 = vst.msk [vmem:[#allocation3] sm:$0xff] %vm374_vm2, %v1712_v0  ;;  %380 = vst.msk [vmem:[#allocation3 + $0x8] sm:$0xff] %vm374_vm2, %v1712_v0  ;;  %1438 = vset.pattern.permute.xlu1 %v1715_v11  ;;  %v1240_v13 = vcombine.low %v386_v4, %v386_v4  ;;  %vm465_vm3 = vcmask 1043456   ;;  %v1243_v56 = vcombine.low %v388_v18, %v388_v18  ;;  %vm383_vm4 = vcmask 261120   ;;  %s1719_s13 = smov 8   ;;  %s1720_s22 = smov 16  }
  0xbb   : > { %381 = vst.msk [vmem:[#allocation3 + $0x10] sm:$0xff] %vm374_vm2, %v1712_v0  ;;  %382 = vst.msk [vmem:[#allocation3 + $0x18] sm:$0xff] %vm374_vm2, %v1712_v0  ;;  %526 = vrot.lane.b32.xlu1 %v1241_v12, %s1716_s24  ;;  %v467_v19 = vsel %vm465_vm3, %v388_v18, 0  ;;  %s1721_s7 = smov 24   ;;  %vm664_vm5 = vcmask 130112   ;;  %vm803_vm6 = vcmask 195712  }
  0xbc   : > { %1283 = vmatpush3.bf16.msra.mxu1 %v467_v19  ;;  %384 = vst.msk [vmem:[#allocation4] sm:$0xff] %vm383_vm4, %v1712_v0  ;;  %vm942_vm7 = vcmask 261312   ;;  %s1237_s17 = sshll.u32 %s1992_s16, 3  ;;  %s1254_s12 = sshll.u32 %s1695_s21, 7 }
  0xbd   : > { %1288 = vmatprep.subr.bf16.mxu1 %v1712_v0  ;;  %s367_s15 = scalar_lea.vmem [#allocation14], %s1237_s17  ;;  %s2141_s11 = scalar_lea.hbm %s2196_s5, %s1254_s12 }
  0xbe   : > { %s1072_s30 = sshll.u32 %s367_s15, 4  ;;  %s1058_s21 = scalar_lea.sflag [#allocation7], %s1992_s16  ;;  %s2143_s30 = int_to_ptr.vmem [resolvable:$true] %s1072_s30 }
  0xbf   : > { %521 = vrot.lane.b32.xlu1 %v1240_v13, %s1716_s24  ;;  %v2044_v14 = vld [vmem:[#allocation2] sm:$0xff]  ;;  %v575_v53 = vld [vmem:[#allocation2 + $0x8] sm:$0xff]  ;;  %s1613_s29 = scalar_lea.vmem %s2143_s30, 128  ;;  %p2239_p4 = scmp.ne.s32.totalorder %s2222_s9, 0 }
  0xc0   : > { %1279 = vmatmul.mubr.msk.bf16.vlgmr.msra.gmra.mrb[0].mxu0 %vm389_vm1, %v386_v4  ;;  %v2086_v57 = vld [vmem:[#allocation2 + $0x10] sm:$0xff]  ;;  %v856_v61 = vld [vmem:[#allocation2 + $0x18] sm:$0xff]  ;;  %p1614_p2 = scmp.ne.s32.totalorder %s2143_s30, %s1613_s29  ;;  %s1722_s4 = smov [#allocation14]  }
  0xc1   : > { %1296 = vmatprep.mubr.msk.bf16.mxu0 %vm1713_vm0, %v1712_v0  ;;  %s1617_s10 = sshll.u32 %s1722_s4, 4  ;;  %s1618_s10 = int_to_ptr.vmem [resolvable:$false] %s1617_s10 }
  0xc2   : > { %p1615_p1 = pnand %p1614_p2, %p2239_p4  ;;  %s1619_s3 = scalar_lea.vmem %s1618_s10, 256 }
  0xc3   : > { %668 = vrot.lane.b32.xlu1 %v1241_v12, %s1717_s26  ;;  %p1620_p11 = scmp.lt.s32.totalorder %s2143_s30, %s1618_s10  ;;  %p1621_p10 = scmp.lt.s32.totalorder %s1619_s3, %s1613_s29 }
  0xc4   : > { %p1616_p3 = pneg %p1615_p1 }
  0xc5   : > { %p1622_p6 = por %p1621_p10, %p1620_p11 }
  0xc7   : > { %666 = vrot.lane.b32.xlu1 %v1240_v13, %s1717_s26  ;;  %p1623_p8 = pnand %p1622_p6, %p1616_p3 }
  0xcb   : > { %807 = vrot.lane.b32.xlu1 %v1241_v12, %s1718_s1 }
  0xcf   : > { %805 = vrot.lane.b32.xlu1 %v1240_v13, %s1718_s1 }
 0x12d   : > { %v527_v23 = vpop.permute.xlu1 %526 }
 0x12e   : > { %v532_v26 = vsel %vm389_vm1, %v527_v23, 0 }
 0x131   : > { %v522_v24 = vpop.permute.xlu1 %521 }
 0x135   : > { %v669_v28 = vpop.permute.xlu1 %668 }
 0x136   : > { %v674_v30 = vsel %vm389_vm1, %v669_v28, 0 }
 0x139   : > { %v667_v29 = vpop.permute.xlu1 %666 }
 0x13d   : > { %v808_v31 = vpop.permute.xlu1 %807 }
 0x13e   : > { %v813_v32 = vsel %vm389_vm1, %v808_v31, 0 }
 0x141   : > { %v806_v33 = vpop.permute.xlu1 %805 }
 0x193   : > { %v430_v6 = vpop.f32.mrb[0].mxu0 }
 0x194   : > { %v1280_v7 = vpop.f32.mrb[1].mxu0  ;;  %v437_v8 = vsel %vm389_vm1, %v430_v6, -inf }
 0x195   : > { %438 = vmax.xlane.f32.xlu0 %v437_v8  ;;  %v433_v9 = vpop.f32.mrb[2].mxu0 }
 0x196   : > { %v1281_v10 = vpop.f32.mrb[3].mxu0 }
 0x222   : > { %v439_v15 = vpop.xlane.xlu0 %438 }
 0x223   : > { %v2047_v16 = vmax.f32 %v2044_v14, %v439_v15 }
 0x225   : > { %v441_v17 = vsub.f32 %v2044_v14, %v2047_v16  ;;  %460 = vst.msk [vmem:[#allocation2] sm:$0xff] %vm374_vm2, %v2047_v16  ;;  %446 = vperm.xlu0 %1437, %v2047_v16   ;;  %v452_v16 = vld [vmem:[#allocation3] sm:$0xff] }
 0x227   : > { %v442_v31 = vmul.f32 1.442695, %v441_v17 }
 0x2a4   : > { %v447_v20 = vpop.permute.xlu0 %446 }
 0x2a5   : > { %v449_v21 = vsub.f32 %v430_v6, %v447_v20 }
 0x2a7   : > { %v450_v22 = vmul.f32 1.442695, %v449_v21 }
 0x2a9   : > { %1443 = vpow2.f32 %v450_v22 }
 0x2b3   : > { %v2058_v25 = vpop.eup %1443 }
 0x2b4   : > { %v461_v27 = vpack.c.bf16 %v2058_v25, %v2058_v25  ;;  %v454_v3 = vsel %vm389_vm1, %v2058_v25, 0.0 }
 0x2b6   : > { %1285 = vmatmul.mubr.msk.bf16.vlgmr.msra.gmra.mrb[0].mxu1 %vm389_vm1, %v461_v27 }
 0x2b7   : > { %1289 = vmatpush3.bf16.xpose.msra.mxu1 %v532_v26  ;;  %1290 = vmatprep.mubr.msk.bf16.mxu1 %vm1713_vm0, %v1712_v0 }
 0x2b8   : > { %1300 = vmatprep.subr.bf16.mxu1 %v1712_v0 }
 0x2be   : > { %1291 = vmatmul.mubr.msk.bf16.vlgmr.msra.gmra.mrb[4].mxu1 %vm389_vm1, %v522_v24 }
 0x2bf   : > { %1301 = vmatpush3.bf16.xpose.msra.mxu1 %v674_v30  ;;  %1302 = vmatprep.mubr.msk.bf16.mxu1 %vm1713_vm0, %v1712_v0 }
 0x2c0   : > { %1312 = vmatprep.subr.bf16.mxu1 %v1712_v0 }
 0x2c6   : > { %1303 = vmatmul.mubr.msk.bf16.vlgmr.msra.gmra.mrb[8].mxu1 %vm389_vm1, %v667_v29 }
 0x2c7   : > { %1313 = vmatpush3.bf16.xpose.msra.mxu1 %v813_v32  ;;  %1314 = vmatprep.mubr.msk.bf16.mxu1 %vm1713_vm0, %v1712_v0 }
 0x2c8   : > { %1324 = vmatprep.subr.bf16.mxu1 %v1712_v0 }
 0x2ce   : > { %1315 = vmatmul.mubr.msk.bf16.vlgmr.msra.gmra.mrb[12].mxu1 %vm389_vm1, %v806_v33 }
 0x2cf   : > { %1328 = vmatprep.mubr.msk.bf16.mxu1 %vm1713_vm0, %v1712_v0 }
 0x389   : > { %v2080_v34 = vpop.f32.mrb[0].mxu1 }
 0x38a   : > { %v1286_v35 = vpop.f32.mrb[1].mxu1 }
 0x38b   : > { %v506_v36 = vpop.f32.mrb[2].mxu1 }
 0x38c   : > { %v1287_v37 = vpop.f32.mrb[3].mxu1 }
 0x391   : > { %v568_v38 = vpop.f32.mrb[4].mxu1 }
 0x392   : > { %v1292_v39 = vpop.f32.mrb[5].mxu1  ;;  %v576_v40 = vsel %vm389_vm1, %v568_v38, -inf }
 0x393   : > { %577 = vmax.xlane.f32.xlu1 %v576_v40  ;;  %v571_v41 = vpop.f32.mrb[6].mxu1 }
 0x394   : > { %v1293_v42 = vpop.f32.mrb[7].mxu1 }
 0x399   : > { %v710_v43 = vpop.f32.mrb[8].mxu1 }
 0x39a   : > { %v1304_v44 = vpop.f32.mrb[9].mxu1  ;;  %v718_v45 = vsel %vm389_vm1, %v710_v43, -inf }
 0x39b   : > { %719 = vmax.xlane.f32.xlu0 %v718_v45  ;;  %v713_v46 = vpop.f32.mrb[10].mxu1 }
 0x39c   : > { %v1305_v47 = vpop.f32.mrb[11].mxu1 }
 0x39d   : > { %v734_v47 = vld [vmem:[#allocation3 + $0x10] sm:$0xff] }
 0x3a1   : > { %v849_v48 = vpop.f32.mrb[12].mxu1 }
 0x3a2   : > { %v1316_v49 = vpop.f32.mrb[13].mxu1  ;;  %v857_v50 = vsel %vm389_vm1, %v849_v48, -inf }
 0x3a3   : > { %858 = vmax.xlane.f32.xlu1 %v857_v50  ;;  %v852_v51 = vpop.f32.mrb[14].mxu1 }
 0x3a4   : > { %v1317_v52 = vpop.f32.mrb[15].mxu1 }
 0x3a5   : > { %v873_v52 = vld [vmem:[#allocation3 + $0x18] sm:$0xff] }
 0x420   : > { %v578_v54 = vpop.xlane.xlu1 %577 }
 0x421   : > { %v579_v55 = vmax.f32 %v575_v53, %v578_v54 }
 0x423   : > { %599 = vst.msk [vmem:[#allocation2 + $0x8] sm:$0xff] %vm374_vm2, %v579_v55  ;;  %585 = vperm.xlu1 %1438, %v579_v55   ;;  %v580_v2 = vsub.f32 %v575_v53, %v579_v55  ;;  %v509_v53 = vld [vmem:[#allocation4] sm:$0xff] }
 0x425   : > { %v581_v4 = vmul.f32 1.442695, %v580_v2 }
 0x427   : > { %604 = vrot.lane.b32.xlu1 %v1243_v56, %s1716_s24  ;;  %1445 = vpow2.f32 %v581_v4 }
 0x428   : > { %v720_v58 = vpop.xlane.xlu0 %719 }
 0x429   : > { %v721_v59 = vmax.f32 %v2086_v57, %v720_v58 }
 0x42b   : > { %v722_v60 = vsub.f32 %v2086_v57, %v721_v59  ;;  %741 = vst.msk [vmem:[#allocation2 + $0x10] sm:$0xff] %vm374_vm2, %v721_v59  ;;  %727 = vperm.xlu0 %1437, %v721_v59  }
 0x42d   : > { %v723_v35 = vmul.f32 1.442695, %v722_v60 }
 0x430   : > { %v859_v62 = vpop.xlane.xlu1 %858 }
 0x431   : > { %v860_v63 = vmax.f32 %v856_v61, %v859_v62  ;;  %v2097_v5 = vpop.eup %1445 }
 0x433   : > { %v861_v1 = vsub.f32 %v856_v61, %v860_v63  ;;  %880 = vst.msk [vmem:[#allocation2 + $0x18] sm:$0xff] %vm374_vm2, %v860_v63  ;;  %866 = vperm.xlu1 %1438, %v860_v63  }
 0x435   : > { %v862_v36 = vmul.f32 1.442695, %v861_v1 }
 0x437   : > { %743 = vrot.lane.b32.xlu1 %v1243_v56, %s1717_s26 }
 0x43b   : > { %882 = vrot.lane.b32.xlu1 %v1243_v56, %s1718_s1 }
 0x45f   : > { %455 = vadd.xlane.f32.xlu1 %v454_v3 }
 0x470   : > { %655 = vperm.xlu1 %1438, %v2097_v5  }
 0x4a2   : > { %v586_v6 = vpop.permute.xlu1 %585 }
 0x4a3   : > { %v588_v7 = vsub.f32 %v568_v38, %v586_v6 }
 0x4a5   : > { %v589_v8 = vmul.f32 1.442695, %v588_v7 }
 0x4a6   : > { %v605_v9 = vpop.permute.xlu1 %604 }
 0x4a7   : > { %1447 = vpow2.f32 %v589_v8  ;;  %v610_v10 = vsel %vm465_vm3, %v605_v9, 0 }
 0x4a8   : > { %1295 = vmatpush3.bf16.msra.mxu0 %v610_v10 }
 0x4a9   : > { %1306 = vmatprep.subr.bf16.mxu0 %v1712_v0 }
 0x4aa   : > { %v728_v11 = vpop.permute.xlu0 %727 }
 0x4ab   : > { %v730_v12 = vsub.f32 %v710_v43, %v728_v11  ;;  %v592_v43 = vld [vmem:[#allocation3 + $0x8] sm:$0xff] }
 0x4ac   : > { %v593_v44 = vmul.f32 %v2097_v5, %v592_v43 }
 0x4ad   : > { %v731_v13 = vmul.f32 1.442695, %v730_v12 }
 0x4af   : > { %1449 = vpow2.f32 %v731_v13 }
 0x4b1   : > { %v1448_v15 = vpop.eup %1447 }
 0x4b2   : > { %v867_v18 = vpop.permute.xlu1 %866  ;;  %v594_v19 = vsel %vm389_vm1, %v1448_v15, 0.0  ;;  %v600_v20 = vpack.c.bf16 %v1448_v15, %v1448_v15  ;;  %v1441_v15 = vld [vmem:[#allocation11] sm:$0xff]  }
 0x4b3   : > { %v869_v21 = vsub.f32 %v849_v48, %v867_v18  ;;  %595 = vadd.xlane.f32.xlu0 %v594_v19  ;;  %1325 = vmatpush3.bf16.msra.mxu1 %v1441_v15  ;;  %v1442_v18 = vld [vmem:[#allocation11 + $0x8] sm:$0xff]  }
 0x4b4   : > { %1297 = vmatmul.mubr.msk.bf16.vlgmr.msra.gmra.mrb[4].mxu0 %vm389_vm1, %v600_v20  ;;  %1326 = vmatprep.subr.bf16.mxu1 %v1712_v0 }
 0x4b5   : > { %v870_v22 = vmul.f32 1.442695, %v869_v21  ;;  %1308 = vmatprep.mubr.msk.bf16.mxu0 %vm1713_vm0, %v1712_v0 }
 0x4b6   : > { %v744_v23 = vpop.permute.xlu1 %743 }
 0x4b7   : > { %1451 = vpow2.f32 %v870_v22  ;;  %v749_v24 = vsel %vm465_vm3, %v744_v23, 0  ;;  %1327 = vmatpush3.bf16.msra.mxu1 %v1442_v18 }
 0x4b8   : > { %1307 = vmatpush3.bf16.msra.mxu0 %v749_v24  ;;  %1453 = vpow2.f32 %v442_v31 }
 0x4b9   : > { %v1450_v25 = vpop.eup %1449  ;;  %1318 = vmatprep.subr.bf16.mxu0 %v1712_v0  ;;  %1455 = vpow2.f32 %v723_v35 }
 0x4ba   : > { %v736_v26 = vsel %vm389_vm1, %v1450_v25, 0.0  ;;  %v742_v27 = vpack.c.bf16 %v1450_v25, %v1450_v25  ;;  %v883_v28 = vpop.permute.xlu1 %882  ;;  %1457 = vpow2.f32 %v862_v36 }
 0x4bb   : > { %737 = vadd.xlane.f32.xlu0 %v736_v26  ;;  %v888_v29 = vsel %vm465_vm3, %v883_v28, 0 }
 0x4bc   : > { %1309 = vmatmul.mubr.msk.bf16.vlgmr.msra.gmra.mrb[8].mxu0 %vm389_vm1, %v742_v27 }
 0x4bd   : > { %1319 = vmatpush3.bf16.msra.mxu0 %v888_v29  ;;  %1320 = vmatprep.mubr.msk.bf16.mxu0 %vm1713_vm0, %v1712_v0 }
 0x4c1   : > { %v1452_v30 = vpop.eup %1451 }
 0x4c2   : > { %v875_v32 = vsel %vm389_vm1, %v1452_v30, 0.0  ;;  %v881_v33 = vpack.c.bf16 %v1452_v30, %v1452_v30  ;;  %v1454_v37 = vpop.eup %1453 }
 0x4c3   : > { %876 = vadd.xlane.f32.xlu1 %v875_v32  ;;  %v1456_v38 = vpop.eup %1455  ;;  %v453_v17 = vmul.f32 %v1454_v37, %v452_v16 }
 0x4c4   : > { %1321 = vmatmul.mubr.msk.bf16.vlgmr.msra.gmra.mrb[12].mxu0 %vm389_vm1, %v881_v33  ;;  %v1458_v14 = vpop.eup %1457  ;;  %v735_v48 = vmul.f32 %v1456_v38, %v734_v47 }
 0x4c5   : > { %v874_v54 = vmul.f32 %v1458_v14, %v873_v52 }
 0x4d1   : > { %512 = vperm.xlu0 %1437, %v1454_v37  }
 0x4d5   : > { %794 = vperm.xlu0 %1437, %v1456_v38  }
 0x4d9   : > { %933 = vperm.xlu0 %1437, %v1458_v14  }
 0x4ec   : > { %v456_v39 = vpop.xlane.xlu1 %455 }
 0x4ed   : > { %v457_v40 = vadd.f32 %v456_v39, %v453_v17 }
 0x4ef   : > { %459 = vst.msk [vmem:[#allocation3] sm:$0xff] %vm374_vm2, %v457_v40 }
 0x4f0   : > { %v656_v51 = vpop.permute.xlu1 %655 }
 0x4f6   : > { %v947_v41 = vld [vmem:[#allocation3] sm:$0xff] }
 0x4f7   : > { %1459 = vrcp.f32 %v947_v41 }
 0x501   : > { %v1460_v42 = vpop.eup %1459 }
 0x502   : > { %952 = vperm.xlu0 %1437, %v1460_v42  }
 0x540   : > { %v596_v45 = vpop.xlane.xlu0 %595 }
 0x541   : > { %v597_v46 = vadd.f32 %v596_v45, %v593_v44  ;;  %v1249_v44 = vld [vmem:[#allocation13] ss:$0 sm:$0xff] }
 0x543   : > { %598 = vst.msk [vmem:[#allocation3 + $0x8] sm:$0xff] %vm374_vm2, %v597_v46 }
 0x548   : > { %v738_v49 = vpop.xlane.xlu0 %737 }
 0x549   : > { %v739_v50 = vadd.f32 %v738_v49, %v735_v48 }
 0x54a   : > { %v957_v3 = vld [vmem:[#allocation3 + $0x8] sm:$0xff] }
 0x54b   : > { %740 = vst.msk [vmem:[#allocation3 + $0x10] sm:$0xff] %vm374_vm2, %v739_v50 }
 0x550   : > { %v877_v55 = vpop.xlane.xlu1 %876  ;;  %v513_v56 = vpop.permute.xlu0 %512 }
 0x551   : > { %v878_v57 = vadd.f32 %v877_v55, %v874_v54  ;;  %v515_v58 = vmul.f32 %v513_v56, %v509_v53 }
 0x552   : > { %v967_v59 = vld [vmem:[#allocation3 + $0x10] sm:$0xff] }
 0x553   : > { %879 = vst.msk [vmem:[#allocation3 + $0x18] sm:$0xff] %vm374_vm2, %v878_v57  ;;  %v516_v60 = vadd.f32 %v515_v58, %v2080_v34  ;;  %1461 = vrcp.f32 %v967_v59 }
 0x554   : > { %1463 = vrcp.f32 %v957_v3  ;;  %v795_v23 = vpop.permute.xlu0 %794 }
 0x555   : > { %517 = vst.msk [vmem:[#allocation4] sm:$0xff] %vm389_vm1, %v516_v60 }
 0x558   : > { %v934_v28 = vpop.permute.xlu0 %933 }
 0x55a   : > { %v977_v34 = vld [vmem:[#allocation3 + $0x18] sm:$0xff] }
 0x55b   : > { %1465 = vrcp.f32 %v977_v34 }
 0x55c   : > { %v652_v19 = vld [vmem:[#allocation4] sm:$0xff] }
 0x55d   : > { %v1462_v61 = vpop.eup %1461  ;;  %v658_v20 = vmul.f32 %v656_v51, %v652_v19 }
 0x55e   : > { %972 = vperm.xlu0 %1437, %v1462_v61   ;;  %v1464_v12 = vpop.eup %1463 }
 0x565   : > { %v1466_v13 = vpop.eup %1465 }
 0x581   : > { %v953_v32 = vpop.permute.xlu0 %952 }
 0x587   : > { %v646_v62 = vpop.f32.mrb[4].mxu0 }
 0x588   : > { %v1298_v63 = vpop.f32.mrb[5].mxu0  ;;  %660 = vrot.lane.b32.xlu1 %v646_v62, %s1719_s13 }
 0x589   : > { %v649_v1 = vpop.f32.mrb[6].mxu0 }
 0x58a   : > { %v1299_v2 = vpop.f32.mrb[7].mxu0 }
 0x58f   : > { %v785_v4 = vpop.f32.mrb[8].mxu0 }
 0x590   : > { %v1310_v5 = vpop.f32.mrb[9].mxu0  ;;  %799 = vrot.lane.b32.xlu1 %v785_v4, %s1720_s22 }
 0x591   : > { %v788_v6 = vpop.f32.mrb[10].mxu0 }
 0x592   : > { %v1311_v7 = vpop.f32.mrb[11].mxu0 }
 0x597   : > { %v924_v8 = vpop.f32.mrb[12].mxu0 }
 0x598   : > { %v1322_v9 = vpop.f32.mrb[13].mxu0  ;;  %938 = vrot.lane.b32.xlu1 %v924_v8, %s1721_s7 }
 0x599   : > { %v927_v10 = vpop.f32.mrb[14].mxu0 }
 0x59a   : > { %v1323_v11 = vpop.f32.mrb[15].mxu0 }
 0x59c   : > { %962 = vperm.xlu1 %1438, %v1464_v12  }
 0x5a0   : > { %982 = vperm.xlu1 %1438, %v1466_v13  }
 0x5dd   : > { %v973_v14 = vpop.permute.xlu0 %972 }
 0x5fa   : > { %v661_v21 = vpop.permute.xlu1 %660 }
 0x5fb   : > { %v663_v22 = vadd.f32 %v661_v21, %v658_v20 }
 0x5fd   : > { %665 = vst.msk [vmem:[#allocation4] sm:$0xff] %vm664_vm5, %v663_v22 }
 0x602   : > { %v800_v26 = vpop.permute.xlu1 %799 }
 0x604   : > { %v791_v24 = vld [vmem:[#allocation4] sm:$0xff] }
 0x605   : > { %v797_v25 = vmul.f32 %v795_v23, %v791_v24 }
 0x607   : > { %v802_v27 = vadd.f32 %v800_v26, %v797_v25 }
 0x609   : > { %804 = vst.msk [vmem:[#allocation4] sm:$0xff] %vm803_vm6, %v802_v27 }
 0x60a   : > { %v939_v0 = vpop.permute.xlu1 %938 }
 0x610   : > { %v930_v29 = vld [vmem:[#allocation4] sm:$0xff] }
 0x611   : > { %v936_v30 = vmul.f32 %v934_v28, %v930_v29 }
 0x613   : > { %v941_v31 = vadd.f32 %v939_v0, %v936_v30 }
 0x615   : > { %943 = vst.msk [vmem:[#allocation4] sm:$0xff] %vm942_vm7, %v941_v31 }
 0x61b   : > { %v963_v36 = vpop.permute.xlu1 %962 }
 0x61c   : > { %v949_v33 = vld [vmem:[#allocation4] sm:$0xff] }
 0x61d   : > { %v955_v35 = vmul.f32 %v953_v32, %v949_v33 }
 0x61f   : > { %956 = vst.msk [vmem:[#allocation4] sm:$0xff] %vm389_vm1, %v955_v35  ;;  %v983_v39 = vpop.permute.xlu1 %982 }
 0x626   : > { %v959_v37 = vld [vmem:[#allocation4] sm:$0xff] }
 0x627   : > { %v965_v38 = vmul.f32 %v963_v36, %v959_v37 }
 0x629   : > { %966 = vst.msk [vmem:[#allocation4] sm:$0xff] %vm664_vm5, %v965_v38 }
 0x630   : > { %v969_v16 = vld [vmem:[#allocation4] sm:$0xff] }
 0x631   : > { %v975_v17 = vmul.f32 %v973_v14, %v969_v16 }
 0x633   : > { %976 = vst.msk [vmem:[#allocation4] sm:$0xff] %vm803_vm6, %v975_v17 }
 0x63a   : > { %v979_v40 = vld [vmem:[#allocation4] sm:$0xff] }
 0x63b   : > { %v985_v41 = vmul.f32 %v983_v39, %v979_v40 }
 0x63d   : > { %986 = vst.msk [vmem:[#allocation4] sm:$0xff] %vm942_vm7, %v985_v41 }
 0x644   : > { %v987_v42 = vld [vmem:[#allocation4] sm:$0xff] }
 0x645   : > { %v988_v43 = vpack.c.bf16 %v987_v42, %v987_v42 }
 0x647   : > { %1329 = vmatmul.mubr.msk.bf16.vlgmr.msra.gmra.mrb[16].mxu1 %vm383_vm4, %v988_v43 }
 0x71a   : > { %v1050_v45 = vpop.f32.mrb[16].mxu1 }
 0x71b   : > { %v1051_v46 = vadd.f32 %v1249_v44, %v1050_v45  ;;  %v1330_v47 = vpop.f32.mrb[17].mxu1 }
 0x71c   : > { %v1053_v48 = vpop.f32.mrb[18].mxu1 }
 0x71d   : > { %v1331_v49 = vpop.f32.mrb[19].mxu1  ;;  %1056 = vst.msk [vmem:[%s367_s15] sm:$0xff] %vm383_vm4, %v1051_v46 }
 0x71e   : > { %1626 = shalt.err (!%p1623_p8)
}
 0x71f   : > { %s1627_s16 = scalar_lea.hbm %s2141_s11, 128  ;;  %s1631_s25 = scalar_lea.hbm %s2196_s5, 256 }
 0x720   : > { %p1628_p0 = scmp.ne.s32.totalorder %s2141_s11, %s1627_s16  ;;  %p1632_p7 = scmp.lt.u32.totalorder %s2141_s11, %s2196_s5 }
 0x721   : > { %p1633_p13 = scmp.lt.u32.totalorder %s1631_s25, %s1627_s16  ;;  %p1635_p2 = scmp.lt.u32.totalorder %s1627_s16, %s2141_s11 }
 0x722   : > { %p1629_p5 = pnand %p1628_p0, %p2239_p4 }
 0x723   : > { %p1634_p9 = por %p1633_p13, %p1632_p7 }
 0x724   : > { %p1630_p12 = pneg %p1629_p5 }
 0x725   : > { %p1636_p1 = por %p1635_p2, %p1634_p9 }
 0x727   : > { %p1637_p3 = pnand %p1636_p1, %p1630_p12 }
 0x729   : > { %1640 = shalt.err (!%p1637_p3)
}
 0x72a   : > { %1346 = dma.vmem_to_hbm [thread:$0]  (%p2239_p4), %s2143_s30, 128, %s2141_s11, %s1058_s21  }
 0x72b PF: > { %s1084_s1 = sand.u32 1, %s1683_s18   ;;  %p2240_p11 = scmp.ne.s32.totalorder %s2216_s27, 0 }
 0x72c   : > { %p2241_p10 = scmp.ge.s32.totalorder %s1703_s23, 2  ;;  %s1085_s13 = scalar_lea.sflag [#allocation7], %s1084_s1 }
 0x72e   : > { %p1366_p6 = pnand %p2241_p10, %p2240_p11 }
 0x730   : > { %1678 = dma.done.wait (!%p1366_p6), %s1085_s13, 128  }
 0x731   : > { %1680 = vsyncadd (!%p1366_p6), %s1085_s13, 4294967168  ;;  %s25_s23 = sadd.s32 1, %s1703_s23   ;;  %s2242_s9 = sld [smem:[#allocation21_spill]] }
 0x732   : > { %p22_p8 = scmp.ge.s32.totalorder %s25_s23, 4   ;;  %s2243_s21 = sld [smem:[#allocation19_spill]] }
 0x733   : > { %s2244_s22 = sld [smem:[#allocation20_spill]]  ;;  %s2245_s18 = smov %s1687_s19 }
 0x734   : > { %s2246_s19 = smov %s1691_s20  ;;  %24 = sbr.rel (!%p22_p8) target bundleno = 13 (0xd), region = 131 }
 0x737   : > { %s2247_s20 = smov %s2242_s9 }
 0x73b   :  { %1090 = vsyncpa [#allocation6], 1 }
 0x73c   :  { %1092 = vsyncpa [#allocation6 + $0x1], 1 }
 0x73d   :  { %1093 = vsyncpa [#allocation9], 1 }
 0x73e   :  { %1095 = vsyncpa [#allocation9 + $0x1], 1 }
 0x73f   :  { %1096 = vsyncpa [#allocation12], 1 }
 0x740   :  { %1097 = vsyncpa [#allocation7], 1 }
 0x741   :  { %1099 = vsyncpa [#allocation7 + $0x1], 1 }

</bundles_post_ra>
